<compile_context>
chip_gen: v6e
topology: v6e:2x2x1
jax: 0.10.0
libtpu: 0.0.40
codegen_flags: <defaults>
</compile_context>

<pallas_src>
import functools

import jax
import jax.numpy as jnp
from jax.experimental import pallas as pl
from jax.experimental.pallas import tpu as pltpu


def _self_attn_agg_kernel(x_ref, wqk_ref, bqk_ref, wv_ref, bv_ref, out_ref, *,
                          scale, hd):
    # x_ref block: (A, BB, E) f32.  wqk: (E, 2*Hd) bf16, bqk: (1, 2*Hd) f32.
    # wv: (E, E) bf16, bv: (1, E) f32.
    A, BB, E = x_ref.shape

    x = x_ref[...]                                    # (A, BB, E) f32
    x2 = x.reshape(A * BB, E)

    # Fused Q|K projection: one MXU pass, bf16 x bf16 -> f32 accumulation.
    qk = jnp.dot(x2.astype(wqk_ref.dtype), wqk_ref[...],
                 preferred_element_type=jnp.float32) + bqk_ref[...]
    q = qk[:, :hd].reshape(A, BB, hd)
    k = qk[:, hd:].reshape(A, BB, hd)

    # Batch-major (BB, A, Hd) for a single batched scores matmul (tiny relayout,
    # only A*BB*Hd elements — the big (A,BB,E) x slab is never transposed).
    q_t = jnp.transpose(q, (1, 0, 2))
    k_t = jnp.transpose(k, (1, 0, 2))
    s = jnp.einsum("bqd,bkd->bqk", q_t, k_t,
                   preferred_element_type=jnp.float32) * scale   # (BB, Aq, Ak)

    # Exact softmax (rows must sum to exactly 1 for the bv hoist to be exact).
    s = s - jnp.max(s, axis=-1, keepdims=True)
    p = jnp.exp(s)
    attn = p / jnp.sum(p, axis=-1, keepdims=True)                # (BB, Aq, Ak)

    # Average over the query axis BEFORE the values projection.
    w = jnp.mean(attn, axis=1)                                   # (BB, Ak)
    # ctx[b, e] = sum_a w[b, a] * x[a, b, e] : A broadcast-FMAs on (BB,E) slabs.
    ctx = jnp.sum(w.T[:, :, None] * x, axis=0)                   # (BB, E) f32

    # out = mean_q(attn @ (x@Wv + bv)) == (mean_q(attn) @ x) @ Wv + bv
    out_ref[...] = (jnp.dot(ctx.astype(wv_ref.dtype), wv_ref[...],
                            preferred_element_type=jnp.float32)
                    + bv_ref[...]).astype(out_ref.dtype)


def self_attention_aggregator(x, wq, bq, wk, bk, wv, bv, hidden_size,
                              weight_dtype=jnp.bfloat16):
    """x: (agg, batch, C, H, W) float32. Returns (batch, C, H, W) float32."""
    A, B, C, H, W = x.shape
    E = C * H * W
    Hd = wq.shape[0]

    # Free view: fold spatial dims; torch's transpose(0,1) lives in index_map.
    x3 = x.reshape(A, B, E)

    # PyTorch Linear weights are (out, in): pre-transpose to (in, out).
    # Fuse Wq|Wk into one (E, 2*Hd) matrix; cast weights to bf16 (halves the
    # dominant HBM weight bytes; MXU consumes bf16 natively on v5e/v6e/v7x).
    wqk_t = jnp.concatenate([wq.T, wk.T], axis=1).astype(weight_dtype)   # (E, 2*Hd)
    bqk = jnp.concatenate([bq, bk]).reshape(1, 2 * Hd).astype(jnp.float32)
    wv_t = wv.T.astype(weight_dtype)                                     # (E, E)
    bv2 = bv.reshape(1, E).astype(jnp.float32)

    # Batch chunking: up to 128 rows per step (multiple of 8 to satisfy the
    # sublane tiling); pad a ragged large batch up to a multiple of 8 instead
    # of emitting one unbounded fat block.
    if B % 8 == 0:
        b_pad = B
    elif B > 8:
        b_pad = ((B + 7) // 8) * 8
    else:
        b_pad = B                       # tiny batch: single full-extent block
    if b_pad % 8 == 0:
        bb = next(c for c in (128, 64, 32, 16, 8) if b_pad % c == 0)
    else:
        bb = b_pad
    if b_pad != B:
        x3 = jnp.concatenate(
            [x3, jnp.zeros((A, b_pad - B, E), x3.dtype)], axis=1)

    kernel = functools.partial(_self_attn_agg_kernel,
                               scale=1.0 / (float(hidden_size) ** 0.5),
                               hd=Hd)

    out = pl.pallas_call(
        kernel,
        out_shape=jax.ShapeDtypeStruct((b_pad, E), jnp.float32),
        grid_spec=pltpu.PrefetchScalarGridSpec(
            num_scalar_prefetch=0,
            grid=(b_pad // bb,),
            in_specs=[
                pl.BlockSpec((A, bb, E), lambda i: (0, i, 0)),   # x (A, B, E)
                pl.BlockSpec(wqk_t.shape, lambda i: (0, 0)),     # Wq|Wk fused
                pl.BlockSpec(bqk.shape, lambda i: (0, 0)),       # bq|bk fused
                pl.BlockSpec(wv_t.shape, lambda i: (0, 0)),      # Wv
                pl.BlockSpec(bv2.shape, lambda i: (0, 0)),       # bv
            ],
            out_specs=pl.BlockSpec((bb, E), lambda i: (i, 0)),
        ),
        compiler_params=pltpu.CompilerParams(
            dimension_semantics=("parallel",)),
    )(x3, wqk_t, bqk, wv_t, bv2)

    return out[:B].reshape(B, C, H, W)


def _reference(x, wq, bq, wk, bk, wv, bv, hidden_size):
    # Pure-JAX f32 reference matching the PyTorch module.
    A, B, C, H, W = x.shape
    xf = jnp.transpose(x, (1, 0, 2, 3, 4)).reshape(B, A, -1)
    q = xf @ wq.T + bq
    k = xf @ wk.T + bk
    v = xf @ wv.T + bv
    scores = jnp.einsum("bqh,bkh->bqk", q, k) / (hidden_size ** 0.5)
    attn = jax.nn.softmax(scores, axis=-1)
    out = jnp.einsum("bqk,bke->bqe", attn, v)
    out = jnp.mean(out, axis=1)
    return out.reshape(B, C, H, W)


if __name__ == "__main__":
    agg, batch, channels, height, width = 8, 2, 4, 16, 16
    encoding_size = channels * height * width      # 1024
    hidden_size = 32

    key = jax.random.PRNGKey(0)
    kx, kwq, kbq, kwk, kbk, kwv, kbv = jax.random.split(key, 7)

    x = jax.random.normal(kx, (agg, batch, channels, height, width), jnp.float32)

    # PyTorch Linear convention: weight (out, in), bias (out,)
    s_e = 1.0 / (encoding_size ** 0.5)
    wq = jax.random.uniform(kwq, (hidden_size, encoding_size), jnp.float32, -s_e, s_e)
    bq = jax.random.uniform(kbq, (hidden_size,), jnp.float32, -s_e, s_e)
    wk = jax.random.uniform(kwk, (hidden_size, encoding_size), jnp.float32, -s_e, s_e)
    bk = jax.random.uniform(kbk, (hidden_size,), jnp.float32, -s_e, s_e)
    wv = jax.random.uniform(kwv, (encoding_size, encoding_size), jnp.float32, -s_e, s_e)
    bv = jax.random.uniform(kbv, (encoding_size,), jnp.float32, -s_e, s_e)

    out = self_attention_aggregator(x, wq, bq, wk, bk, wv, bv, hidden_size)
    out = jax.block_until_ready(out)

    ref = _reference(x, wq, bq, wk, bk, wv, bv, hidden_size)
    assert out.shape == (batch, channels, height, width)
    # Tolerance reflects bf16 weight/activation rounding on the MXU inputs
    # (all accumulation and softmax math is f32); measured error is ~1e-3.
    max_err = float(jnp.max(jnp.abs(out - ref)))
    assert jnp.allclose(out, ref, atol=1e-2, rtol=1e-2), max_err

    print("KERNEL_OK")
</pallas_src>

<mosaic_0001>
module attributes {stable_mosaic.version = 11 : i64} {
  func.func @_self_attn_agg_kernel(%arg0: i32, %arg1: memref<8x2x1024xf32, #tpu.memory_space<vmem>>, %arg2: memref<1024x64xbf16, #tpu.memory_space<vmem>>, %arg3: memref<1x64xf32, #tpu.memory_space<vmem>>, %arg4: memref<1024x1024xbf16, #tpu.memory_space<vmem>>, %arg5: memref<1x1024xf32, #tpu.memory_space<vmem>>, %arg6: memref<2x1024xf32, #tpu.memory_space<vmem>>) attributes {dimension_semantics = [#tpu.dimension_semantics<parallel>], iteration_bounds = array<i64: 1>, scalar_prefetch = 0 : i64, scratch_operands = 0 : i64, tpu.core_type = #tpu.core_type<tc>, window_params = [{transform_indices = @transform_0, window_bounds = array<i64: 8, 2, 1024>}, {pipeline_mode = #tpu.pipeline_mode<synchronous>, transform_indices = @transform_1, window_bounds = array<i64: 1024, 64>}, {pipeline_mode = #tpu.pipeline_mode<synchronous>, transform_indices = @transform_2, window_bounds = array<i64: 1, 64>}, {pipeline_mode = #tpu.pipeline_mode<synchronous>, transform_indices = @transform_3, window_bounds = array<i64: 1024, 1024>}, {pipeline_mode = #tpu.pipeline_mode<synchronous>, transform_indices = @transform_4, window_bounds = array<i64: 1, 1024>}, {transform_indices = @transform_5, window_bounds = array<i64: 2, 1024>}]} {
    %c0 = arith.constant 0 : index
    %c0_0 = arith.constant 0 : index
    %c0_1 = arith.constant 0 : index
    %0 = vector.load %arg1[%c0, %c0_0, %c0_1] : memref<8x2x1024xf32, #tpu.memory_space<vmem>>, vector<8x2x1024xf32>
    %1 = vector.shape_cast %0 : vector<8x2x1024xf32> to vector<16x1024xf32>
    %2 = arith.truncf %1 : vector<16x1024xf32> to vector<16x1024xbf16>
    %c0_2 = arith.constant 0 : index
    %c0_3 = arith.constant 0 : index
    %3 = vector.load %arg2[%c0_2, %c0_3] : memref<1024x64xbf16, #tpu.memory_space<vmem>>, vector<1024x64xbf16>
    %cst = arith.constant dense<0.000000e+00> : vector<16x64xf32>
    %4 = tpu.matmul %2, %3, %cst {dimension_numbers = #tpu.dot_dimension_numbers<[1], [0], [0], [1], [0, 0, 1, 1], [], []>} : vector<16x1024xbf16>, vector<1024x64xbf16>, vector<16x64xf32> -> vector<16x64xf32>
    %c0_4 = arith.constant 0 : index
    %c0_5 = arith.constant 0 : index
    %5 = vector.load %arg3[%c0_4, %c0_5] : memref<1x64xf32, #tpu.memory_space<vmem>>, vector<1x64xf32>
    %6 = vector.broadcast %5 : vector<1x64xf32> to vector<16x64xf32>
    %7 = arith.addf %4, %6 : vector<16x64xf32>
    %8 = vector.extract_strided_slice %7 {offsets = [0, 0], sizes = [16, 32], strides = [1, 1]} : vector<16x64xf32> to vector<16x32xf32>
    %9 = vector.shape_cast %8 : vector<16x32xf32> to vector<8x2x32xf32>
    %10 = vector.extract_strided_slice %7 {offsets = [0, 32], sizes = [16, 32], strides = [1, 1]} : vector<16x64xf32> to vector<16x32xf32>
    %11 = vector.shape_cast %10 : vector<16x32xf32> to vector<8x2x32xf32>
    %12 = tpu.transpose %9, [1, 0, 2] : vector<8x2x32xf32> -> vector<2x8x32xf32>
    %13 = tpu.transpose %11, [1, 0, 2] : vector<8x2x32xf32> -> vector<2x8x32xf32>
    "tpu.trace_start"() <{level = 10 : i32, message = "bqd,bkd->bqk"}> : () -> ()
    %cst_6 = arith.constant dense<0.000000e+00> : vector<2x8x8xf32>
    %14 = tpu.matmul %12, %13, %cst_6 {dimension_numbers = #tpu.dot_dimension_numbers<[2], [2], [1], [1], [0, 0, 0, 1, 1, 1], [0], [0]>} : vector<2x8x32xf32>, vector<2x8x32xf32>, vector<2x8x8xf32> -> vector<2x8x8xf32>
    "tpu.trace_stop"() : () -> ()
    %cst_7 = arith.constant 0.176776692 : f32
    %15 = vector.broadcast %cst_7 : f32 to vector<2x8x8xf32>
    %16 = arith.mulf %14, %15 : vector<2x8x8xf32>
    %cst_8 = arith.constant dense<0xFF800000> : vector<2x8xf32>
    %17 = vector.multi_reduction <maximumf>, %16, %cst_8 [2] : vector<2x8x8xf32> to vector<2x8xf32>
    %18 = vector.shape_cast %17 : vector<2x8xf32> to vector<2x8x1xf32>
    %19 = vector.broadcast %18 : vector<2x8x1xf32> to vector<2x8x8xf32>
    %20 = arith.subf %16, %19 : vector<2x8x8xf32>
    %21 = math.exp %20 : vector<2x8x8xf32>
    %cst_9 = arith.constant dense<0.000000e+00> : vector<2x8xf32>
    %22 = vector.multi_reduction <add>, %21, %cst_9 [2] : vector<2x8x8xf32> to vector<2x8xf32>
    %23 = vector.shape_cast %22 : vector<2x8xf32> to vector<2x8x1xf32>
    %24 = vector.broadcast %23 : vector<2x8x1xf32> to vector<2x8x8xf32>
    %25 = arith.divf %21, %24 : vector<2x8x8xf32>
    %cst_10 = arith.constant dense<0.000000e+00> : vector<2x8xf32>
    %26 = vector.multi_reduction <add>, %25, %cst_10 [1] : vector<2x8x8xf32> to vector<2x8xf32>
    %cst_11 = arith.constant 8.000000e+00 : f32
    %27 = vector.broadcast %cst_11 : f32 to vector<2x8xf32>
    %28 = arith.divf %26, %27 : vector<2x8xf32>
    %29 = tpu.transpose %28, [1, 0] : vector<2x8xf32> -> vector<8x2xf32>
    %30 = vector.shape_cast %29 : vector<8x2xf32> to vector<8x2x1xf32>
    %31 = vector.broadcast %30 : vector<8x2x1xf32> to vector<8x2x1024xf32>
    %32 = arith.mulf %31, %0 : vector<8x2x1024xf32>
    %cst_12 = arith.constant dense<0.000000e+00> : vector<2x1024xf32>
    %33 = vector.multi_reduction <add>, %32, %cst_12 [0] : vector<8x2x1024xf32> to vector<2x1024xf32>
    %34 = arith.truncf %33 : vector<2x1024xf32> to vector<2x1024xbf16>
    %c0_13 = arith.constant 0 : index
    %c0_14 = arith.constant 0 : index
    %35 = vector.load %arg4[%c0_13, %c0_14] : memref<1024x1024xbf16, #tpu.memory_space<vmem>>, vector<1024x1024xbf16>
    %cst_15 = arith.constant dense<0.000000e+00> : vector<2x1024xf32>
    %36 = tpu.matmul %34, %35, %cst_15 {dimension_numbers = #tpu.dot_dimension_numbers<[1], [0], [0], [1], [0, 0, 1, 1], [], []>} : vector<2x1024xbf16>, vector<1024x1024xbf16>, vector<2x1024xf32> -> vector<2x1024xf32>
    %c0_16 = arith.constant 0 : index
    %c0_17 = arith.constant 0 : index
    %37 = vector.load %arg5[%c0_16, %c0_17] : memref<1x1024xf32, #tpu.memory_space<vmem>>, vector<1x1024xf32>
    %38 = vector.broadcast %37 : vector<1x1024xf32> to vector<2x1024xf32>
    %39 = arith.addf %36, %38 : vector<2x1024xf32>
    %c0_18 = arith.constant 0 : index
    %c0_19 = arith.constant 0 : index
    %40 = vector.load %arg6[%c0_18, %c0_19] : memref<2x1024xf32, #tpu.memory_space<vmem>>, vector<2x1024xf32>
    tpu.vector_store %arg6[%c0_18, %c0_19], %39 {strides = array<i32>} : memref<2x1024xf32, #tpu.memory_space<vmem>>, vector<2x1024xf32>,
    return
  }
  func.func @transform_0(%arg0: i32) -> (i32, i32, i32) {
    %c0_i32 = arith.constant 0 : i32
    %c0_i32_0 = arith.constant 0 : i32
    %c0_i32_1 = arith.constant 0 : i32
    return %c0_i32, %arg0, %c0_i32_0 : i32, i32, i32
  }
  func.func @transform_1(%arg0: i32) -> (i32, i32) {
    %c0_i32 = arith.constant 0 : i32
    %c0_i32_0 = arith.constant 0 : i32
    %c0_i32_1 = arith.constant 0 : i32
    return %c0_i32, %c0_i32_0 : i32, i32
  }
  func.func @transform_2(%arg0: i32) -> (i32, i32) {
    %c0_i32 = arith.constant 0 : i32
    %c0_i32_0 = arith.constant 0 : i32
    %c0_i32_1 = arith.constant 0 : i32
    return %c0_i32, %c0_i32_0 : i32, i32
  }
  func.func @transform_3(%arg0: i32) -> (i32, i32) {
    %c0_i32 = arith.constant 0 : i32
    %c0_i32_0 = arith.constant 0 : i32
    %c0_i32_1 = arith.constant 0 : i32
    return %c0_i32, %c0_i32_0 : i32, i32
  }
  func.func @transform_4(%arg0: i32) -> (i32, i32) {
    %c0_i32 = arith.constant 0 : i32
    %c0_i32_0 = arith.constant 0 : i32
    %c0_i32_1 = arith.constant 0 : i32
    return %c0_i32, %c0_i32_0 : i32, i32
  }
  func.func @transform_5(%arg0: i32) -> (i32, i32) {
    %c0_i32 = arith.constant 0 : i32
    %c0_i32_0 = arith.constant 0 : i32
    return %arg0, %c0_i32 : i32, i32
  }
}

</mosaic_0001>

<bundles_post_ra>
// kernel: tpu_custom_call.1
= control target key start
LH: loop header
LB: loop body
LE: loop exit
PB: predicated region body
PF: predicated region fallthrough
CT: control target
= control target key end

     0   :  { %10 = vsyncpa [#allocation3], 0  ;;  %s7780_s0 = inlined_call_operand.hbm [shape: f32[8,2,1024], index: 0, kind: input, shape index: {}]   ;;  %s7781_s1 = inlined_call_operand.vmem [shape: bf16[1024,64], index: 1, kind: input, shape index: {}]   ;;  %s7782_s2 = inlined_call_operand.hbm [shape: f32[1,64], index: 2, kind: input, shape index: {}]   ;;  %s7783_s3 = inlined_call_operand.hbm [shape: bf16[1024,1024], index: 3, kind: input, shape index: {}]   ;;  %s7784_s4 = inlined_call_operand.hbm [shape: f32[1,1024], index: 4, kind: input, shape index: {}]   ;;  %s7785_s5 = inlined_call_operand.hbm [shape: f32[2,1024], index: 5, kind: output, shape index: {}]  }
   0x1   :  { %11 = vsyncpa [#allocation6], 0 }
   0x2   :  { %12 = vsyncpa [#allocation9], 0 }
   0x3   :  { %13 = vsyncpa [#allocation4], 0  ;;  %s6748_s18 = smov [#allocation5]   ;;  %s6749_s20 = smov [#allocation2]  }
   0x4   :  { %s34_s19 = sshll.u32 %s6748_s18, 4  ;;  %s19_s21 = sshll.u32 %s6749_s20, 4  ;;  %s35_s19 = int_to_ptr.vmem [resolvable:$true] %s34_s19  ;;  %s20_s21 = int_to_ptr.vmem [resolvable:$true] %s19_s21 }
   0x5   :  { %s6648_s22 = scalar_lea.vmem %s35_s19, 16  ;;  %s6652_s23 = scalar_lea.vmem %s35_s19, 32 }
   0x6   :  { %p6649_p0 = scmp.ne.s32.totalorder %s35_s19, %s6648_s22  ;;  %p6653_p1 = scmp.lt.s32.totalorder %s35_s19, %s35_s19 }
   0x7   :  { %p6654_p2 = scmp.lt.s32.totalorder %s6652_s23, %s6648_s22 }
   0x9   :  { %p6655_p3 = por %p6654_p2, %p6653_p1 }
   0xb   :  { %p6656_p4 = pnand %p6655_p3, %p6649_p0 }
   0xd   :  { %6659 = shalt.err (!%p6656_p4)
}
   0xe   :  { %37 = dma.hbm_to_vmem [thread:$0]  %s7782_s2, 16, %s35_s19, [#allocation6]  }
   0xf   :  { %s6668_s26 = scalar_lea.vmem %s20_s21, 2048  ;;  %p6673_p6 = scmp.lt.s32.totalorder %s20_s21, %s20_s21 }
  0x10   :  { %p6669_p5 = scmp.ne.s32.totalorder %s20_s21, %s6668_s26  ;;  %p6674_p7 = scmp.lt.s32.totalorder %s6668_s26, %s6668_s26 }
  0x12   :  { %p6675_p8 = por %p6674_p7, %p6673_p6 }
  0x14   :  { %p6676_p9 = pnand %p6675_p8, %p6669_p5 }
  0x16   :  { %6679 = shalt.err (!%p6676_p9)
}
  0x17   :  { %s6750_s27 = smov 256   ;;  %s6751_s28 = smov 16  }
  0x18   :  { %25 = dma.hbm_to_vmem [thread:$0]  %s7780_s0, 2048, %s20_s21, [#allocation3], %s6750_s27, %s6750_s27, %s6751_s28  }
  0x19   :  { %s6752_s6 = smov [#allocation7]  }
  0x1a   :  { %s43_s7 = sshll.u32 %s6752_s6, 4  ;;  %s44_s7 = int_to_ptr.vmem [resolvable:$true] %s43_s7 }
  0x1b   :  { %s6688_s8 = scalar_lea.vmem %s44_s7, 65536  ;;  %p6693_p11 = scmp.lt.s32.totalorder %s44_s7, %s44_s7 }
  0x1c   :  { %p6689_p10 = scmp.ne.s32.totalorder %s44_s7, %s6688_s8  ;;  %p6694_p12 = scmp.lt.s32.totalorder %s6688_s8, %s6688_s8 }
  0x1e   :  { %p6695_p13 = por %p6694_p12, %p6693_p11 }
  0x20   :  { %p6696_p0 = pnand %p6695_p13, %p6689_p10 }
  0x22   :  { %6699 = shalt.err (!%p6696_p0)
}
  0x23   :  { %s6753_s2 = smov 512   ;;  %s6754_s9 = smov 32  }
  0x24   :  { %49 = dma.hbm_to_vmem [thread:$0]  %s7783_s3, 65536, %s44_s7, [#allocation6], %s6753_s2, %s6753_s2, %s6754_s9  }
  0x25   :  { %s6755_s12 = smov [#allocation8]  }
  0x26   :  { %s56_s13 = sshll.u32 %s6755_s12, 4  ;;  %s57_s13 = int_to_ptr.vmem [resolvable:$true] %s56_s13 }
  0x27   :  { %s6708_s0 = scalar_lea.vmem %s57_s13, 128  ;;  %p6713_p2 = scmp.lt.s32.totalorder %s57_s13, %s57_s13 }
  0x28   :  { %p6709_p1 = scmp.ne.s32.totalorder %s57_s13, %s6708_s0  ;;  %p6714_p3 = scmp.lt.s32.totalorder %s6708_s0, %s6708_s0 }
  0x2a   :  { %p6715_p4 = por %p6714_p3, %p6713_p2 }
  0x2c   :  { %p6716_p5 = pnand %p6715_p4, %p6709_p1 }
  0x2e   :  { %6719 = shalt.err (!%p6716_p5)
}
  0x2f   :  { %59 = dma.hbm_to_vmem [thread:$0]  %s7784_s4, 128, %s57_s13, [#allocation9]  }
  0x30   :  { %6740 = dma.done.wait [#allocation3], 2048  }
  0x31   :  { %6741 = vsyncadd [#allocation3], 4294965248 }
  0x32   :  { %6742 = dma.done.wait [#allocation6], 65552  }
  0x33   :  { %6743 = vsyncadd [#allocation6], 4294901744 }
  0x34   :  { %6744 = dma.done.wait [#allocation9], 128  }
  0x35   :  { %6745 = vsyncadd [#allocation9], 4294967168  ;;  %v6527_v0 = vld [vmem:[%s7781_s1 + $0x78] sm:$0xff]   ;;  %v6531_v4 = vld [vmem:[%s7781_s1 + $0x70] sm:$0xff]   ;;  %v6756_v24 = vmov 1983009808   ;;  %v112_v26 = vlaneseq }
  0x36   :  { %v6528_v1 = vld [vmem:[%s7781_s1 + $0xf8] sm:$0xff]   ;;  %6411 = vmatprep.subr.bf16.mxu0 %v6527_v0  ;;  %v6532_v5 = vld [vmem:[%s7781_s1 + $0xf0] sm:$0xff]   ;;  %v6535_v8 = vld [vmem:[%s7781_s1 + $0x68] sm:$0xff]   ;;  %v110_v25 = vunpack.c.l.s4 %v6756_v24  ;;  %vm6760_vm0 = vmmov 0   ;;  %vm1138_vm1 = vcmask 261120   ;;  %vm1331_vm2 = vcmask 64512  }
  0x37   :  { %v6529_v2 = vld [vmem:[%s7781_s1 + $0x38] sm:$0xff]   ;;  %6433 = vmatprep.subr.bf16.mxu1 %v6528_v1  ;;  %v6533_v6 = vld [vmem:[%s7781_s1 + $0x30] sm:$0xff]   ;;  %v6536_v9 = vld [vmem:[%s7781_s1 + $0xe8] sm:$0xff]   ;;  %v6888_v32 = vshrl.u32 %v112_v26, 7  ;;  %vm1373_vm3 = vcmask 1041409   ;;  %vm1864_vm4 = vcmask 1041408  }
  0x38   :  { %v6530_v3 = vld [vmem:[%s7781_s1 + $0xb8] sm:$0xff]   ;;  %6412 = vmatpush3.bf16.msra.mxu0 %v6529_v2  ;;  %v6534_v7 = vld [vmem:[%s7781_s1 + $0xb0] sm:$0xff]   ;;  %v6537_v10 = vld [vmem:[%s7781_s1 + $0x28] sm:$0xff]   ;;  %v111_v31 = vunpack.c.0.s8 %v110_v25  ;;  %s6761_s26 = smov [#allocation10]  }
  0x39   :  { %6434 = vmatpush3.bf16.msra.mxu1 %v6530_v3  ;;  %6413 = vmatprep.subr.bf16.mxu0 %v6531_v4  ;;  %v6538_v11 = vld [vmem:[%s7781_s1 + $0xa8] sm:$0xff]   ;;  %v6539_v12 = vld [vmem:[%s7781_s1 + $0x60] sm:$0xff]   ;;  %v6543_v16 = vld [vmem:[%s7781_s1 + $0x58] sm:$0xff]   ;;  %7806 = vst [vmem:[#allocation15_spill] sm:$0xff] %v6888_v32  ;;  %s5815_s27 = sshll.u32 %s6761_s26, 4  ;;  %s5816_s27 = int_to_ptr.vmem [resolvable:$true] %s5815_s27 }
  0x3a   :  { %6435 = vmatprep.subr.bf16.mxu1 %v6532_v5  ;;  %v6540_v13 = vld [vmem:[%s7781_s1 + $0xe0] sm:$0xff]   ;;  %v6544_v17 = vld [vmem:[%s7781_s1 + $0xd8] sm:$0xff]   ;;  %v6547_v20 = vld [vmem:[%s7781_s1 + $0x50] sm:$0xff]   ;;  %v6903_v37 = vsub.s32 %v111_v31, %v6888_v32  ;;  %s6720_s28 = scalar_lea.vmem %s5816_s27, 256  ;;  %p6725_p7 = scmp.lt.s32.totalorder %s5816_s27, %s5816_s27 }
  0x3b   :  { %v6541_v14 = vld [vmem:[%s7781_s1 + $0x20] sm:$0xff]   ;;  %v6545_v18 = vld [vmem:[%s7781_s1 + $0x18] sm:$0xff]   ;;  %v6548_v21 = vld [vmem:[%s7781_s1 + $0xd0] sm:$0xff]   ;;  %p6721_p6 = scmp.ne.s32.totalorder %s5816_s27, %s6720_s28  ;;  %p6726_p8 = scmp.lt.s32.totalorder %s6720_s28, %s6720_s28 }
  0x3c   :  { %6414 = vmatpush3.bf16.msra.mxu0 %v6533_v6  ;;  %v6542_v15 = vld [vmem:[%s7781_s1 + $0xa0] sm:$0xff]   ;;  %v6546_v19 = vld [vmem:[%s7781_s1 + $0x98] sm:$0xff]   ;;  %v6549_v22 = vld [vmem:[%s7781_s1 + $0x10] sm:$0xff]   ;;  %7807 = vst [vmem:[#allocation16_spill] sm:$0xff] %v6903_v37 }
  0x3d   :  { %6436 = vmatpush3.bf16.msra.mxu1 %v6534_v7  ;;  %6415 = vmatprep.subr.bf16.mxu0 %v6535_v8  ;;  %v6550_v23 = vld [vmem:[%s7781_s1 + $0x90] sm:$0xff]   ;;  %v6551_v27 = vld [vmem:[%s7781_s1 + $0x48] sm:$0xff]   ;;  %v6555_v33 = vld [vmem:[%s7781_s1 + $0x40] sm:$0xff]   ;;  %p6727_p9 = por %p6726_p8, %p6725_p7 }
  0x3e   :  { %6437 = vmatprep.subr.bf16.mxu1 %v6536_v9  ;;  %v6552_v28 = vld [vmem:[%s7781_s1 + $0xc8] sm:$0xff]   ;;  %v6556_v34 = vld [vmem:[%s7781_s1 + $0xc0] sm:$0xff]   ;;  %v75_v39 = vld [vmem:[#allocation2 + $0x10] sm:$0xff] }
  0x3f   :  { %v6553_v29 = vld [vmem:[%s7781_s1 + $0x8] sm:$0xff]   ;;  %v6557_v35 = vld [vmem:[%s7781_s1] sm:$0xff]   ;;  %v79_v41 = vld [vmem:[#allocation2 + $0x30] sm:$0xff]  ;;  %p6728_p10 = pnand %p6727_p9, %p6721_p6 }
  0x40   :  { %6416 = vmatpush3.bf16.msra.mxu0 %v6537_v10  ;;  %v6554_v30 = vld [vmem:[%s7781_s1 + $0x88] sm:$0xff]   ;;  %v6558_v36 = vld [vmem:[%s7781_s1 + $0x80] sm:$0xff]   ;;  %v83_v43 = vld [vmem:[#allocation2 + $0x50] sm:$0xff] }
  0x41   :  { %6438 = vmatpush3.bf16.msra.mxu1 %v6538_v11  ;;  %6417 = vmatprep.subr.bf16.mxu0 %v6539_v12  ;;  %v73_v38 = vld [vmem:[#allocation2] sm:$0xff]  ;;  %v87_v46 = vld [vmem:[#allocation2 + $0x70] sm:$0xff]  ;;  %v6575_v51 = vld [vmem:[%s7781_s1 + $0x178] sm:$0xff]  }
  0x42   :  { %6439 = vmatprep.subr.bf16.mxu1 %v6540_v13  ;;  %v77_v40 = vld [vmem:[#allocation2 + $0x20] sm:$0xff]  ;;  %v105_v44 = vcombine.low %v73_v38, %v75_v39  ;;  %v6576_v54 = vld [vmem:[%s7781_s1 + $0x1f8] sm:$0xff]   ;;  %v106_v59 = vcombine.high %v73_v38, %v75_v39  ;;  %v6579_v7 = vld [vmem:[%s7781_s1 + $0x170] sm:$0xff]  }
  0x43   :  { %v81_v42 = vld [vmem:[#allocation2 + $0x40] sm:$0xff]  ;;  %v107_v47 = vcombine.low %v77_v40, %v79_v41  ;;  %v108_v60 = vcombine.high %v77_v40, %v79_v41  ;;  %v6577_v4 = vld [vmem:[%s7781_s1 + $0x138] sm:$0xff]   ;;  %v6581_v13 = vld [vmem:[%s7781_s1 + $0x130] sm:$0xff]  }
  0x44   :  { %6418 = vmatpush3.bf16.msra.mxu0 %v6541_v14  ;;  %v85_v45 = vld [vmem:[#allocation2 + $0x60] sm:$0xff]  ;;  %v177_v48 = vcombine.low %v81_v42, %v83_v43  ;;  %v115_v49 = vrot.slane %v105_v44, %v6903_v37  ;;  %v178_v61 = vcombine.high %v81_v42, %v83_v43  ;;  %v122_v1 = vrot.slane %v106_v59, %v6903_v37  ;;  %v6578_v12 = vld [vmem:[%s7781_s1 + $0x1b8] sm:$0xff]   ;;  %v6597_v31 = vld [vmem:[%s7781_s1 + $0x110] sm:$0xff]  }
  0x45   :  { %6440 = vmatpush3.bf16.msra.mxu1 %v6542_v15  ;;  %6419 = vmatprep.subr.bf16.mxu0 %v6543_v16  ;;  %v179_v50 = vcombine.low %v85_v45, %v87_v46  ;;  %v129_v52 = vrot.slane %v107_v47, %v6903_v37  ;;  %v180_v62 = vcombine.high %v85_v45, %v87_v46  ;;  %v6583_v16 = vld [vmem:[%s7781_s1 + $0x168] sm:$0xff]   ;;  %v6591_v24 = vld [vmem:[%s7781_s1 + $0x158] sm:$0xff]   ;;  %v6588_v25 = vld [vmem:[%s7781_s1 + $0x1e0] sm:$0xff]  }
  0x46   :  { %6441 = vmatprep.subr.bf16.mxu1 %v6544_v17  ;;  %v187_v53 = vrot.slane %v177_v48, %v6903_v37  ;;  %v136_v2 = vrot.slane %v108_v60, %v6903_v37  ;;  %v194_v3 = vrot.slane %v178_v61, %v6903_v37  ;;  %v6580_v17 = vld [vmem:[%s7781_s1 + $0x1f0] sm:$0xff]   ;;  %v6590_v26 = vld [vmem:[%s7781_s1 + $0x1a0] sm:$0xff]   ;;  %v6989_v38 = vld [vmem:[#allocation2 + $0x28] sm:$0xff] }
  0x47   :  { %v201_v55 = vrot.slane %v179_v50, %v6903_v37  ;;  %v138_v56 = vcombine.high %v115_v49, %v129_v52  ;;  %v137_v63 = vcombine.low %v115_v49, %v129_v52  ;;  %v208_v5 = vrot.slane %v180_v62, %v6903_v37  ;;  %v6991_v39 = vld [vmem:[#allocation2 + $0x38] sm:$0xff]  ;;  %v6993_v40 = vld [vmem:[#allocation2 + $0x48] sm:$0xff]  ;;  %v6603_v52 = vld [vmem:[%s7781_s1 + $0x140] sm:$0xff]  }
  0x48   :  { %6420 = vmatpush3.bf16.msra.mxu0 %v6545_v18  ;;  %v140_v8 = vcombine.high %v122_v1, %v136_v2  ;;  %v139_v9 = vcombine.low %v122_v1, %v136_v2  ;;  %v6582_v18 = vld [vmem:[%s7781_s1 + $0x1b0] sm:$0xff]   ;;  %v6995_v41 = vld [vmem:[#allocation2 + $0x58] sm:$0xff]  ;;  %v6997_v42 = vld [vmem:[#allocation2 + $0x68] sm:$0xff]  ;;  %v143_v44 = vcombine.low %v6989_v38, %v6991_v39 }
  0x49   :  { %6442 = vmatpush3.bf16.msra.mxu1 %v6546_v19  ;;  %6421 = vmatprep.subr.bf16.mxu0 %v6547_v20  ;;  %v210_v57 = vcombine.high %v187_v53, %v201_v55  ;;  %v209_v0 = vcombine.low %v187_v53, %v201_v55  ;;  %v212_v10 = vcombine.high %v194_v3, %v208_v5  ;;  %v6585_v19 = vld [vmem:[%s7781_s1 + $0x128] sm:$0xff]   ;;  %v6587_v20 = vld [vmem:[%s7781_s1 + $0x160] sm:$0xff]   ;;  %v7003_v45 = vld [vmem:[#allocation2 + $0x78] sm:$0xff] }
  0x4a   :  { %6443 = vmatprep.subr.bf16.mxu1 %v6548_v21  ;;  %v211_v11 = vcombine.low %v194_v3, %v208_v5  ;;  %v6584_v21 = vld [vmem:[%s7781_s1 + $0x1e8] sm:$0xff]   ;;  %v213_v46 = vcombine.low %v6993_v40, %v6995_v41  ;;  %v165_v49 = vrot.slane %v143_v44, %v6903_v37  ;;  %v215_v50 = vcombine.low %v6997_v42, %v7003_v45  ;;  %v6604_v60 = vld [vmem:[%s7781_s1 + $0x1c0] sm:$0xff]  }
  0x4b   :  { %v266_v58 = vpack.c.bf16 %v210_v57, %v138_v56  ;;  %v265_v6 = vpack.c.bf16 %v209_v0, %v137_v63  ;;  %v268_v14 = vpack.c.bf16 %v212_v10, %v140_v8  ;;  %v6601_v47 = vld [vmem:[%s7781_s1 + $0x108] sm:$0xff]   ;;  %v6605_v57 = vld [vmem:[%s7781_s1 + $0x100] sm:$0xff]   ;;  %v144_v63 = vcombine.high %v6989_v38, %v6991_v39 }
  0x4c   :  { %6422 = vmatpush3.bf16.msra.mxu0 %v6549_v22  ;;  %v267_v15 = vpack.c.bf16 %v211_v11, %v139_v9  ;;  %v6586_v22 = vld [vmem:[%s7781_s1 + $0x1a8] sm:$0xff]   ;;  %v223_v53 = vrot.slane %v213_v46, %v6903_v37  ;;  %v237_v56 = vrot.slane %v215_v50, %v6903_v37  ;;  %v214_v0 = vcombine.high %v6993_v40, %v6995_v41 }
  0x4d   :  { %6444 = vmatpush3.bf16.msra.mxu1 %v6550_v23  ;;  %6423 = vmatprep.subr.bf16.mxu0 %v6551_v27  ;;  %v6589_v23 = vld [vmem:[%s7781_s1 + $0x120] sm:$0xff]   ;;  %v6593_v27 = vld [vmem:[%s7781_s1 + $0x118] sm:$0xff]   ;;  %v6602_v59 = vld [vmem:[%s7781_s1 + $0x188] sm:$0xff]   ;;  %v216_v1 = vcombine.high %v6997_v42, %v7003_v45  ;;  %v172_v5 = vrot.slane %v144_v63, %v6903_v37 }
  0x4e   :  { %6445 = vmatprep.subr.bf16.mxu1 %v6552_v28  ;;  %824 = vmatprep.mubr.bf16.mxu0 %v266_v58  ;;  %v6595_v28 = vld [vmem:[%s7781_s1 + $0x150] sm:$0xff]   ;;  %v246_v58 = vcombine.high %v223_v53, %v237_v56  ;;  %v245_v3 = vcombine.low %v223_v53, %v237_v56 }
  0x4f   :  { %865 = vmatprep.mubr.bf16.mxu1 %v268_v14  ;;  %v244_v8 = vrot.slane %v216_v1, %v6903_v37 }
  0x50   :  { %6424 = vmatpush3.bf16.msra.mxu0 %v6553_v29  ;;  %v6592_v29 = vld [vmem:[%s7781_s1 + $0x1d8] sm:$0xff]  }
  0x51   :  { %6446 = vmatpush3.bf16.msra.mxu1 %v6554_v30  ;;  %6425 = vmatprep.subr.bf16.mxu0 %v6555_v33  ;;  %v6594_v30 = vld [vmem:[%s7781_s1 + $0x198] sm:$0xff]   ;;  %v6596_v33 = vld [vmem:[%s7781_s1 + $0x1d0] sm:$0xff]  }
  0x52   :  { %6447 = vmatprep.subr.bf16.mxu1 %v6556_v34  ;;  %v6599_v34 = vld [vmem:[%s7781_s1 + $0x148] sm:$0xff]  }
  0x54   :  { %6426 = vmatpush3.bf16.msra.mxu0 %v6557_v35  ;;  %v6985_v35 = vld [vmem:[#allocation2 + $0x8] sm:$0xff] }
  0x55   :  { %6448 = vmatpush3.bf16.msra.mxu1 %v6558_v36  ;;  %6455 = vmatprep.subr.bf16.mxu0 %v6575_v51  ;;  %v6987_v36 = vld [vmem:[#allocation2 + $0x18] sm:$0xff]  ;;  %v6598_v51 = vld [vmem:[%s7781_s1 + $0x190] sm:$0xff]  }
  0x56   :  { %6477 = vmatprep.subr.bf16.mxu1 %v6576_v54  ;;  %v141_v43 = vcombine.low %v6985_v35, %v6987_v36  ;;  %v6600_v54 = vld [vmem:[%s7781_s1 + $0x1c8] sm:$0xff]   ;;  %v142_v62 = vcombine.high %v6985_v35, %v6987_v36 }
  0x57   :  { %825 = vmatmul.mubr.bf16.vlgmr.msra.gmra.mxu0 %v265_v6  ;;  %v230_v6 = vrot.slane %v214_v0, %v6903_v37 }
  0x58   :  { %6456 = vmatpush3.bf16.msra.mxu0 %v6577_v4  ;;  %866 = vmatmul.mubr.bf16.vlgmr.msra.gmra.mxu1 %v267_v15  ;;  %v151_v48 = vrot.slane %v141_v43, %v6903_v37  ;;  %v158_v4 = vrot.slane %v142_v62, %v6903_v37 }
  0x59   :  { %6457 = vmatprep.subr.bf16.mxu0 %v6579_v7  ;;  %6478 = vmatpush3.bf16.msra.mxu1 %v6578_v12  ;;  %v6606_v7 = vld [vmem:[%s7781_s1 + $0x180] sm:$0xff]   ;;  %v248_v12 = vcombine.high %v230_v6, %v244_v8  ;;  %s6758_s1 = smov 96  }
  0x5a   :  { %6479 = vmatprep.subr.bf16.mxu1 %v6580_v17  ;;  %v174_v55 = vcombine.high %v151_v48, %v165_v49  ;;  %v173_v2 = vcombine.low %v151_v48, %v165_v49  ;;  %v176_v10 = vcombine.high %v158_v4, %v172_v5  ;;  %v175_v11 = vcombine.low %v158_v4, %v172_v5 }
  0x5c   :  { %6458 = vmatpush3.bf16.msra.mxu0 %v6581_v13  ;;  %v270_v61 = vpack.c.bf16 %v246_v58, %v174_v55  ;;  %v269_v9 = vpack.c.bf16 %v245_v3, %v173_v2  ;;  %v247_v13 = vcombine.low %v230_v6, %v244_v8  ;;  %v272_v14 = vpack.c.bf16 %v248_v12, %v176_v10 }
  0x5d   :  { %6459 = vmatprep.subr.bf16.mxu0 %v6583_v16  ;;  %6480 = vmatpush3.bf16.msra.mxu1 %v6582_v18 }
  0x5e   :  { %6481 = vmatprep.subr.bf16.mxu1 %v6584_v21  ;;  %906 = vmatprep.mubr.bf16.mxu0 %v270_v61  ;;  %v271_v15 = vpack.c.bf16 %v247_v13, %v175_v11 }
  0x5f   :  { %947 = vmatprep.mubr.bf16.mxu1 %v272_v14 }
  0x60   :  { %6460 = vmatpush3.bf16.msra.mxu0 %v6585_v19 }
  0x61   :  { %6461 = vmatprep.subr.bf16.mxu0 %v6587_v20  ;;  %6482 = vmatpush3.bf16.msra.mxu1 %v6586_v22  ;;  %v5826_v22 = vld [vmem:[#allocation5] ss:$0 sm:$0xff] }
  0x62   :  { %6483 = vmatprep.subr.bf16.mxu1 %v6588_v25 }
  0x64   :  { %6462 = vmatpush3.bf16.msra.mxu0 %v6589_v23 }
  0x65   :  { %6463 = vmatprep.subr.bf16.mxu0 %v6591_v24  ;;  %6484 = vmatpush3.bf16.msra.mxu1 %v6590_v26 }
  0x66   :  { %6485 = vmatprep.subr.bf16.mxu1 %v6592_v29 }
  0x68   :  { %6464 = vmatpush3.bf16.msra.mxu0 %v6593_v27 }
  0x69   :  { %6465 = vmatprep.subr.bf16.mxu0 %v6595_v28  ;;  %6486 = vmatpush3.bf16.msra.mxu1 %v6594_v30 }
  0x6a   :  { %6487 = vmatprep.subr.bf16.mxu1 %v6596_v33 }
  0x6c   :  { %6466 = vmatpush3.bf16.msra.mxu0 %v6597_v31 }
  0x6d   :  { %6467 = vmatprep.subr.bf16.mxu0 %v6599_v34  ;;  %6488 = vmatpush3.bf16.msra.mxu1 %v6598_v51  ;;  %v6757_v51 = vmov 1934713408  }
  0x6e   :  { %6489 = vmatprep.subr.bf16.mxu1 %v6600_v54 }
  0x70   :  { %6468 = vmatpush3.bf16.msra.mxu0 %v6601_v47 }
  0x71   :  { %6469 = vmatprep.subr.bf16.mxu0 %v6603_v52  ;;  %6490 = vmatpush3.bf16.msra.mxu1 %v6602_v59  ;;  %v1002_v52 = vunpack.c.l.s4 %v6757_v51 }
  0x72   :  { %6491 = vmatprep.subr.bf16.mxu1 %v6604_v60 }
  0x73   :  { %v1003_v59 = vunpack.c.0.s8 %v1002_v52 }
  0x74   :  { %6470 = vmatpush3.bf16.msra.mxu0 %v6605_v57 }
  0x75   :  { %6492 = vmatpush3.bf16.msra.mxu1 %v6606_v7  ;;  %v1006_v2 = vsub.s32 %v1003_v59, %v6888_v32 }
  0x77   :  { %907 = vmatmul.mubr.bf16.vlgmr.msra.gmra.mxu0 %v269_v9 }
  0x78   :  { %948 = vmatmul.mubr.bf16.vlgmr.msra.gmra.mxu1 %v271_v15 }
 0x117   :  { %v6427_v16 = vpop.f32.mrf.mxu0 }
 0x118   :  { %v6449_v18 = vpop.f32.mrf.mxu1 }
 0x119   :  { %v6428_v17 = vpop.f32.mrf.mxu0 }
 0x11a   :  { %v6450_v20 = vpop.f32.mrf.mxu1  ;;  %v6429_v21 = vadd.f32 %v6428_v17, %v6427_v16 }
 0x11b   :  { %v6430_v19 = vpop.f32.mrf.mxu0  ;;  %v6451_v26 = vadd.f32 %v6450_v20, %v6449_v18 }
 0x11c   :  { %v6452_v24 = vpop.f32.mrf.mxu1  ;;  %v827_v25 = vadd.f32 %v6429_v21, %v5826_v22 }
 0x11d   :  { %v6431_v23 = vpop.f32.mrf.mxu0 }
 0x11e   :  { %v6432_v27 = vadd.f32 %v6431_v23, %v6430_v19  ;;  %v6453_v30 = vpop.f32.mrf.mxu1  ;;  %v868_v33 = vadd.f32 %v6451_v26, %v827_v25  ;;  %v6759_v19 = vmov 0.0  }
 0x11f   :  { %v6454_v46 = vadd.f32 %v6453_v30, %v6452_v24  ;;  %6503 = vmatprep.subr.mxu0 %v6759_v19  ;;  %6508 = vmatprep.subr.mxu1 %v6759_v19 }
 0x120   :  { %v830_v34 = vadd.f32 %v6432_v27, %v5826_v22  ;;  %6505 = vmatprep.mubr.msk.f32.mxu0 %vm6760_vm0, %v6759_v19  ;;  %6510 = vmatprep.mubr.msk.f32.mxu1 %vm6760_vm0, %v6759_v19 }
 0x122   :  { %v871_v53 = vadd.f32 %v6454_v46, %v830_v34 }
 0x137   :  { %v6471_v28 = vpop.f32.mrf.mxu0 }
 0x138   :  { %v6493_v44 = vpop.f32.mrf.mxu1 }
 0x139   :  { %v6472_v29 = vpop.f32.mrf.mxu0 }
 0x13a   :  { %v6473_v31 = vadd.f32 %v6472_v29, %v6471_v28  ;;  %v6494_v49 = vpop.f32.mrf.mxu1 }
 0x13b   :  { %v6474_v43 = vpop.f32.mrf.mxu0  ;;  %v6495_v54 = vadd.f32 %v6494_v49, %v6493_v44 }
 0x13c   :  { %v909_v47 = vadd.f32 %v6473_v31, %v868_v33  ;;  %v6496_v55 = vpop.f32.mrf.mxu1 }
 0x13d   :  { %v6475_v48 = vpop.f32.mrf.mxu0 }
 0x13e   :  { %v6476_v50 = vadd.f32 %v6475_v48, %v6474_v43  ;;  %v950_v56 = vadd.f32 %v6495_v54, %v909_v47  ;;  %v6497_v58 = vpop.f32.mrf.mxu1 }
 0x13f   :  { %v6498_v61 = vadd.f32 %v6497_v58, %v6496_v55 }
 0x140   :  { %v912_v57 = vadd.f32 %v6476_v50, %v871_v53  ;;  %v958_v60 = vcombine.high %v950_v56, %v950_v56  ;;  %v965_v62 = vrot.slane %v950_v56, %v6903_v37 }
 0x142   :  { %v953_v63 = vadd.f32 %v6498_v61, %v912_v57  ;;  %1036 = vrot.lane.b32.xlu0 %v965_v62, %s6758_s1  ;;  %v972_v0 = vrot.slane %v958_v60, %v6903_v37  ;;  %v973_v1 = vcombine.high %v965_v62, %v965_v62 }
 0x144   :  { %v975_v3 = vcombine.high %v953_v63, %v953_v63  ;;  %1040 = vrot.lane.b32.xlu1 %v972_v0, %s6758_s1  ;;  %v1000_v4 = vcombine.low %v965_v62, %v973_v1  ;;  %v974_v5 = vcombine.high %v972_v0, %v972_v0  ;;  %v982_v6 = vrot.slane %v953_v63, %v6903_v37 }
 0x146   :  { %1038 = vrot.lane.b32.xlu0 %v973_v1, %s6758_s1  ;;  %v1009_v7 = vcombine.low %v972_v0, %v974_v5  ;;  %v990_v8 = vcombine.high %v982_v6, %v982_v6  ;;  %v989_v9 = vrot.slane %v975_v3, %v6903_v37  ;;  %v1007_v10 = vrot.slane %v1000_v4, %v1006_v2 }
 0x148   :  { %1042 = vrot.lane.b32.xlu1 %v974_v5, %s6758_s1  ;;  %v1016_v11 = vrot.slane %v1009_v7, %v1006_v2  ;;  %v1018_v12 = vcombine.low %v982_v6, %v990_v8  ;;  %v991_v13 = vcombine.high %v989_v9, %v989_v9 }
 0x14a   :  { %v1100_v14 = vcombine.low %v1007_v10, %v1016_v11  ;;  %v5893_v15 = vcombine.high %v1007_v10, %v1016_v11  ;;  %1044 = vrot.lane.b32.xlu0 %v982_v6, %s6758_s1  ;;  %v1027_v16 = vcombine.low %v989_v9, %v991_v13  ;;  %v1025_v17 = vrot.slane %v1018_v12, %v1006_v2 }
 0x14c   :  { %1046 = vrot.lane.b32.xlu1 %v990_v8, %s6758_s1  ;;  %v1034_v18 = vrot.slane %v1027_v16, %v1006_v2  ;;  %v1108_v22 = vrot.slane %v1100_v14, %v6903_v37  ;;  %v1225_v23 = vrot.slane %v5893_v15, %v6903_v37 }
 0x14e   :  { %1048 = vrot.lane.b32.xlu0 %v989_v9, %s6758_s1  ;;  %v1101_v20 = vcombine.low %v1025_v17, %v1034_v18  ;;  %v5894_v21 = vcombine.high %v1025_v17, %v1034_v18 }
 0x150   :  { %v1115_v24 = vrot.slane %v1101_v20, %v6903_v37  ;;  %v1232_v25 = vrot.slane %v5894_v21, %v6903_v37  ;;  %1050 = vrot.lane.b32.xlu1 %v991_v13, %s6758_s1 }
 0x152   :  { %v1116_v26 = vcombine.low %v1108_v22, %v1115_v24  ;;  %v1233_v27 = vcombine.low %v1225_v23, %v1232_v25 }
 0x1b4   :  { %v1037_v28 = vpop.permute.xlu0 %1036 }
 0x1b6   :  { %v1041_v29 = vpop.permute.xlu1 %1040 }
 0x1b8   :  { %v1039_v30 = vpop.permute.xlu0 %1038 }
 0x1b9   :  { %v1060_v44 = vcombine.low %v1037_v28, %v1039_v30 }
 0x1ba   :  { %v1043_v31 = vpop.permute.xlu1 %1042 }
 0x1bb   :  { %v1069_v34 = vcombine.low %v1041_v29, %v1043_v31  ;;  %v1067_v50 = vrot.slane %v1060_v44, %v1006_v2 }
 0x1bc   :  { %v1045_v33 = vpop.permute.xlu0 %1044 }
 0x1bd   :  { %v1076_v46 = vrot.slane %v1069_v34, %v1006_v2 }
 0x1be   :  { %v1047_v43 = vpop.permute.xlu1 %1046 }
 0x1bf   :  { %v1078_v47 = vcombine.low %v1045_v33, %v1047_v43  ;;  %v1121_v52 = vcombine.low %v1067_v50, %v1076_v46  ;;  %v5895_v53 = vcombine.high %v1067_v50, %v1076_v46 }
 0x1c0   :  { %v1049_v48 = vpop.permute.xlu0 %1048 }
 0x1c1   :  { %v1085_v54 = vrot.slane %v1078_v47, %v1006_v2  ;;  %v1129_v58 = vrot.slane %v1121_v52, %v6903_v37  ;;  %v1246_v59 = vrot.slane %v5895_v53, %v6903_v37  ;;  %v2053_v52 = vld [vmem:[#allocation7 + $0x1e0] sm:$0xff] }
 0x1c2   :  { %v1051_v49 = vpop.permute.xlu1 %1050  ;;  %v2177_v53 = vld [vmem:[#allocation7 + $0x5c0] sm:$0xff] }
 0x1c3   :  { %v1087_v51 = vcombine.low %v1049_v48, %v1051_v49 }
 0x1c5   :  { %v1094_v55 = vrot.slane %v1087_v51, %v1006_v2  ;;  %v2049_v51 = vld [vmem:[#allocation7 + $0x1c0] sm:$0xff] }
 0x1c7   :  { %v1122_v56 = vcombine.low %v1085_v54, %v1094_v55  ;;  %v5896_v57 = vcombine.high %v1085_v54, %v1094_v55  ;;  %v5955_v54 = vcombine.low %v2049_v51, %v2053_v52  ;;  %v5956_v55 = vcombine.high %v2049_v51, %v2053_v52  ;;  %v1993_v51 = vld [vmem:[#allocation7] sm:$0xff] }
 0x1c8   :  { %v1997_v52 = vld [vmem:[#allocation7 + $0x20] sm:$0xff] }
 0x1c9   :  { %v1136_v60 = vrot.slane %v1122_v56, %v6903_v37  ;;  %v1253_v61 = vrot.slane %v5896_v57, %v6903_v37  ;;  %v2181_v56 = vld [vmem:[#allocation7 + $0x5e0] sm:$0xff] }
 0x1ca   :  { %v2041_v57 = vld [vmem:[#allocation7 + $0x180] sm:$0xff] }
 0x1cb   :  { %v1137_v62 = vcombine.low %v1129_v58, %v1136_v60  ;;  %v1254_v63 = vcombine.low %v1246_v59, %v1253_v61  ;;  %v2045_v58 = vld [vmem:[#allocation7 + $0x1a0] sm:$0xff]  ;;  %v6083_v59 = vcombine.low %v2177_v53, %v2181_v56  ;;  %v6084_v60 = vcombine.high %v2177_v53, %v2181_v56 }
 0x1cc   :  { %v5948_v61 = vcombine.high %v2041_v57, %v2045_v58  ;;  %v2121_v53 = vld [vmem:[#allocation7 + $0x400] sm:$0xff] }
 0x1cd   :  { %6504 = vmatpush3.xpose.msk.msra.mxu0 %vm1138_vm1, %v1137_v62  ;;  %6509 = vmatpush3.xpose.msk.msra.mxu1 %vm1138_vm1, %v1254_v63  ;;  %v2169_v62 = vld [vmem:[#allocation7 + $0x580] sm:$0xff] }
 0x1ce   :  { %v2173_v63 = vld [vmem:[#allocation7 + $0x5a0] sm:$0xff]  ;;  %5107 = vmatprep.subr.bf16.mxu0 %v5956_v55  ;;  %5148 = vmatprep.subr.bf16.mxu1 %v6084_v60 }
 0x1d0   :  { %6506 = vmatmul.mubr.msk.f32.vlgmr.msra.gmra.mxu0 %vm1138_vm1, %v1116_v26  ;;  %6511 = vmatmul.mubr.msk.f32.vlgmr.msra.gmra.mxu1 %vm1138_vm1, %v1233_v27 }
 0x1d1   :  { %5108 = vmatpush1.bf16.msra.mxu0 %v5955_v54  ;;  %5149 = vmatpush1.bf16.msra.mxu1 %v6083_v59  ;;  %v2125_v54 = vld [vmem:[#allocation7 + $0x420] sm:$0xff]  ;;  %v5899_v59 = vcombine.low %v1993_v51, %v1997_v52 }
 0x1d2   :  { %5109 = vmatprep.subr.bf16.mxu0 %v5948_v61  ;;  %v6027_v60 = vcombine.low %v2121_v53, %v2125_v54  ;;  %v2113_v61 = vld [vmem:[#allocation7 + $0x3c0] sm:$0xff] }
 0x290   :  { %v1209_v0 = vpop.f32.mrf.mxu0  ;;  %v1325_v1 = vpop.f32.mrf.mxu1 }
 0x291   :  { %v1329_v2 = vmul.f32 0.17677669, %v1209_v0  ;;  %v1330_v3 = vmul.f32 0.17677669, %v1325_v1  ;;  %v2033_v0 = vld [vmem:[#allocation7 + $0x140] sm:$0xff]  ;;  %v6076_v1 = vcombine.high %v2169_v62, %v2173_v63 }
 0x292   :  { %v6507_v4 = vpop.f32.mrf.mxu0  ;;  %v6512_v5 = vpop.f32.mrf.mxu1 }
 0x293   :  { %v1335_v6 = vsel %vm1331_vm2, %v1330_v3, -inf  ;;  %v1332_v7 = vsel %vm1331_vm2, %v1329_v2, -inf  ;;  %v2165_v4 = vld [vmem:[#allocation7 + $0x560] sm:$0xff]  ;;  %v5947_v5 = vcombine.low %v2041_v57, %v2045_v58  ;;  %5150 = vmatprep.subr.bf16.mxu1 %v6076_v1  ;;  %v5900_v57 = vcombine.high %v1993_v51, %v1997_v52 }
 0x294   :  { %1336 = vmax.xlane.f32.xlu1 %v1335_v6  ;;  %1333 = vmax.xlane.f32.xlu0 %v1332_v7  ;;  %v6075_v6 = vcombine.low %v2169_v62, %v2173_v63  ;;  %v6028_v58 = vcombine.high %v2121_v53, %v2125_v54  ;;  %v2117_v62 = vld [vmem:[#allocation7 + $0x3e0] sm:$0xff]  ;;  %v7790_v53 = vsub.s32 3, %v6888_v32 }
 0x295   :  { %5110 = vmatpush1.bf16.msra.mxu0 %v5947_v5  ;;  %v2241_v63 = vld [vmem:[#allocation7 + $0x7c0] sm:$0xff]  ;;  %v6020_v1 = vcombine.high %v2113_v61, %v2117_v62 }
 0x296   :  { %5151 = vmatpush1.bf16.msra.mxu1 %v6075_v6  ;;  %v2105_v5 = vld [vmem:[#allocation7 + $0x380] sm:$0xff] }
 0x297   :  { %v2109_v6 = vld [vmem:[#allocation7 + $0x3a0] sm:$0xff] }
 0x298   :  { %v2073_v54 = vld [vmem:[#allocation7 + $0x280] sm:$0xff] }
 0x31d   :  { %v1337_v8 = vpop.xlane.xlu1 %1336  ;;  %v1334_v9 = vpop.xlane.xlu0 %1333 }
 0x31e   :  { %v1339_v10 = vsub.f32 %v1330_v3, %v1337_v8  ;;  %v1338_v11 = vsub.f32 %v1329_v2, %v1334_v9  ;;  %v2037_v2 = vld [vmem:[#allocation7 + $0x160] sm:$0xff] }
 0x31f   :  { %v2161_v3 = vld [vmem:[#allocation7 + $0x540] sm:$0xff]  ;;  %v5940_v7 = vcombine.high %v2033_v0, %v2037_v2 }
 0x320   :  { %v1340_v12 = vmul.f32 1.442695, %v1338_v11  ;;  %v1342_v13 = vmul.f32 1.442695, %v1339_v10  ;;  %v6068_v8 = vcombine.high %v2161_v3, %v2165_v4  ;;  %v2025_v9 = vld [vmem:[#allocation7 + $0x100] sm:$0xff] }
 0x321   :  { %v2029_v10 = vld [vmem:[#allocation7 + $0x120] sm:$0xff]  ;;  %5111 = vmatprep.subr.bf16.mxu0 %v5940_v7 }
 0x322   :  { %6623 = vpow2.f32 %v1340_v12  ;;  %v2153_v11 = vld [vmem:[#allocation7 + $0x500] sm:$0xff]  ;;  %5152 = vmatprep.subr.bf16.mxu1 %v6068_v8  ;;  %v6011_v8 = vcombine.low %v2105_v5, %v2109_v6 }
 0x323   :  { %6625 = vpow2.f32 %v1342_v13  ;;  %v2157_v12 = vld [vmem:[#allocation7 + $0x520] sm:$0xff]  ;;  %v5939_v13 = vcombine.low %v2033_v0, %v2037_v2  ;;  %v6019_v0 = vcombine.low %v2113_v61, %v2117_v62 }
 0x324   :  { %v2245_v2 = vld [vmem:[#allocation7 + $0x7e0] sm:$0xff] }
 0x325   :  { %5112 = vmatpush1.bf16.msra.mxu0 %v5939_v13  ;;  %v2233_v7 = vld [vmem:[#allocation7 + $0x780] sm:$0xff] }
 0x32f   :  { %v6624_v14 = vpop.eup %6623 }
 0x330   :  { %v1344_v15 = vsel %vm1331_vm2, %v6624_v14, 0.0  ;;  %v6626_v16 = vpop.eup %6625 }
 0x331   :  { %1345 = vadd.xlane.f32.xlu0 %v1344_v15  ;;  %v1347_v17 = vsel %vm1331_vm2, %v6626_v16, 0.0  ;;  %v5932_v15 = vcombine.high %v2025_v9, %v2029_v10 }
 0x333   :  { %5113 = vmatprep.subr.bf16.mxu0 %v5932_v15  ;;  %v2101_v15 = vld [vmem:[#allocation7 + $0x360] sm:$0xff] }
 0x335   :  { %1348 = vadd.xlane.f32.xlu0 %v1347_v17  ;;  %v2017_v17 = vld [vmem:[#allocation7 + $0xc0] sm:$0xff] }
 0x3ba   :  { %v1346_v18 = vpop.xlane.xlu0 %1345 }
 0x3bb   :  { %6627 = vrcp.f32 %v1346_v18  ;;  %v2021_v18 = vld [vmem:[#allocation7 + $0xe0] sm:$0xff] }
 0x3be   :  { %v1349_v19 = vpop.xlane.xlu0 %1348 }
 0x3bf   :  { %6629 = vrcp.f32 %v1349_v19  ;;  %v2145_v19 = vld [vmem:[#allocation7 + $0x4c0] sm:$0xff] }
 0x3c8   :  { %v6628_v20 = vpop.eup %6627 }
 0x3c9   :  { %v1351_v21 = vmul.f32 %v6628_v20, %v6624_v14  ;;  %v6067_v14 = vcombine.low %v2161_v3, %v2165_v4  ;;  %v2149_v20 = vld [vmem:[#allocation7 + $0x4e0] sm:$0xff]  ;;  %v6147_v3 = vcombine.low %v2241_v63, %v2245_v2  ;;  %v6148_v4 = vcombine.high %v2241_v63, %v2245_v2 }
 0x3ca   :  { %v7789_v63 = vsub.s32 4, %v6888_v32  ;;  %v2193_v2 = vld [vmem:[#allocation7 + $0x640] sm:$0xff] }
 0x3cb   :  { %v1354_v22 = vsel %vm1331_vm2, %v1351_v21, 0.0  ;;  %v5931_v21 = vcombine.low %v2025_v9, %v2029_v10  ;;  %5153 = vmatpush1.bf16.msra.mxu1 %v6067_v14  ;;  %v6012_v9 = vcombine.high %v2105_v5, %v2109_v6  ;;  %v2237_v10 = vld [vmem:[#allocation7 + $0x7a0] sm:$0xff] }
 0x3cc   :  { %v6630_v23 = vpop.eup %6629  ;;  %v1355_v24 = vrot.slane %v1354_v22, 4  ;;  %v6140_v13 = vcombine.high %v2233_v7, %v2237_v10  ;;  %v2097_v14 = vld [vmem:[#allocation7 + $0x340] sm:$0xff] }
 0x3cd   :  { %v1353_v25 = vmul.f32 %v6630_v23, %v6626_v16  ;;  %v6060_v16 = vcombine.high %v2153_v11, %v2157_v12  ;;  %v5924_v23 = vcombine.high %v2017_v17, %v2021_v18  ;;  %5114 = vmatpush1.bf16.msra.mxu0 %v5931_v21  ;;  %v2197_v5 = vld [vmem:[#allocation7 + $0x660] sm:$0xff] }
 0x3ce   :  { %v1356_v26 = vadd.f32 %v1355_v24, %v1354_v22  ;;  %v6059_v22 = vcombine.low %v2153_v11, %v2157_v12  ;;  %v6052_v24 = vcombine.high %v2145_v19, %v2149_v20  ;;  %v7793_v11 = vsub.s32 0, %v6888_v32 }
 0x3cf   :  { %v1361_v27 = vsel %vm1331_vm2, %v1353_v25, 0.0  ;;  %5154 = vmatprep.subr.bf16.mxu1 %v6060_v16  ;;  %v2009_v25 = vld [vmem:[#allocation7 + $0x80] sm:$0xff]  ;;  %5115 = vmatprep.subr.bf16.mxu0 %v5924_v23  ;;  %v6139_v12 = vcombine.low %v2233_v7, %v2237_v10  ;;  %v6100_v6 = vcombine.high %v2193_v2, %v2197_v5 }
 0x3d0   :  { %v1357_v28 = vrot.slane %v1356_v26, 2  ;;  %v1362_v29 = vrot.slane %v1361_v27, 4  ;;  %5155 = vmatpush1.bf16.msra.mxu1 %v6059_v22  ;;  %v7792_v22 = vsub.s32 1, %v6888_v32  ;;  %v2089_v23 = vld [vmem:[#allocation7 + $0x300] sm:$0xff] }
 0x3d1   :  { %5156 = vmatprep.subr.bf16.mxu1 %v6052_v24  ;;  %v2093_v24 = vld [vmem:[#allocation7 + $0x320] sm:$0xff] }
 0x3d2   :  { %v1358_v30 = vadd.f32 %v1357_v28, %v1356_v26  ;;  %v1363_v31 = vadd.f32 %v1362_v29, %v1361_v27  ;;  %v2013_v26 = vld [vmem:[#allocation7 + $0xa0] sm:$0xff]  ;;  %v5923_v29 = vcombine.low %v2017_v17, %v2021_v18  ;;  %v6003_v17 = vcombine.low %v2097_v14, %v2101_v15 }
 0x3d3   :  { %v2137_v27 = vld [vmem:[#allocation7 + $0x480] sm:$0xff]  ;;  %v6004_v18 = vcombine.high %v2097_v14, %v2101_v15  ;;  %v6099_v14 = vcombine.low %v2193_v2, %v2197_v5  ;;  %v6636_v2 = vld [vmem:[#allocation2 + $0x50] sm:$0xff] }
 0x3d4   :  { %v1359_v33 = vrot.slane %v1358_v30, 1  ;;  %v1364_v34 = vrot.slane %v1363_v31, 2  ;;  %v2141_v28 = vld [vmem:[#allocation7 + $0x4a0] sm:$0xff]  ;;  %5116 = vmatpush1.bf16.msra.mxu0 %v5923_v29  ;;  %v5995_v29 = vcombine.low %v2089_v23, %v2093_v24 }
 0x3d5   :  { %v2057_v10 = vld [vmem:[#allocation7 + $0x200] sm:$0xff] }
 0x3d6   :  { %v1365_v43 = vadd.f32 %v1364_v34, %v1363_v31  ;;  %v1360_v44 = vadd.f32 %v1359_v33, %v1358_v30  ;;  %v6051_v30 = vcombine.low %v2145_v19, %v2149_v20  ;;  %v5916_v31 = vcombine.high %v2009_v25, %v2013_v26  ;;  %v2001_v34 = vld [vmem:[#allocation7 + $0x40] sm:$0xff] }
 0x3d7   :  { %v6044_v33 = vcombine.high %v2137_v27, %v2141_v28  ;;  %v2225_v19 = vld [vmem:[#allocation7 + $0x740] sm:$0xff] }
 0x3d8   :  { %v1366_v46 = vrot.slane %v1365_v43, 1  ;;  %v1369_v48 = vmul.f32 0.125, %v1360_v44  ;;  %v2129_v44 = vld [vmem:[#allocation7 + $0x440] sm:$0xff]  ;;  %5157 = vmatpush1.bf16.msra.mxu1 %v6051_v30  ;;  %5117 = vmatprep.subr.bf16.mxu0 %v5916_v31  ;;  %v5996_v30 = vcombine.high %v2089_v23, %v2093_v24 }
 0x3d9   :  { %5158 = vmatprep.subr.bf16.mxu1 %v6044_v33  ;;  %v2229_v20 = vld [vmem:[#allocation7 + $0x760] sm:$0xff] }
 0x3da   :  { %v1367_v47 = vadd.f32 %v1366_v46, %v1365_v43  ;;  %v2005_v43 = vld [vmem:[#allocation7 + $0x60] sm:$0xff] }
 0x3db   :  { %v2133_v46 = vld [vmem:[#allocation7 + $0x460] sm:$0xff]  ;;  %v5907_v55 = vcombine.low %v2001_v34, %v2005_v43 }
 0x3dc   :  { %v1370_v49 = vmul.f32 0.125, %v1367_v47  ;;  %v5915_v47 = vcombine.low %v2009_v25, %v2013_v26  ;;  %v6035_v56 = vcombine.low %v2129_v44, %v2133_v46  ;;  %v2217_v25 = vld [vmem:[#allocation7 + $0x700] sm:$0xff] }
 0x3dd   :  { %v2221_v26 = vld [vmem:[#allocation7 + $0x720] sm:$0xff] }
 0x3de   :  { %v1374_v50 = vsel %vm1373_vm3, %v1370_v49, %v1369_v48  ;;  %v6043_v48 = vcombine.low %v2137_v27, %v2141_v28  ;;  %v5908_v49 = vcombine.high %v2001_v34, %v2005_v43  ;;  %5118 = vmatpush1.bf16.msra.mxu0 %v5915_v47  ;;  %v6131_v27 = vcombine.low %v2225_v19, %v2229_v20  ;;  %v2081_v43 = vld [vmem:[#allocation7 + $0x2c0] sm:$0xff] }
 0x3df   :  { %1376 = vxpose.xlu1.b32.start.end [1/1] (short) (narrow) %v1374_v50, 8  ;;  %v6036_v50 = vcombine.high %v2129_v44, %v2133_v46  ;;  %v6132_v28 = vcombine.high %v2225_v19, %v2229_v20  ;;  %v6124_v31 = vcombine.high %v2217_v25, %v2221_v26  ;;  %v7791_v34 = vsub.s32 2, %v6888_v32  ;;  %v2085_v44 = vld [vmem:[#allocation7 + $0x2e0] sm:$0xff] }
 0x3e0   :  { %5159 = vmatpush1.bf16.msra.mxu1 %v6043_v48  ;;  %5119 = vmatprep.subr.bf16.mxu0 %v5908_v49  ;;  %v2209_v46 = vld [vmem:[#allocation7 + $0x6c0] sm:$0xff]  ;;  %v6123_v47 = vcombine.low %v2217_v25, %v2221_v26  ;;  %v5988_v48 = vcombine.high %v2081_v43, %v2085_v44  ;;  %v5987_v51 = vcombine.low %v2081_v43, %v2085_v44 }
 0x3e1   :  { %5160 = vmatprep.subr.bf16.mxu1 %v6036_v50  ;;  %v2213_v49 = vld [vmem:[#allocation7 + $0x6e0] sm:$0xff] }
 0x3e2   :  { %5120 = vmatpush1.bf16.msra.mxu0 %v5907_v55  ;;  %v6116_v50 = vcombine.high %v2209_v46, %v2213_v49  ;;  %v2077_v55 = vld [vmem:[#allocation7 + $0x2a0] sm:$0xff] }
 0x3e3   :  { %5121 = vmatprep.subr.bf16.mxu0 %v5900_v57  ;;  %v6115_v57 = vcombine.low %v2209_v46, %v2213_v49  ;;  %v5979_v61 = vcombine.low %v2073_v54, %v2077_v55  ;;  %v7103_v24 = vld [vmem:[#allocation7 + $0x9c0] sm:$0xff] }
 0x3e4   :  { %5161 = vmatpush1.bf16.msra.mxu1 %v6035_v56  ;;  %v2201_v56 = vld [vmem:[#allocation7 + $0x680] sm:$0xff] }
 0x3e5   :  { %5162 = vmatprep.subr.bf16.mxu1 %v6028_v58  ;;  %v5980_v58 = vcombine.high %v2073_v54, %v2077_v55  ;;  %v7105_v25 = vld [vmem:[#allocation7 + $0x9e0] sm:$0xff] }
 0x3e6   :  { %5122 = vmatpush1.bf16.msra.mxu0 %v5899_v59  ;;  %v2205_v59 = vld [vmem:[#allocation7 + $0x6a0] sm:$0xff] }
 0x3e7   :  { %5123 = vmatprep.subr.bf16.mxu0 %v6020_v1  ;;  %v2069_v1 = vld [vmem:[#allocation7 + $0x260] sm:$0xff] }
 0x3e8   :  { %5163 = vmatpush1.bf16.msra.mxu1 %v6027_v60  ;;  %v6108_v60 = vcombine.high %v2201_v56, %v2205_v59  ;;  %v7107_v26 = vld [vmem:[#allocation7 + $0xdc0] sm:$0xff] }
 0x3e9   :  { %5164 = vmatprep.subr.bf16.mxu1 %v6148_v4  ;;  %v6631_v46 = vld [vmem:[#allocation2] sm:$0xff] }
 0x3ea   :  { %5124 = vmatpush2.bf16.msra.mxu0 %v6019_v0  ;;  %v2065_v0 = vld [vmem:[#allocation7 + $0x240] sm:$0xff]  ;;  %v7127_v55 = vrot.slane %v6631_v46, %v6903_v37 }
 0x3eb   :  { %5125 = vmatprep.subr.bf16.mxu0 %v6012_v9  ;;  %v5972_v4 = vcombine.high %v2065_v0, %v2069_v1  ;;  %v5971_v7 = vcombine.low %v2065_v0, %v2069_v1  ;;  %v7788_v9 = vsub.s32 5, %v6888_v32 }
 0x3ec   :  { %5165 = vmatpush2.bf16.msra.mxu1 %v6147_v3  ;;  %v6107_v3 = vcombine.low %v2201_v56, %v2205_v59 }
 0x3ed   :  { %5166 = vmatprep.subr.bf16.mxu1 %v6140_v13  ;;  %v2185_v13 = vld [vmem:[#allocation7 + $0x600] sm:$0xff] }
 0x3ee   :  { %5126 = vmatpush2.bf16.msra.mxu0 %v6011_v8 }
 0x3ef   :  { %5127 = vmatprep.subr.bf16.mxu0 %v6004_v18 }
 0x3f0   :  { %5167 = vmatpush2.bf16.msra.mxu1 %v6139_v12  ;;  %v2061_v12 = vld [vmem:[#allocation7 + $0x220] sm:$0xff] }
 0x3f1   :  { %5168 = vmatprep.subr.bf16.mxu1 %v6132_v28  ;;  %v5964_v15 = vcombine.high %v2057_v10, %v2061_v12  ;;  %v5963_v19 = vcombine.low %v2057_v10, %v2061_v12  ;;  %v6212_v28 = vcombine.high %v7103_v24, %v7105_v25  ;;  %v7167_v12 = vrot.slane %v6636_v2, %v6903_v37 }
 0x3f2   :  { %5128 = vmatpush2.bf16.msra.mxu0 %v6003_v17  ;;  %v2189_v17 = vld [vmem:[#allocation7 + $0x620] sm:$0xff] }
 0x3f3   :  { %5129 = vmatprep.subr.bf16.mxu0 %v5996_v30  ;;  %v6092_v18 = vcombine.high %v2185_v13, %v2189_v17  ;;  %v6091_v23 = vcombine.low %v2185_v13, %v2189_v17  ;;  %v6637_v13 = vld [vmem:[#allocation2 + $0x60] sm:$0xff] }
 0x3f4   :  { %5169 = vmatpush2.bf16.msra.mxu1 %v6131_v27  ;;  %v7786_v27 = vsub.s32 7, %v6888_v32 }
 0x3f5   :  { %5170 = vmatprep.subr.bf16.mxu1 %v6124_v31  ;;  %v7326_v31 = vld [vmem:[#allocation7 + $0xd00] sm:$0xff] }
 0x3f6   :  { %5130 = vmatpush2.bf16.msra.mxu0 %v5995_v29  ;;  %v7112_v29 = vld [vmem:[#allocation7 + $0xde0] sm:$0xff]  ;;  %7810 = vst [vmem:[#allocation19_spill] sm:$0xff] %v7326_v31 }
 0x3f7   :  { %5131 = vmatprep.subr.bf16.mxu0 %v5988_v48  ;;  %v6340_v43 = vcombine.high %v7107_v26, %v7112_v29  ;;  %v6632_v48 = vld [vmem:[#allocation2 + $0x10] sm:$0xff] }
 0x3f8   :  { %5171 = vmatpush2.bf16.msra.mxu1 %v6123_v47  ;;  %v1464_v47 = vcombine.high %v6631_v46, %v6631_v46  ;;  %v1498_v49 = vcombine.high %v6632_v48, %v6632_v48  ;;  %v7195_v46 = vrot.slane %v6987_v36, %v6903_v37 }
 0x3f9   :  { %5172 = vmatprep.subr.bf16.mxu1 %v6116_v50  ;;  %v6633_v50 = vld [vmem:[#allocation2 + $0x20] sm:$0xff] }
 0x3fa   :  { %5132 = vmatpush2.bf16.msra.mxu0 %v5987_v51  ;;  %v1532_v51 = vcombine.high %v6633_v50, %v6633_v50  ;;  %v7130_v56 = vrot.slane %v1464_v47, %v6903_v37  ;;  %v7136_v59 = vrot.slane %v1498_v49, %v6903_v37  ;;  %v1549_v47 = vcombine.high %v6989_v38, %v6989_v38 }
 0x3fb   :  { %5133 = vmatprep.subr.bf16.mxu0 %v5980_v58  ;;  %v6635_v58 = vld [vmem:[#allocation2 + $0x40] sm:$0xff]  ;;  %v7206_v49 = vrot.slane %v6989_v38, %v6903_v37 }
 0x3fc   :  { %5173 = vmatpush2.bf16.msra.mxu1 %v6115_v57  ;;  %v7133_v57 = vrot.slane %v6632_v48, %v6903_v37  ;;  %v7151_v1 = vrot.slane %v6635_v58, %v6903_v37  ;;  %v1480_v5 = vcombine.high %v7130_v56, %v7130_v56 }
 0x3fd   :  { %5174 = vmatprep.subr.bf16.mxu1 %v6108_v60  ;;  %v7139_v60 = vrot.slane %v6633_v50, %v6903_v37  ;;  %v1583_v50 = vcombine.high %v6991_v39, %v6991_v39 }
 0x3fe   :  { %5134 = vmatpush2.bf16.msra.mxu0 %v5979_v61  ;;  %v7142_v61 = vrot.slane %v1532_v51, %v6903_v37  ;;  %v6638_v51 = vld [vmem:[#allocation2 + $0x70] sm:$0xff] }
 0x3ff   :  { %5135 = vmatprep.subr.bf16.mxu0 %v5972_v4  ;;  %v1479_v4 = vcombine.high %v7127_v55, %v7127_v55 }
 0x400   :  { %5175 = vmatpush2.bf16.msra.mxu1 %v6107_v3  ;;  %v1634_v3 = vcombine.high %v6636_v2, %v6636_v2 }
 0x401   :  { %5176 = vmatprep.subr.bf16.mxu1 %v6100_v6 }
 0x402   :  { %5136 = vmatpush2.bf16.msra.mxu0 %v5971_v7 }
 0x403   :  { %5137 = vmatprep.subr.bf16.mxu0 %v5964_v15 }
 0x404   :  { %5177 = vmatpush2.bf16.msra.mxu1 %v6099_v14  ;;  %v1668_v14 = vcombine.high %v6637_v13, %v6637_v13 }
 0x405   :  { %5178 = vmatprep.subr.bf16.mxu1 %v6092_v18  ;;  %v7314_v18 = vld [vmem:[#allocation7 + $0x900] sm:$0xff] }
 0x406   :  { %5138 = vmatpush2.bf16.msra.mxu0 %v5963_v19  ;;  %v1481_v19 = vcombine.high %v6985_v35, %v6985_v35  ;;  %v7202_v48 = vrot.slane %v1668_v14, %v6903_v37  ;;  %v1685_v14 = vcombine.high %v6997_v42, %v6997_v42  ;;  %7808 = vst [vmem:[#allocation17_spill] sm:$0xff] %v7314_v18 }
 0x407   :  { %5189 = vmatprep.subr.bf16.mxu0 %v6212_v28  ;;  %v7184_v28 = vrot.slane %v6985_v35, %v6903_v37  ;;  %v7298_v35 = vld [vmem:[#allocation7 + $0x940] sm:$0xff] }
 0x408   :  { %5179 = vmatpush2.bf16.msra.mxu1 %v6091_v23  ;;  %v7180_v23 = vrot.slane %v1634_v3, %v6903_v37  ;;  %v1651_v3 = vcombine.high %v6995_v41, %v6995_v41 }
 0x409   :  { %5230 = vmatprep.subr.bf16.mxu1 %v6340_v43  ;;  %v1496_v38 = vcombine.high %v7184_v28, %v7184_v28  ;;  %v7300_v43 = vld [vmem:[#allocation7 + $0x960] sm:$0xff] }
 0x45b   :  { %v7077_v16 = vpop.trf.xlu1 }
 0x45c   :  { %v1411_v21 = vrot.slane %v7077_v16, %v7793_v11  ;;  %v1418_v33 = vrot.slane %v7077_v16, %v7792_v22  ;;  %v1425_v52 = vrot.slane %v7077_v16, %v7791_v34  ;;  %v1432_v62 = vrot.slane %v7077_v16, %v7790_v53  ;;  %v7282_v11 = vld [vmem:[#allocation7 + $0x980] sm:$0xff] }
 0x45d   :  { %v1439_v8 = vrot.slane %v7077_v16, %v7789_v63  ;;  %v1446_v20 = vrot.slane %v7077_v16, %v7788_v9  ;;  %v1460_v44 = vrot.slane %v7077_v16, %v7786_v27  ;;  %v7245_v27 = vrot.slane %v6993_v40, %v6903_v37  ;;  %v7324_v34 = vld [vmem:[#allocation7 + $0x920] sm:$0xff] }
 0x45e   :  { %1413 = vbcast.lane.b32.xlu0 %v1411_v21, 256  ;;  %v7787_v21 = vsub.s32 6, %v6888_v32  ;;  %7809 = vst [vmem:[#allocation18_spill] sm:$0xff] %v7324_v34 }
 0x460   :  { %v1453_v30 = vrot.slane %v7077_v16, %v7787_v21  ;;  %v1600_v16 = vcombine.high %v6635_v58, %v6635_v58  ;;  %v1617_v58 = vcombine.high %v6993_v40, %v6993_v40  ;;  %v7310_v21 = vld [vmem:[#allocation7 + $0xd40] sm:$0xff] }
 0x462   :  { %1420 = vbcast.lane.b32.xlu0 %v1418_v33, 256  ;;  %v7160_v7 = vrot.slane %v1600_v16, %v6903_v37  ;;  %v7220_v16 = vrot.slane %v6638_v51, %v6903_v37  ;;  %v7254_v9 = vrot.slane %v1617_v58, %v6903_v37  ;;  %v7272_v58 = vrot.slane %v1651_v3, %v6903_v37  ;;  %v7286_v33 = vld [vmem:[#allocation7 + $0xd80] sm:$0xff] }
 0x466   :  { %1427 = vbcast.lane.b32.xlu0 %v1425_v52, 256  ;;  %v6634_v52 = vld [vmem:[#allocation2 + $0x30] sm:$0xff] }
 0x467   :  { %v1566_v54 = vcombine.high %v6634_v52, %v6634_v52 }
 0x469   :  { %v7148_v0 = vrot.slane %v1566_v54, %v6903_v37  ;;  %v7215_v54 = vrot.slane %v6991_v39, %v6903_v37  ;;  %v7232_v39 = vrot.slane %v1549_v47, %v6903_v37  ;;  %v7249_v47 = vrot.slane %v6995_v41, %v6903_v37 }
 0x46a   :  { %1434 = vbcast.lane.b32.xlu0 %v1432_v62, 256  ;;  %v7145_v62 = vrot.slane %v6634_v52, %v6903_v37  ;;  %v1702_v52 = vcombine.high %v6638_v51, %v6638_v51  ;;  %v7269_v41 = vrot.slane %v7003_v45, %v6903_v37  ;;  %v7328_v51 = vld [vmem:[#allocation7 + $0xd20] sm:$0xff] }
 0x46b   :  { %7811 = vst [vmem:[#allocation20_spill] sm:$0xff] %v7328_v51 }
 0x46c   :  { %v7265_v53 = vrot.slane %v1702_v52, %v6903_v37  ;;  %v7284_v52 = vld [vmem:[#allocation7 + $0x9a0] sm:$0xff] }
 0x46e   :  { %1441 = vbcast.lane.b32.xlu0 %v1439_v8, 256 }
 0x472   :  { %1448 = vbcast.lane.b32.xlu0 %v1446_v20, 256 }
 0x476   :  { %1455 = vbcast.lane.b32.xlu0 %v1453_v30, 256  ;;  %v1515_v30 = vcombine.high %v6987_v36, %v6987_v36  ;;  %v7211_v36 = vrot.slane %v1481_v19, %v6903_v37  ;;  %v1719_v19 = vcombine.high %v7003_v45, %v7003_v45 }
 0x478   :  { %v7225_v2 = vrot.slane %v1515_v30, %v6903_v37  ;;  %v7241_v30 = vrot.slane %v1583_v50, %v6903_v37  ;;  %v1497_v63 = vcombine.high %v7211_v36, %v7211_v36  ;;  %v7260_v50 = vrot.slane %v6997_v42, %v6903_v37 }
 0x479   :  { %v7277_v42 = vrot.slane %v1685_v14, %v6903_v37  ;;  %v7280_v22 = vrot.slane %v1719_v19, %v6903_v37  ;;  %v7296_v19 = vld [vmem:[#allocation7 + $0xda0] sm:$0xff] }
 0x47a   :  { %1462 = vbcast.lane.b32.xlu0 %v1460_v44, 256  ;;  %v7191_v44 = vrot.slane %v6637_v13, %v6903_v37  ;;  %v7312_v14 = vld [vmem:[#allocation7 + $0xd60] sm:$0xff] }
 0x4d0   :  { %v1414_v13 = vpop.permute.xlu0 %1413 }
 0x4d1   :  { %v1800_v10 = vmul.f32 %v7127_v55, %v1414_v13  ;;  %v1801_v40 = vmul.f32 %v1479_v4, %v1414_v13  ;;  %v1802_v15 = vmul.f32 %v7130_v56, %v1414_v13  ;;  %v1803_v17 = vmul.f32 %v1480_v5, %v1414_v13 }
 0x4d2   :  { %v1804_v20 = vmul.f32 %v7184_v28, %v1414_v13  ;;  %v1805_v45 = vmul.f32 %v1496_v38, %v1414_v13  ;;  %v1806_v3 = vmul.f32 %v7211_v36, %v1414_v13  ;;  %v1807_v8 = vmul.f32 %v1497_v63, %v1414_v13 }
 0x4d3   :  { %v1880_v6 = vsel %vm1864_vm4, %v1801_v40, 0.0  ;;  %v1910_v55 = vsel %vm1864_vm4, %v1803_v17, 0.0  ;;  %v1865_v4 = vsel %vm1864_vm4, %v1800_v10, 0.0  ;;  %v1895_v37 = vsel %vm1864_vm4, %v1802_v15, 0.0 }
 0x4d4   :  { %v1421_v32 = vpop.permute.xlu0 %1420  ;;  %v1940_v56 = vsel %vm1864_vm4, %v1805_v45, 0.0  ;;  %v7373_v5 = vsel %vm1864_vm4, %v1807_v8, 0.0  ;;  %v7376_v28 = vsel %vm1864_vm4, %v1804_v20, 0.0  ;;  %v7379_v36 = vsel %vm1864_vm4, %v1806_v3, 0.0 }
 0x4d5   :  { %7812 = vst [vmem:[#allocation21_spill] sm:$0xff] %v7379_v36  ;;  %v1808_v63 = vmul.f32 %v7133_v57, %v1421_v32  ;;  %v7813_v17 = vcombine.high %v7133_v57, %v7133_v57  ;;  %v1810_v15 = vmul.f32 %v7136_v59, %v1421_v32  ;;  %v7814_v38 = vcombine.high %v7136_v59, %v7136_v59 }
 0x4d6   :  { %v7390_v8 = vmul.f32 %v7195_v46, %v1421_v32  ;;  %v7815_v20 = vcombine.high %v7195_v46, %v7195_v46  ;;  %v7396_v45 = vmul.f32 %v7225_v2, %v1421_v32  ;;  %v7816_v57 = vcombine.high %v7225_v2, %v7225_v2 }
 0x4d7   :  { %v1809_v10 = vmul.f32 %v7813_v17, %v1421_v32  ;;  %v1811_v13 = vmul.f32 %v7814_v38, %v1421_v32  ;;  %v1866_v38 = vsel %vm1864_vm4, %v1808_v63, 0.0  ;;  %v1896_v31 = vsel %vm1864_vm4, %v1810_v15, 0.0 }
 0x4d8   :  { %v1813_v40 = vmul.f32 %v7815_v20, %v1421_v32  ;;  %v7401_v3 = vmul.f32 %v7816_v57, %v1421_v32  ;;  %v1428_v51 = vpop.permute.xlu0 %1427  ;;  %v1867_v20 = vadd.f32 %v1866_v38, %v1865_v4  ;;  %v1897_v34 = vadd.f32 %v1896_v31, %v1895_v37 }
 0x4d9   :  { %v1881_v17 = vsel %vm1864_vm4, %v1809_v10, 0.0  ;;  %v1911_v59 = vsel %vm1864_vm4, %v1811_v13, 0.0  ;;  %v1816_v36 = vmul.f32 %v7139_v60, %v1428_v51  ;;  %v7817_v2 = vcombine.high %v7139_v60, %v7139_v60 }
 0x4da   :  { %v1882_v18 = vadd.f32 %v1881_v17, %v1880_v6  ;;  %v1912_v46 = vadd.f32 %v1911_v59, %v1910_v55  ;;  %v1818_v57 = vmul.f32 %v7142_v61, %v1428_v51  ;;  %v7818_v10 = vcombine.high %v7142_v61, %v7142_v61 }
 0x4db   :  { %v1817_v32 = vmul.f32 %v7817_v2, %v1428_v51  ;;  %v7416_v63 = vmul.f32 %v7206_v49, %v1428_v51  ;;  %v7819_v6 = vcombine.high %v7206_v49, %v7206_v49  ;;  %v7422_v37 = vmul.f32 %v7232_v39, %v1428_v51 }
 0x4dc   :  { %v1819_v13 = vmul.f32 %v7818_v10, %v1428_v51  ;;  %v7820_v31 = vcombine.high %v7232_v39, %v7232_v39  ;;  %v1868_v15 = vsel %vm1864_vm4, %v1816_v36, 0.0  ;;  %v1898_v17 = vsel %vm1864_vm4, %v1818_v57, 0.0  ;;  %v7433_v59 = vpop.permute.xlu0 %1434 }
 0x4dd   :  { %v1821_v55 = vmul.f32 %v7819_v6, %v1428_v51  ;;  %v1883_v4 = vsel %vm1864_vm4, %v1817_v32, 0.0  ;;  %v1869_v2 = vadd.f32 %v1868_v15, %v1867_v20  ;;  %v1899_v10 = vadd.f32 %v1898_v17, %v1897_v34 }
 0x4de   :  { %v7427_v60 = vmul.f32 %v7820_v31, %v1428_v51  ;;  %v1913_v61 = vsel %vm1864_vm4, %v1819_v13, 0.0  ;;  %v1884_v49 = vadd.f32 %v1883_v4, %v1882_v18  ;;  %v7821_v39 = vcombine.high %v7145_v62, %v7145_v62 }
 0x4df   :  { %v1914_v38 = vadd.f32 %v1913_v61, %v1912_v46  ;;  %v7822_v32 = vcombine.high %v7148_v0, %v7148_v0  ;;  %v1824_v36 = vmul.f32 %v7145_v62, %v7433_v59  ;;  %v1826_v57 = vmul.f32 %v7148_v0, %v7433_v59 }
 0x4e0   :  { %v1825_v51 = vmul.f32 %v7821_v39, %v7433_v59  ;;  %v7823_v34 = vcombine.high %v7215_v54, %v7215_v54  ;;  %v1941_v46 = vsel %vm1864_vm4, %v1813_v40, 0.0  ;;  %v1943_v20 = vsel %vm1864_vm4, %v1821_v55, 0.0  ;;  %v7463_v15 = vpop.permute.xlu0 %1441 }
 0x4e1   :  { %v1827_v13 = vmul.f32 %v7822_v32, %v7433_v59  ;;  %v7824_v6 = vcombine.high %v7241_v30, %v7241_v30  ;;  %v1870_v0 = vsel %vm1864_vm4, %v1824_v36, 0.0  ;;  %v1900_v61 = vsel %vm1864_vm4, %v1826_v57, 0.0 }
 0x4e2   :  { %v1829_v18 = vmul.f32 %v7823_v34, %v7433_v59  ;;  %v1885_v62 = vsel %vm1864_vm4, %v1825_v51, 0.0  ;;  %v1871_v39 = vadd.f32 %v1870_v0, %v1869_v2  ;;  %v1901_v55 = vadd.f32 %v1900_v61, %v1899_v10 }
 0x4e3   :  { %v7457_v31 = vmul.f32 %v7824_v6, %v7433_v59  ;;  %v1915_v4 = vsel %vm1864_vm4, %v1827_v13, 0.0  ;;  %v1886_v17 = vadd.f32 %v1885_v62, %v1884_v49  ;;  %v7825_v32 = vcombine.high %v7151_v1, %v7151_v1 }
 0x4e4   :  { %v1916_v40 = vadd.f32 %v1915_v4, %v1914_v38  ;;  %v7826_v51 = vcombine.high %v7160_v7, %v7160_v7  ;;  %v1832_v36 = vmul.f32 %v7151_v1, %v7463_v15  ;;  %v1834_v57 = vmul.f32 %v7160_v7, %v7463_v15  ;;  %v7492_v61 = vpop.permute.xlu0 %1448 }
 0x4e5   :  { %v1833_v34 = vmul.f32 %v7825_v32, %v7463_v15  ;;  %v7827_v49 = vcombine.high %v7245_v27, %v7245_v27  ;;  %v1942_v2 = vadd.f32 %v1941_v46, %v1940_v56  ;;  %v1945_v10 = vsel %vm1864_vm4, %v1829_v18, 0.0 }
 0x4e6   :  { %v1835_v13 = vmul.f32 %v7826_v51, %v7463_v15  ;;  %v7828_v6 = vcombine.high %v7254_v9, %v7254_v9  ;;  %v1872_v7 = vsel %vm1864_vm4, %v1832_v36, 0.0  ;;  %v1902_v0 = vsel %vm1864_vm4, %v1834_v57, 0.0 }
 0x4e7   :  { %v1837_v38 = vmul.f32 %v7827_v49, %v7463_v15  ;;  %v1887_v4 = vsel %vm1864_vm4, %v1833_v34, 0.0  ;;  %v1873_v46 = vadd.f32 %v1872_v7, %v1871_v39  ;;  %v1903_v18 = vadd.f32 %v1902_v0, %v1901_v55 }
 0x4e8   :  { %v7486_v62 = vmul.f32 %v7828_v6, %v7463_v15  ;;  %v1917_v1 = vsel %vm1864_vm4, %v1835_v13, 0.0  ;;  %v1888_v32 = vadd.f32 %v1887_v4, %v1886_v17  ;;  %v7829_v51 = vcombine.high %v7167_v12, %v7167_v12  ;;  %v7519_v0 = vpop.permute.xlu0 %1455 }
 0x4e9   :  { %v1918_v56 = vadd.f32 %v1917_v1, %v1916_v40  ;;  %v7830_v34 = vcombine.high %v7180_v23, %v7180_v23  ;;  %v1840_v36 = vmul.f32 %v7167_v12, %v7492_v61  ;;  %v1842_v57 = vmul.f32 %v7180_v23, %v7492_v61 }
 0x4ea   :  { %v1841_v49 = vmul.f32 %v7829_v51, %v7492_v61  ;;  %v7831_v17 = vcombine.high %v7249_v47, %v7249_v47  ;;  %v1944_v39 = vadd.f32 %v1943_v20, %v1942_v2  ;;  %v1947_v55 = vsel %vm1864_vm4, %v1837_v38, 0.0 }
 0x4eb   :  { %v1843_v13 = vmul.f32 %v7830_v34, %v7492_v61  ;;  %v7832_v6 = vcombine.high %v7272_v58, %v7272_v58  ;;  %v1874_v7 = vsel %vm1864_vm4, %v1840_v36, 0.0  ;;  %v1904_v23 = vsel %vm1864_vm4, %v1842_v57, 0.0 }
 0x4ec   :  { %v1845_v40 = vmul.f32 %v7831_v17, %v7492_v61  ;;  %v1889_v1 = vsel %vm1864_vm4, %v1841_v49, 0.0  ;;  %v1875_v20 = vadd.f32 %v1874_v7, %v1873_v46  ;;  %v1905_v2 = vadd.f32 %v1904_v23, %v1903_v18  ;;  %v7546_v23 = vpop.permute.xlu0 %1462 }
 0x4ed   :  { %v1847_v4 = vmul.f32 %v7832_v6, %v7492_v61  ;;  %v1919_v12 = vsel %vm1864_vm4, %v1843_v13, 0.0  ;;  %v1890_v51 = vadd.f32 %v1889_v1, %v1888_v32  ;;  %v7833_v38 = vcombine.high %v7191_v44, %v7191_v44 }
 0x4ee   :  { %v1920_v34 = vadd.f32 %v1919_v12, %v1918_v56  ;;  %v7834_v49 = vcombine.high %v7202_v48, %v7202_v48  ;;  %v1848_v36 = vmul.f32 %v7191_v44, %v7519_v0  ;;  %v1850_v57 = vmul.f32 %v7202_v48, %v7519_v0 }
 0x4ef   :  { %v1849_v17 = vmul.f32 %v7833_v38, %v7519_v0  ;;  %v7835_v32 = vcombine.high %v7260_v50, %v7260_v50  ;;  %v1946_v46 = vadd.f32 %v1945_v10, %v1944_v39  ;;  %v1949_v18 = vsel %vm1864_vm4, %v1845_v40, 0.0 }
 0x4f0   :  { %v1851_v13 = vmul.f32 %v7834_v49, %v7519_v0  ;;  %v7836_v6 = vcombine.high %v7277_v42, %v7277_v42  ;;  %v1876_v7 = vsel %vm1864_vm4, %v1848_v36, 0.0  ;;  %v1906_v48 = vsel %vm1864_vm4, %v1850_v57, 0.0 }
 0x4f1   :  { %v1853_v56 = vmul.f32 %v7835_v32, %v7519_v0  ;;  %v1891_v12 = vsel %vm1864_vm4, %v1849_v17, 0.0  ;;  %v1877_v10 = vadd.f32 %v1876_v7, %v1875_v20  ;;  %v1907_v39 = vadd.f32 %v1906_v48, %v1905_v2 }
 0x4f2   :  { %v1855_v1 = vmul.f32 %v7836_v6, %v7519_v0  ;;  %v1921_v44 = vsel %vm1864_vm4, %v1851_v13, 0.0  ;;  %v1892_v38 = vadd.f32 %v1891_v12, %v1890_v51  ;;  %v7837_v40 = vcombine.high %v7220_v16, %v7220_v16 }
 0x4f3   :  { %v1922_v49 = vadd.f32 %v1921_v44, %v1920_v34  ;;  %v7838_v17 = vcombine.high %v7265_v53, %v7265_v53  ;;  %v1856_v36 = vmul.f32 %v7220_v16, %v7546_v23  ;;  %v1858_v57 = vmul.f32 %v7265_v53, %v7546_v23 }
 0x4f4   :  { %v1857_v32 = vmul.f32 %v7837_v40, %v7546_v23  ;;  %v7839_v51 = vcombine.high %v7269_v41, %v7269_v41  ;;  %v1948_v20 = vadd.f32 %v1947_v55, %v1946_v46  ;;  %v1951_v2 = vsel %vm1864_vm4, %v1853_v56, 0.0 }
 0x4f5   :  { %v1859_v13 = vmul.f32 %v7838_v17, %v7546_v23  ;;  %v7840_v6 = vcombine.high %v7280_v22, %v7280_v22  ;;  %v1878_v7 = vsel %vm1864_vm4, %v1856_v36, 0.0  ;;  %v1908_v53 = vsel %vm1864_vm4, %v1858_v57, 0.0 }
 0x4f6   :  { %v1861_v34 = vmul.f32 %v7839_v51, %v7546_v23  ;;  %v1893_v44 = vsel %vm1864_vm4, %v1857_v32, 0.0  ;;  %v1879_v17 = vadd.f32 %v1878_v7, %v1877_v10  ;;  %v1909_v51 = vadd.f32 %v1908_v53, %v1907_v39 }
 0x4f7   :  { %v1863_v12 = vmul.f32 %v7840_v6, %v7546_v23  ;;  %v1923_v16 = vsel %vm1864_vm4, %v1859_v13, 0.0  ;;  %v1894_v48 = vadd.f32 %v1893_v44, %v1892_v38  ;;  %v1950_v55 = vadd.f32 %v1949_v18, %v1948_v20 }
 0x4f8   :  { %v1924_v40 = vadd.f32 %v1923_v16, %v1922_v49  ;;  %v1953_v56 = vsel %vm1864_vm4, %v1861_v34, 0.0  ;;  %v1971_v46 = vsel %vm1864_vm4, %v7401_v3, 0.0  ;;  %v1973_v6 = vsel %vm1864_vm4, %v7427_v60, 0.0 }
 0x4f9   :  { %v7578_v32 = vpack.c.bf16 %v1894_v48, %v1894_v48  ;;  %v7582_v36 = vpack.c.bf16 %v1879_v17, %v1879_v17  ;;  %v7584_v57 = vpack.c.bf16 %v1909_v51, %v1909_v51  ;;  %v1952_v38 = vadd.f32 %v1951_v2, %v1950_v55 }
 0x4fa   :  { %v7580_v13 = vpack.c.bf16 %v1924_v40, %v1924_v40  ;;  %v1972_v49 = vadd.f32 %v1971_v46, %v7373_v5  ;;  %v1975_v18 = vsel %vm1864_vm4, %v7457_v31, 0.0  ;;  %v1977_v3 = vsel %vm1864_vm4, %v7486_v62, 0.0  ;;  %v2405_v46 = vld [vmem:[#allocation7 + $0xce0] sm:$0xff] }
 0x4fb   :  { %5139 = vmatprep.mubr.bf16.mxu0 %v7578_v32  ;;  %v1979_v60 = vsel %vm1864_vm4, %v1847_v4, 0.0  ;;  %v1981_v10 = vsel %vm1864_vm4, %v1855_v1, 0.0  ;;  %v1983_v39 = vsel %vm1864_vm4, %v1863_v12, 0.0  ;;  %v1828_v34 = vmul.f32 %v7215_v54, %v7433_v59 }
 0x4fc   :  { %5180 = vmatprep.mubr.bf16.mxu1 %v7580_v13  ;;  %5140 = vmatmul.mubr.bf16.vlgmr.msra.gmra.mxu0 %v7582_v36  ;;  %v1954_v5 = vadd.f32 %v1953_v56, %v1952_v38  ;;  %v1974_v31 = vadd.f32 %v1973_v6, %v1972_v49  ;;  %v1836_v62 = vmul.f32 %v7245_v27, %v7463_v15  ;;  %v1926_v20 = vsel %vm1864_vm4, %v7390_v8, 0.0  ;;  %v2401_v56 = vld [vmem:[#allocation7 + $0xcc0] sm:$0xff] }
 0x4fd   :  { %5181 = vmatmul.mubr.bf16.vlgmr.msra.gmra.mxu1 %v7584_v57  ;;  %v7841_v4 = vcombine.low %v7103_v24, %v7105_v25  ;;  %v7842_v1 = vcombine.low %v7107_v26, %v7112_v29  ;;  %v1844_v54 = vmul.f32 %v7249_v47, %v7492_v61  ;;  %v1852_v2 = vmul.f32 %v7260_v50, %v7519_v0 }
 0x4fe   :  { %v1860_v27 = vmul.f32 %v7269_v41, %v7546_v23  ;;  %v1928_v8 = vsel %vm1864_vm4, %v7416_v63, 0.0  ;;  %v7618_v12 = vpack.c.bf16 %v1954_v5, %v1954_v5  ;;  %v1976_v24 = vadd.f32 %v1975_v18, %v1974_v31  ;;  %v7854_v5 = vld [vmem:[#allocation20_spill] sm:$0xff]  ;;  %v7855_v31 = vld [vmem:[#allocation19_spill] sm:$0xff] }
 0x4ff   :  { %5190 = vmatpush1.bf16.msra.mxu0 %v7841_v4  ;;  %5231 = vmatpush1.bf16.msra.mxu1 %v7842_v1  ;;  %v7843_v25 = vcombine.high %v7282_v11, %v7284_v52  ;;  %v7844_v26 = vcombine.high %v7286_v33, %v7296_v19  ;;  %v1927_v29 = vadd.f32 %v1926_v20, %v7376_v28  ;;  %v1930_v47 = vsel %vm1864_vm4, %v1828_v34, 0.0  ;;  %v2269_v1 = vld [vmem:[#allocation7 + $0x8a0] sm:$0xff] }
 0x500   :  { %v1932_v50 = vsel %vm1864_vm4, %v1836_v62, 0.0  ;;  %v1934_v41 = vsel %vm1864_vm4, %v1844_v54, 0.0  ;;  %v1936_v63 = vsel %vm1864_vm4, %v1852_v2, 0.0  ;;  %v1938_v44 = vsel %vm1864_vm4, %v1860_v27, 0.0  ;;  %5221 = vmatprep.mubr.bf16.mxu0 %v7618_v12  ;;  %v2393_v2 = vld [vmem:[#allocation7 + $0xc80] sm:$0xff] }
 0x501   :  { %5191 = vmatprep.subr.bf16.mxu0 %v7843_v25  ;;  %5232 = vmatprep.subr.bf16.mxu1 %v7844_v26  ;;  %v1978_v16 = vadd.f32 %v1977_v3, %v1976_v24  ;;  %v1929_v7 = vadd.f32 %v1928_v8, %v1927_v29  ;;  %v1830_v53 = vmul.f32 %v7241_v30, %v7433_v59  ;;  %v7852_v3 = vld [vmem:[#allocation18_spill] sm:$0xff]  ;;  %v2397_v27 = vld [vmem:[#allocation7 + $0xca0] sm:$0xff] }
 0x502   :  { %v1838_v28 = vmul.f32 %v7254_v9, %v7463_v15  ;;  %v7845_v48 = vcombine.low %v7282_v11, %v7284_v52  ;;  %v7846_v40 = vcombine.low %v7286_v33, %v7296_v19  ;;  %v1846_v17 = vmul.f32 %v7272_v58, %v7492_v61  ;;  %v2273_v52 = vld [vmem:[#allocation7 + $0x8c0] sm:$0xff]  ;;  %v7849_v15 = vld [vmem:[#allocation21_spill] sm:$0xff] }
 0x503   :  { %v1854_v51 = vmul.f32 %v7277_v42, %v7519_v0  ;;  %v1862_v30 = vmul.f32 %v7280_v22, %v7546_v23  ;;  %v1956_v9 = vsel %vm1864_vm4, %v7396_v45, 0.0  ;;  %v1980_v59 = vadd.f32 %v1979_v60, %v1978_v16  ;;  %v2277_v58 = vld [vmem:[#allocation7 + $0x8e0] sm:$0xff]  ;;  %v7853_v60 = vld [vmem:[#allocation17_spill] sm:$0xff] }
 0x504   :  { %5192 = vmatpush1.bf16.msra.mxu0 %v7845_v48  ;;  %5233 = vmatpush1.bf16.msra.mxu1 %v7846_v40  ;;  %v7847_v11 = vcombine.high %v7298_v35, %v7300_v43  ;;  %v7848_v33 = vcombine.high %v7310_v21, %v7312_v14  ;;  %v1931_v19 = vadd.f32 %v1930_v47, %v1929_v7  ;;  %v1958_v22 = vsel %vm1864_vm4, %v7422_v37, 0.0  ;;  %v2261_v7 = vld [vmem:[#allocation7 + $0x860] sm:$0xff] }
 0x505   :  { %v1957_v42 = vadd.f32 %v1956_v9, %v7849_v15  ;;  %v1960_v61 = vsel %vm1864_vm4, %v1830_v53, 0.0  ;;  %v1962_v45 = vsel %vm1864_vm4, %v1838_v28, 0.0  ;;  %v1964_v0 = vsel %vm1864_vm4, %v1846_v17, 0.0  ;;  %v2385_v53 = vld [vmem:[#allocation7 + $0xc40] sm:$0xff] }
 0x506   :  { %5193 = vmatprep.subr.bf16.mxu0 %v7847_v11  ;;  %5234 = vmatprep.subr.bf16.mxu1 %v7848_v33  ;;  %v1966_v23 = vsel %vm1864_vm4, %v1854_v51, 0.0  ;;  %v1982_v55 = vadd.f32 %v1981_v10, %v1980_v59  ;;  %v1933_v6 = vadd.f32 %v1932_v50, %v1931_v19  ;;  %v1968_v49 = vsel %vm1864_vm4, %v1862_v30, 0.0  ;;  %v2257_v50 = vld [vmem:[#allocation7 + $0x840] sm:$0xff] }
 0x507   :  { %v1959_v38 = vadd.f32 %v1958_v22, %v1957_v42  ;;  %v7850_v18 = vcombine.low %v7298_v35, %v7300_v43  ;;  %v7851_v37 = vcombine.low %v7310_v21, %v7312_v14  ;;  %v6187_v34 = vcombine.low %v7853_v60, %v7852_v3  ;;  %v2265_v35 = vld [vmem:[#allocation7 + $0x880] sm:$0xff] }
 0x508   :  { %v6315_v10 = vcombine.low %v7855_v31, %v7854_v5  ;;  %v6180_v62 = vcombine.high %v2273_v52, %v2277_v58  ;;  %v1984_v20 = vadd.f32 %v1983_v39, %v1982_v55  ;;  %v7856_v4 = vcombine.high %v7853_v60, %v7852_v3  ;;  %v2389_v28 = vld [vmem:[#allocation7 + $0xc60] sm:$0xff] }
 0x509   :  { %5194 = vmatpush1.bf16.msra.mxu0 %v7850_v18  ;;  %5235 = vmatpush1.bf16.msra.mxu1 %v7851_v37  ;;  %v7857_v43 = vcombine.high %v7855_v31, %v7854_v5  ;;  %v1935_v21 = vadd.f32 %v1934_v41, %v1933_v6  ;;  %v1961_v14 = vadd.f32 %v1960_v61, %v1959_v38  ;;  %v2249_v30 = vld [vmem:[#allocation7 + $0x800] sm:$0xff] }
 0x50a   :  { %5195 = vmatprep.subr.bf16.mxu0 %v7856_v4  ;;  %v6308_v54 = vcombine.high %v2401_v56, %v2405_v46  ;;  %v7681_v8 = vpack.c.bf16 %v1984_v20, %v1984_v20  ;;  %v6179_v39 = vcombine.low %v2273_v52, %v2277_v58  ;;  %v6307_v26 = vcombine.low %v2401_v56, %v2405_v46  ;;  %v2253_v59 = vld [vmem:[#allocation7 + $0x820] sm:$0xff] }
 0x50b   :  { %5236 = vmatprep.subr.bf16.mxu1 %v7857_v43  ;;  %v1937_v24 = vadd.f32 %v1936_v63, %v1935_v21  ;;  %v1963_v25 = vadd.f32 %v1962_v45, %v1961_v14  ;;  %v6172_v29 = vcombine.high %v2265_v35, %v2269_v1  ;;  %v6300_v47 = vcombine.high %v2393_v2, %v2397_v27  ;;  %v2381_v11 = vld [vmem:[#allocation7 + $0xc20] sm:$0xff] }
 0x50c   :  { %5262 = vmatprep.mubr.bf16.mxu1 %v7681_v8  ;;  %v6171_v63 = vcombine.low %v2265_v35, %v2269_v1  ;;  %v6299_v40 = vcombine.low %v2393_v2, %v2397_v27  ;;  %v6164_v17 = vcombine.high %v2257_v50, %v2261_v7  ;;  %v6292_v51 = vcombine.high %v2385_v53, %v2389_v28  ;;  %v2369_v15 = vld [vmem:[#allocation7 + $0xbc0] sm:$0xff] }
 0x50d   :  { %5196 = vmatpush1.bf16.msra.mxu0 %v6187_v34  ;;  %5237 = vmatpush1.bf16.msra.mxu1 %v6315_v10  ;;  %v7684_v16 = vadd.f32 %v1938_v44, %v1937_v24  ;;  %v1965_v41 = vadd.f32 %v1964_v0, %v1963_v25  ;;  %v2377_v44 = vld [vmem:[#allocation7 + $0xc00] sm:$0xff]  ;;  %v6163_v33 = vcombine.low %v2257_v50, %v2261_v7 }
 0x50e   :  { %5197 = vmatprep.subr.bf16.mxu0 %v6180_v62  ;;  %5238 = vmatprep.subr.bf16.mxu1 %v6308_v54  ;;  %v6291_v52 = vcombine.low %v2385_v53, %v2389_v28  ;;  %v6156_v58 = vcombine.high %v2249_v30, %v2253_v59  ;;  %v6284_v19 = vcombine.high %v2377_v44, %v2381_v11  ;;  %v2373_v42 = vld [vmem:[#allocation7 + $0xbe0] sm:$0xff] }
 0x50f   :  { %v1967_v48 = vadd.f32 %v1966_v23, %v1965_v41  ;;  %v2497_v22 = vld [vmem:[#allocation7 + $0xfc0] sm:$0xff]  ;;  %v6155_v45 = vcombine.low %v2249_v30, %v2253_v59  ;;  %v6283_v0 = vcombine.low %v2377_v44, %v2381_v11  ;;  %v6276_v23 = vcombine.high %v2369_v15, %v2373_v42 }
 0x510   :  { %v2501_v61 = vld [vmem:[#allocation7 + $0xfe0] sm:$0xff] }
 0x511   :  { %5198 = vmatpush1.bf16.msra.mxu0 %v6179_v39  ;;  %5239 = vmatpush1.bf16.msra.mxu1 %v6307_v26  ;;  %v7686_v9 = vadd.f32 %v1968_v49, %v1967_v48  ;;  %v6404_v55 = vcombine.high %v2497_v22, %v2501_v61  ;;  %v2361_v56 = vld [vmem:[#allocation7 + $0xb80] sm:$0xff]  ;;  %v6275_v49 = vcombine.low %v2369_v15, %v2373_v42 }
 0x512   :  { %5199 = vmatprep.subr.bf16.mxu0 %v6172_v29  ;;  %5240 = vmatprep.subr.bf16.mxu1 %v6300_v47  ;;  %v2365_v46 = vld [vmem:[#allocation7 + $0xba0] sm:$0xff]  ;;  %v6403_v18 = vcombine.low %v2497_v22, %v2501_v61 }
 0x513   :  { %v2489_v6 = vld [vmem:[#allocation7 + $0xf80] sm:$0xff]  ;;  %v6268_v37 = vcombine.high %v2361_v56, %v2365_v46  ;;  %v6267_v10 = vcombine.low %v2361_v56, %v2365_v46  ;;  %v2050_v56 = vld [vmem:[#allocation7 + $0x1c8] sm:$0xff] }
 0x514   :  { %v2493_v38 = vld [vmem:[#allocation7 + $0xfa0] sm:$0xff]  ;;  %v2054_v46 = vld [vmem:[#allocation7 + $0x1e8] sm:$0xff] }
 0x515   :  { %5200 = vmatpush1.bf16.msra.mxu0 %v6171_v63  ;;  %5241 = vmatpush1.bf16.msra.mxu1 %v6299_v40  ;;  %v6396_v3 = vcombine.high %v2489_v6, %v2493_v38  ;;  %v2353_v60 = vld [vmem:[#allocation7 + $0xb40] sm:$0xff]  ;;  %v6395_v62 = vcombine.low %v2489_v6, %v2493_v38  ;;  %v2178_v6 = vld [vmem:[#allocation7 + $0x5c8] sm:$0xff] }
 0x516   :  { %5201 = vmatprep.subr.bf16.mxu0 %v6164_v17  ;;  %5242 = vmatprep.subr.bf16.mxu1 %v6292_v51  ;;  %v2357_v34 = vld [vmem:[#allocation7 + $0xb60] sm:$0xff]  ;;  %v2182_v38 = vld [vmem:[#allocation7 + $0x5e8] sm:$0xff] }
 0x517   :  { %v2481_v5 = vld [vmem:[#allocation7 + $0xf40] sm:$0xff]  ;;  %v6260_v20 = vcombine.high %v2353_v60, %v2357_v34  ;;  %v6259_v14 = vcombine.low %v2353_v60, %v2357_v34  ;;  %v2042_v60 = vld [vmem:[#allocation7 + $0x188] sm:$0xff] }
 0x518   :  { %v2485_v31 = vld [vmem:[#allocation7 + $0xf60] sm:$0xff]  ;;  %v2046_v34 = vld [vmem:[#allocation7 + $0x1a8] sm:$0xff] }
 0x519   :  { %5202 = vmatpush1.bf16.msra.mxu0 %v6163_v33  ;;  %5243 = vmatpush1.bf16.msra.mxu1 %v6291_v52  ;;  %v6388_v4 = vcombine.high %v2481_v5, %v2485_v31  ;;  %v2345_v43 = vld [vmem:[#allocation7 + $0xb00] sm:$0xff]  ;;  %v6387_v54 = vcombine.low %v2481_v5, %v2485_v31  ;;  %v2170_v5 = vld [vmem:[#allocation7 + $0x588] sm:$0xff] }
 0x51a   :  { %5203 = vmatprep.subr.bf16.mxu0 %v6156_v58  ;;  %5244 = vmatprep.subr.bf16.mxu1 %v6284_v19  ;;  %v2349_v35 = vld [vmem:[#allocation7 + $0xb20] sm:$0xff]  ;;  %v2174_v31 = vld [vmem:[#allocation7 + $0x5a8] sm:$0xff] }
 0x51b   :  { %v2473_v1 = vld [vmem:[#allocation7 + $0xf00] sm:$0xff]  ;;  %v6252_v2 = vcombine.high %v2345_v43, %v2349_v35  ;;  %v6251_v29 = vcombine.low %v2345_v43, %v2349_v35  ;;  %v5950_v43 = vcombine.high %v2042_v60, %v2046_v34  ;;  %v6078_v35 = vcombine.high %v2170_v5, %v2174_v31 }
 0x51c   :  { %v2477_v21 = vld [vmem:[#allocation7 + $0xf20] sm:$0xff] }
 0x51d   :  { %5204 = vmatpush1.bf16.msra.mxu0 %v6155_v45  ;;  %5245 = vmatpush1.bf16.msra.mxu1 %v6283_v0  ;;  %v6380_v27 = vcombine.high %v2473_v1, %v2477_v21  ;;  %v2337_v24 = vld [vmem:[#allocation7 + $0xac0] sm:$0xff]  ;;  %v6379_v47 = vcombine.low %v2473_v1, %v2477_v21  ;;  %v2034_v1 = vld [vmem:[#allocation7 + $0x148] sm:$0xff] }
 0x51e   :  { %5205 = vmatprep.subr.bf16.mxu0 %v6276_v23  ;;  %5246 = vmatprep.subr.bf16.mxu1 %v6404_v55  ;;  %v2341_v25 = vld [vmem:[#allocation7 + $0xae0] sm:$0xff]  ;;  %v2038_v21 = vld [vmem:[#allocation7 + $0x168] sm:$0xff] }
 0x51f   :  { %v2465_v39 = vld [vmem:[#allocation7 + $0xec0] sm:$0xff]  ;;  %v6244_v50 = vcombine.high %v2337_v24, %v2341_v25  ;;  %v6243_v63 = vcombine.low %v2337_v24, %v2341_v25  ;;  %v2026_v24 = vld [vmem:[#allocation7 + $0x108] sm:$0xff] }
 0x520   :  { %v2469_v26 = vld [vmem:[#allocation7 + $0xee0] sm:$0xff]  ;;  %v2030_v25 = vld [vmem:[#allocation7 + $0x128] sm:$0xff] }
 0x521   :  { %5206 = vmatpush2.bf16.msra.mxu0 %v6275_v49  ;;  %5247 = vmatpush2.bf16.msra.mxu1 %v6403_v18  ;;  %v6372_v41 = vcombine.high %v2465_v39, %v2469_v26  ;;  %v2329_v7 = vld [vmem:[#allocation7 + $0xa80] sm:$0xff]  ;;  %v6371_v40 = vcombine.low %v2465_v39, %v2469_v26  ;;  %v2154_v39 = vld [vmem:[#allocation7 + $0x508] sm:$0xff] }
 0x522   :  { %5207 = vmatprep.subr.bf16.mxu0 %v6268_v37  ;;  %5248 = vmatprep.subr.bf16.mxu1 %v6396_v3  ;;  %v2333_v53 = vld [vmem:[#allocation7 + $0xaa0] sm:$0xff]  ;;  %v5958_v37 = vcombine.high %v2050_v56, %v2054_v46  ;;  %v6086_v3 = vcombine.high %v2178_v6, %v2182_v38  ;;  %v2158_v26 = vld [vmem:[#allocation7 + $0x528] sm:$0xff] }
 0x523   :  { %v2457_v28 = vld [vmem:[#allocation7 + $0xe80] sm:$0xff]  ;;  %v6236_v17 = vcombine.high %v2329_v7, %v2333_v53  ;;  %v6235_v33 = vcombine.low %v2329_v7, %v2333_v53  ;;  %v2018_v7 = vld [vmem:[#allocation7 + $0xc8] sm:$0xff] }
 0x524   :  { %v2461_v48 = vld [vmem:[#allocation7 + $0xea0] sm:$0xff]  ;;  %v2022_v53 = vld [vmem:[#allocation7 + $0xe8] sm:$0xff] }
 0x525   :  { %5208 = vmatpush2.bf16.msra.mxu0 %v6267_v10  ;;  %5249 = vmatpush2.bf16.msra.mxu1 %v6395_v62  ;;  %v6364_v51 = vcombine.high %v2457_v28, %v2461_v48  ;;  %v2321_v30 = vld [vmem:[#allocation7 + $0xa40] sm:$0xff]  ;;  %v6363_v52 = vcombine.low %v2457_v28, %v2461_v48  ;;  %v5957_v10 = vcombine.low %v2050_v56, %v2054_v46  ;;  %v2146_v28 = vld [vmem:[#allocation7 + $0x4c8] sm:$0xff] }
 0x526   :  { %5209 = vmatprep.subr.bf16.mxu0 %v6260_v20  ;;  %5250 = vmatprep.subr.bf16.mxu1 %v6388_v4  ;;  %v2325_v59 = vld [vmem:[#allocation7 + $0xa60] sm:$0xff]  ;;  %v7690_v62 = vpack.c.bf16 %v7684_v16, %v7684_v16  ;;  %v7694_v20 = vpack.c.bf16 %v7686_v9, %v7686_v9  ;;  %v6085_v4 = vcombine.low %v2178_v6, %v2182_v38  ;;  %v2150_v48 = vld [vmem:[#allocation7 + $0x4e8] sm:$0xff] }
 0x527   :  { %v2449_v44 = vld [vmem:[#allocation7 + $0xe40] sm:$0xff]  ;;  %v6228_v58 = vcombine.high %v2321_v30, %v2325_v59  ;;  %v6227_v45 = vcombine.low %v2321_v30, %v2325_v59  ;;  %v5949_v16 = vcombine.low %v2042_v60, %v2046_v34  ;;  %v6077_v9 = vcombine.low %v2170_v5, %v2174_v31  ;;  %v2010_v30 = vld [vmem:[#allocation7 + $0x88] sm:$0xff] }
 0x528   :  { %v2453_v11 = vld [vmem:[#allocation7 + $0xe60] sm:$0xff]  ;;  %v2014_v59 = vld [vmem:[#allocation7 + $0xa8] sm:$0xff] }
 0x529   :  { %5210 = vmatpush2.bf16.msra.mxu0 %v6259_v14  ;;  %5251 = vmatpush2.bf16.msra.mxu1 %v6387_v54  ;;  %v6356_v19 = vcombine.high %v2449_v44, %v2453_v11  ;;  %v2313_v15 = vld [vmem:[#allocation7 + $0xa00] sm:$0xff]  ;;  %v6355_v0 = vcombine.low %v2449_v44, %v2453_v11  ;;  %v2162_v14 = vld [vmem:[#allocation7 + $0x548] sm:$0xff] }
 0x52a   :  { %5211 = vmatprep.subr.bf16.mxu0 %v6252_v2  ;;  %5252 = vmatprep.subr.bf16.mxu1 %v6380_v27  ;;  %v2317_v42 = vld [vmem:[#allocation7 + $0xa20] sm:$0xff]  ;;  %v2166_v54 = vld [vmem:[#allocation7 + $0x568] sm:$0xff]  ;;  %v5942_v2 = vcombine.high %v2034_v1, %v2038_v21 }
 0x52b   :  { %v2441_v22 = vld [vmem:[#allocation7 + $0xe00] sm:$0xff]  ;;  %v6220_v23 = vcombine.high %v2313_v15, %v2317_v42  ;;  %v6219_v49 = vcombine.low %v2313_v15, %v2317_v42  ;;  %v6070_v27 = vcombine.high %v2162_v14, %v2166_v54  ;;  %v2138_v44 = vld [vmem:[#allocation7 + $0x488] sm:$0xff] }
 0x52c   :  { %v2445_v61 = vld [vmem:[#allocation7 + $0xe20] sm:$0xff]  ;;  %v2142_v11 = vld [vmem:[#allocation7 + $0x4a8] sm:$0xff] }
 0x52d   :  { %5212 = vmatpush2.bf16.msra.mxu0 %v6251_v29  ;;  %5253 = vmatpush2.bf16.msra.mxu1 %v6379_v47  ;;  %v6348_v55 = vcombine.high %v2441_v22, %v2445_v61  ;;  %v6347_v18 = vcombine.low %v2441_v22, %v2445_v61  ;;  %v5941_v29 = vcombine.low %v2034_v1, %v2038_v21  ;;  %v2002_v15 = vld [vmem:[#allocation7 + $0x48] sm:$0xff] }
 0x52e   :  { %5213 = vmatprep.subr.bf16.mxu0 %v6244_v50  ;;  %5254 = vmatprep.subr.bf16.mxu1 %v6372_v41  ;;  %v6069_v47 = vcombine.low %v2162_v14, %v2166_v54  ;;  %v5934_v50 = vcombine.high %v2026_v24, %v2030_v25  ;;  %v6062_v41 = vcombine.high %v2154_v39, %v2158_v26  ;;  %v2006_v42 = vld [vmem:[#allocation7 + $0x68] sm:$0xff] }
 0x52f   :  { %v2130_v22 = vld [vmem:[#allocation7 + $0x448] sm:$0xff] }
 0x530   :  { %v2134_v61 = vld [vmem:[#allocation7 + $0x468] sm:$0xff] }
 0x531   :  { %5214 = vmatpush2.bf16.msra.mxu0 %v6243_v63  ;;  %5255 = vmatpush2.bf16.msra.mxu1 %v6371_v40  ;;  %v5933_v63 = vcombine.low %v2026_v24, %v2030_v25  ;;  %v6061_v40 = vcombine.low %v2154_v39, %v2158_v26  ;;  %v1994_v56 = vld [vmem:[#allocation7 + $0x8] sm:$0xff] }
 0x532   :  { %5215 = vmatprep.subr.bf16.mxu0 %v6236_v17  ;;  %5256 = vmatprep.subr.bf16.mxu1 %v6364_v51  ;;  %v5926_v17 = vcombine.high %v2018_v7, %v2022_v53  ;;  %v6054_v51 = vcombine.high %v2146_v28, %v2150_v48  ;;  %v1998_v46 = vld [vmem:[#allocation7 + $0x28] sm:$0xff] }
 0x533   :  { %v2122_v6 = vld [vmem:[#allocation7 + $0x408] sm:$0xff] }
 0x534   :  { %v2126_v38 = vld [vmem:[#allocation7 + $0x428] sm:$0xff] }
 0x535   :  { %5216 = vmatpush2.bf16.msra.mxu0 %v6235_v33  ;;  %5257 = vmatpush2.bf16.msra.mxu1 %v6363_v52  ;;  %v5925_v33 = vcombine.low %v2018_v7, %v2022_v53  ;;  %v6053_v52 = vcombine.low %v2146_v28, %v2150_v48  ;;  %v2114_v60 = vld [vmem:[#allocation7 + $0x3c8] sm:$0xff] }
 0x536   :  { %5217 = vmatprep.subr.bf16.mxu0 %v6228_v58  ;;  %5258 = vmatprep.subr.bf16.mxu1 %v6356_v19  ;;  %v5918_v58 = vcombine.high %v2010_v30, %v2014_v59  ;;  %v6046_v19 = vcombine.high %v2138_v44, %v2142_v11  ;;  %v2118_v34 = vld [vmem:[#allocation7 + $0x3e8] sm:$0xff] }
 0x537   :  { %v2242_v5 = vld [vmem:[#allocation7 + $0x7c8] sm:$0xff] }
 0x538   :  { %v2246_v31 = vld [vmem:[#allocation7 + $0x7e8] sm:$0xff] }
 0x539   :  { %5218 = vmatpush2.bf16.msra.mxu0 %v6227_v45  ;;  %5259 = vmatpush2.bf16.msra.mxu1 %v6355_v0  ;;  %v5917_v45 = vcombine.low %v2010_v30, %v2014_v59  ;;  %v6045_v0 = vcombine.low %v2138_v44, %v2142_v11  ;;  %v2106_v1 = vld [vmem:[#allocation7 + $0x388] sm:$0xff] }
 0x53a   :  { %5219 = vmatprep.subr.bf16.mxu0 %v6220_v23  ;;  %5260 = vmatprep.subr.bf16.mxu1 %v6348_v55  ;;  %v5910_v23 = vcombine.high %v2002_v15, %v2006_v42  ;;  %v6038_v55 = vcombine.high %v2130_v22, %v2134_v61  ;;  %v2110_v21 = vld [vmem:[#allocation7 + $0x3a8] sm:$0xff] }
 0x53b   :  { %v2234_v14 = vld [vmem:[#allocation7 + $0x788] sm:$0xff] }
 0x53c   :  { %v2238_v54 = vld [vmem:[#allocation7 + $0x7a8] sm:$0xff] }
 0x53d   :  { %5220 = vmatpush2.bf16.msra.mxu0 %v6219_v49  ;;  %5261 = vmatpush2.bf16.msra.mxu1 %v6347_v18  ;;  %v5909_v49 = vcombine.low %v2002_v15, %v2006_v42  ;;  %v6037_v18 = vcombine.low %v2130_v22, %v2134_v61  ;;  %v2098_v24 = vld [vmem:[#allocation7 + $0x348] sm:$0xff] }
 0x53e   :  { %5271 = vmatprep.subr.bf16.mxu0 %v5958_v37  ;;  %5312 = vmatprep.subr.bf16.mxu1 %v6086_v3  ;;  %v5902_v37 = vcombine.high %v1994_v56, %v1998_v46  ;;  %v6030_v3 = vcombine.high %v2122_v6, %v2126_v38  ;;  %v2102_v25 = vld [vmem:[#allocation7 + $0x368] sm:$0xff] }
 0x53f   :  { %v2226_v39 = vld [vmem:[#allocation7 + $0x748] sm:$0xff] }
 0x540   :  { %5222 = vmatmul.mubr.bf16.vlgmr.msra.gmra.mxu0 %v7690_v62  ;;  %5263 = vmatmul.mubr.bf16.vlgmr.msra.gmra.mxu1 %v7694_v20  ;;  %v2230_v26 = vld [vmem:[#allocation7 + $0x768] sm:$0xff] }
 0x541   :  { %5272 = vmatpush1.bf16.msra.mxu0 %v5957_v10  ;;  %5303 = vmatprep.mubr.bf16.mxu0 %v7578_v32  ;;  %v5901_v10 = vcombine.low %v1994_v56, %v1998_v46  ;;  %v2090_v7 = vld [vmem:[#allocation7 + $0x308] sm:$0xff] }
 0x542   :  { %5313 = vmatpush1.bf16.msra.mxu1 %v6085_v4  ;;  %5344 = vmatprep.mubr.bf16.mxu1 %v7580_v13  ;;  %v6029_v4 = vcombine.low %v2122_v6, %v2126_v38  ;;  %v2094_v53 = vld [vmem:[#allocation7 + $0x328] sm:$0xff] }
 0x543   :  { %5273 = vmatprep.subr.bf16.mxu0 %v5950_v43  ;;  %5314 = vmatprep.subr.bf16.mxu1 %v6078_v35  ;;  %v6022_v43 = vcombine.high %v2114_v60, %v2118_v34  ;;  %v6150_v35 = vcombine.high %v2242_v5, %v2246_v31  ;;  %v2218_v28 = vld [vmem:[#allocation7 + $0x708] sm:$0xff] }
 0x544   :  { %v2222_v48 = vld [vmem:[#allocation7 + $0x728] sm:$0xff] }
 0x545   :  { %5274 = vmatpush1.bf16.msra.mxu0 %v5949_v16  ;;  %v6021_v16 = vcombine.low %v2114_v60, %v2118_v34  ;;  %v2082_v30 = vld [vmem:[#allocation7 + $0x2c8] sm:$0xff] }
 0x546   :  { %5315 = vmatpush1.bf16.msra.mxu1 %v6077_v9  ;;  %5275 = vmatprep.subr.bf16.mxu0 %v5942_v2  ;;  %v6149_v9 = vcombine.low %v2242_v5, %v2246_v31  ;;  %v6014_v2 = vcombine.high %v2106_v1, %v2110_v21  ;;  %v2086_v59 = vld [vmem:[#allocation7 + $0x2e8] sm:$0xff] }
 0x547   :  { %5316 = vmatprep.subr.bf16.mxu1 %v6070_v27  ;;  %v6142_v27 = vcombine.high %v2234_v14, %v2238_v54  ;;  %v2210_v44 = vld [vmem:[#allocation7 + $0x6c8] sm:$0xff] }
 0x548   :  { %v2214_v11 = vld [vmem:[#allocation7 + $0x6e8] sm:$0xff] }
 0x549   :  { %5276 = vmatpush1.bf16.msra.mxu0 %v5941_v29  ;;  %v6013_v29 = vcombine.low %v2106_v1, %v2110_v21  ;;  %v2074_v15 = vld [vmem:[#allocation7 + $0x288] sm:$0xff] }
 0x54a   :  { %5317 = vmatpush1.bf16.msra.mxu1 %v6069_v47  ;;  %5277 = vmatprep.subr.bf16.mxu0 %v5934_v50  ;;  %v6141_v47 = vcombine.low %v2234_v14, %v2238_v54  ;;  %v6006_v50 = vcombine.high %v2098_v24, %v2102_v25  ;;  %v2078_v42 = vld [vmem:[#allocation7 + $0x2a8] sm:$0xff] }
 0x54b   :  { %5318 = vmatprep.subr.bf16.mxu1 %v6062_v41  ;;  %v6134_v41 = vcombine.high %v2226_v39, %v2230_v26  ;;  %v2202_v22 = vld [vmem:[#allocation7 + $0x688] sm:$0xff] }
 0x54c   :  { %v2206_v61 = vld [vmem:[#allocation7 + $0x6a8] sm:$0xff] }
 0x54d   :  { %5278 = vmatpush1.bf16.msra.mxu0 %v5933_v63  ;;  %v6005_v63 = vcombine.low %v2098_v24, %v2102_v25  ;;  %v2066_v56 = vld [vmem:[#allocation7 + $0x248] sm:$0xff] }
 0x54e   :  { %5319 = vmatpush1.bf16.msra.mxu1 %v6061_v40  ;;  %5279 = vmatprep.subr.bf16.mxu0 %v5926_v17  ;;  %v6133_v40 = vcombine.low %v2226_v39, %v2230_v26  ;;  %v5998_v17 = vcombine.high %v2090_v7, %v2094_v53  ;;  %v2070_v46 = vld [vmem:[#allocation7 + $0x268] sm:$0xff] }
 0x54f   :  { %5320 = vmatprep.subr.bf16.mxu1 %v6054_v51  ;;  %v6126_v51 = vcombine.high %v2218_v28, %v2222_v48  ;;  %v2194_v6 = vld [vmem:[#allocation7 + $0x648] sm:$0xff] }
 0x550   :  { %v2198_v38 = vld [vmem:[#allocation7 + $0x668] sm:$0xff] }
 0x551   :  { %5280 = vmatpush1.bf16.msra.mxu0 %v5925_v33  ;;  %v5997_v33 = vcombine.low %v2090_v7, %v2094_v53  ;;  %v2058_v60 = vld [vmem:[#allocation7 + $0x208] sm:$0xff] }
 0x552   :  { %5321 = vmatpush1.bf16.msra.mxu1 %v6053_v52  ;;  %5281 = vmatprep.subr.bf16.mxu0 %v5918_v58  ;;  %v6125_v52 = vcombine.low %v2218_v28, %v2222_v48  ;;  %v5990_v58 = vcombine.high %v2082_v30, %v2086_v59  ;;  %v2062_v34 = vld [vmem:[#allocation7 + $0x228] sm:$0xff] }
 0x553   :  { %5322 = vmatprep.subr.bf16.mxu1 %v6046_v19  ;;  %v6118_v19 = vcombine.high %v2210_v44, %v2214_v11  ;;  %v2186_v5 = vld [vmem:[#allocation7 + $0x608] sm:$0xff] }
 0x554   :  { %v2190_v31 = vld [vmem:[#allocation7 + $0x628] sm:$0xff] }
 0x555   :  { %5282 = vmatpush1.bf16.msra.mxu0 %v5917_v45  ;;  %v5989_v45 = vcombine.low %v2082_v30, %v2086_v59  ;;  %v2306_v1 = vld [vmem:[#allocation7 + $0x9c8] sm:$0xff] }
 0x556   :  { %5323 = vmatpush1.bf16.msra.mxu1 %v6045_v0  ;;  %5283 = vmatprep.subr.bf16.mxu0 %v5910_v23  ;;  %v6117_v0 = vcombine.low %v2210_v44, %v2214_v11  ;;  %v5982_v23 = vcombine.high %v2074_v15, %v2078_v42  ;;  %v2310_v21 = vld [vmem:[#allocation7 + $0x9e8] sm:$0xff] }
 0x557   :  { %5324 = vmatprep.subr.bf16.mxu1 %v6038_v55  ;;  %v6110_v55 = vcombine.high %v2202_v22, %v2206_v61  ;;  %v2434_v14 = vld [vmem:[#allocation7 + $0xdc8] sm:$0xff]  ;;  %v6213_v39 = vcombine.low %v2306_v1, %v2310_v21 }
 0x558   :  { %v2438_v54 = vld [vmem:[#allocation7 + $0xde8] sm:$0xff] }
 0x559   :  { %5284 = vmatpush1.bf16.msra.mxu0 %v5909_v49  ;;  %v5981_v49 = vcombine.low %v2074_v15, %v2078_v42  ;;  %v2298_v24 = vld [vmem:[#allocation7 + $0x988] sm:$0xff] }
 0x55a   :  { %5325 = vmatpush1.bf16.msra.mxu1 %v6037_v18  ;;  %5285 = vmatprep.subr.bf16.mxu0 %v5902_v37  ;;  %v6109_v18 = vcombine.low %v2202_v22, %v2206_v61  ;;  %v5974_v37 = vcombine.high %v2066_v56, %v2070_v46  ;;  %v2302_v25 = vld [vmem:[#allocation7 + $0x9a8] sm:$0xff] }
 0x55b   :  { %5326 = vmatprep.subr.bf16.mxu1 %v6030_v3  ;;  %v6102_v3 = vcombine.high %v2194_v6, %v2198_v38  ;;  %v2426_v26 = vld [vmem:[#allocation7 + $0xd88] sm:$0xff] }
 0x55c   :  { %v2294_v7 = vld [vmem:[#allocation7 + $0x968] sm:$0xff] }
 0x55d   :  { %5286 = vmatpush1.bf16.msra.mxu0 %v5901_v10  ;;  %v5973_v10 = vcombine.low %v2066_v56, %v2070_v46  ;;  %v2418_v28 = vld [vmem:[#allocation7 + $0xd48] sm:$0xff] }
 0x55e   :  { %5327 = vmatpush1.bf16.msra.mxu1 %v6029_v4  ;;  %5287 = vmatprep.subr.bf16.mxu0 %v6022_v43  ;;  %v6101_v4 = vcombine.low %v2194_v6, %v2198_v38  ;;  %v5966_v43 = vcombine.high %v2058_v60, %v2062_v34  ;;  %v2422_v48 = vld [vmem:[#allocation7 + $0xd68] sm:$0xff] }
 0x55f   :  { %5328 = vmatprep.subr.bf16.mxu1 %v6150_v35  ;;  %v6094_v35 = vcombine.high %v2186_v5, %v2190_v31  ;;  %v2282_v30 = vld [vmem:[#allocation7 + $0x908] sm:$0xff] }
 0x560   :  { %v2286_v59 = vld [vmem:[#allocation7 + $0x928] sm:$0xff] }
 0x561   :  { %5288 = vmatpush2.bf16.msra.mxu0 %v6021_v16  ;;  %v5965_v16 = vcombine.low %v2058_v60, %v2062_v34  ;;  %v2410_v44 = vld [vmem:[#allocation7 + $0xd08] sm:$0xff] }
 0x562   :  { %5329 = vmatpush2.bf16.msra.mxu1 %v6149_v9  ;;  %5289 = vmatprep.subr.bf16.mxu0 %v6014_v2  ;;  %v6093_v9 = vcombine.low %v2186_v5, %v2190_v31  ;;  %v6214_v2 = vcombine.high %v2306_v1, %v2310_v21  ;;  %v2414_v11 = vld [vmem:[#allocation7 + $0xd28] sm:$0xff] }
 0x563   :  { %5330 = vmatprep.subr.bf16.mxu1 %v6142_v27  ;;  %v6342_v27 = vcombine.high %v2434_v14, %v2438_v54  ;;  %v2274_v15 = vld [vmem:[#allocation7 + $0x8c8] sm:$0xff] }
 0x564   :  { %v2278_v42 = vld [vmem:[#allocation7 + $0x8e8] sm:$0xff] }
 0x565   :  { %5290 = vmatpush2.bf16.msra.mxu0 %v6013_v29  ;;  %v2430_v29 = vld [vmem:[#allocation7 + $0xda8] sm:$0xff] }
 0x566   :  { %5331 = vmatpush2.bf16.msra.mxu1 %v6141_v47  ;;  %5291 = vmatprep.subr.bf16.mxu0 %v6006_v50  ;;  %v6341_v47 = vcombine.low %v2434_v14, %v2438_v54  ;;  %v6206_v50 = vcombine.high %v2298_v24, %v2302_v25  ;;  %v6334_v53 = vcombine.high %v2426_v26, %v2430_v29  ;;  %v2402_v22 = vld [vmem:[#allocation7 + $0xcc8] sm:$0xff] }
 0x567   :  { %5332 = vmatprep.subr.bf16.mxu1 %v6134_v41  ;;  %v2290_v41 = vld [vmem:[#allocation7 + $0x948] sm:$0xff] }
 0x568   :  { %v2406_v61 = vld [vmem:[#allocation7 + $0xce8] sm:$0xff] }
 0x569   :  { %5292 = vmatpush2.bf16.msra.mxu0 %v6005_v63  ;;  %v6205_v63 = vcombine.low %v2298_v24, %v2302_v25  ;;  %v2266_v56 = vld [vmem:[#allocation7 + $0x888] sm:$0xff] }
 0x56a   :  { %5333 = vmatpush2.bf16.msra.mxu1 %v6133_v40  ;;  %5293 = vmatprep.subr.bf16.mxu0 %v5998_v17  ;;  %v6333_v40 = vcombine.low %v2426_v26, %v2430_v29  ;;  %v6198_v17 = vcombine.high %v2290_v41, %v2294_v7  ;;  %v2270_v46 = vld [vmem:[#allocation7 + $0x8a8] sm:$0xff] }
 0x56b   :  { %5334 = vmatprep.subr.bf16.mxu1 %v6126_v51  ;;  %v6326_v51 = vcombine.high %v2418_v28, %v2422_v48  ;;  %v2394_v6 = vld [vmem:[#allocation7 + $0xc88] sm:$0xff] }
 0x56c   :  { %v2398_v38 = vld [vmem:[#allocation7 + $0xca8] sm:$0xff] }
 0x56d   :  { %5294 = vmatpush2.bf16.msra.mxu0 %v5997_v33  ;;  %v6197_v33 = vcombine.low %v2290_v41, %v2294_v7  ;;  %v2258_v60 = vld [vmem:[#allocation7 + $0x848] sm:$0xff] }
 0x56e   :  { %5335 = vmatpush2.bf16.msra.mxu1 %v6125_v52  ;;  %5295 = vmatprep.subr.bf16.mxu0 %v5990_v58  ;;  %v6325_v52 = vcombine.low %v2418_v28, %v2422_v48  ;;  %v6190_v58 = vcombine.high %v2282_v30, %v2286_v59  ;;  %v2262_v34 = vld [vmem:[#allocation7 + $0x868] sm:$0xff] }
 0x56f   :  { %5336 = vmatprep.subr.bf16.mxu1 %v6118_v19  ;;  %v6318_v19 = vcombine.high %v2410_v44, %v2414_v11  ;;  %v2386_v5 = vld [vmem:[#allocation7 + $0xc48] sm:$0xff] }
 0x570   :  { %v2390_v31 = vld [vmem:[#allocation7 + $0xc68] sm:$0xff] }
 0x571   :  { %5296 = vmatpush2.bf16.msra.mxu0 %v5989_v45  ;;  %v6189_v45 = vcombine.low %v2282_v30, %v2286_v59  ;;  %v2250_v1 = vld [vmem:[#allocation7 + $0x808] sm:$0xff] }
 0x572   :  { %5337 = vmatpush2.bf16.msra.mxu1 %v6117_v0  ;;  %5297 = vmatprep.subr.bf16.mxu0 %v5982_v23  ;;  %v6317_v0 = vcombine.low %v2410_v44, %v2414_v11  ;;  %v6182_v23 = vcombine.high %v2274_v15, %v2278_v42  ;;  %v2254_v21 = vld [vmem:[#allocation7 + $0x828] sm:$0xff] }
 0x573   :  { %5338 = vmatprep.subr.bf16.mxu1 %v6110_v55  ;;  %v6310_v55 = vcombine.high %v2402_v22, %v2406_v61  ;;  %v2378_v14 = vld [vmem:[#allocation7 + $0xc08] sm:$0xff]  ;;  %v6157_v29 = vcombine.low %v2250_v1, %v2254_v21 }
 0x574   :  { %v2382_v54 = vld [vmem:[#allocation7 + $0xc28] sm:$0xff] }
 0x575   :  { %5298 = vmatpush2.bf16.msra.mxu0 %v5981_v49  ;;  %v6181_v49 = vcombine.low %v2274_v15, %v2278_v42  ;;  %v2370_v24 = vld [vmem:[#allocation7 + $0xbc8] sm:$0xff] }
 0x576   :  { %5339 = vmatpush2.bf16.msra.mxu1 %v6109_v18  ;;  %5299 = vmatprep.subr.bf16.mxu0 %v5974_v37  ;;  %v6309_v18 = vcombine.low %v2402_v22, %v2406_v61  ;;  %v6174_v37 = vcombine.high %v2266_v56, %v2270_v46  ;;  %v2374_v25 = vld [vmem:[#allocation7 + $0xbe8] sm:$0xff] }
 0x577   :  { %5340 = vmatprep.subr.bf16.mxu1 %v6102_v3  ;;  %v6302_v3 = vcombine.high %v2394_v6, %v2398_v38  ;;  %v2502_v26 = vld [vmem:[#allocation7 + $0xfe8] sm:$0xff] }
 0x578   :  { %v2362_v7 = vld [vmem:[#allocation7 + $0xb88] sm:$0xff] }
 0x579   :  { %5300 = vmatpush2.bf16.msra.mxu0 %v5973_v10  ;;  %v6173_v10 = vcombine.low %v2266_v56, %v2270_v46  ;;  %v2490_v28 = vld [vmem:[#allocation7 + $0xf88] sm:$0xff] }
 0x57a   :  { %5341 = vmatpush2.bf16.msra.mxu1 %v6101_v4  ;;  %5301 = vmatprep.subr.bf16.mxu0 %v5966_v43  ;;  %v6301_v4 = vcombine.low %v2394_v6, %v2398_v38  ;;  %v6166_v43 = vcombine.high %v2258_v60, %v2262_v34  ;;  %v2494_v48 = vld [vmem:[#allocation7 + $0xfa8] sm:$0xff] }
 0x57b   :  { %5342 = vmatprep.subr.bf16.mxu1 %v6094_v35  ;;  %v6294_v35 = vcombine.high %v2386_v5, %v2390_v31  ;;  %v2354_v30 = vld [vmem:[#allocation7 + $0xb48] sm:$0xff] }
 0x57c   :  { %v2358_v59 = vld [vmem:[#allocation7 + $0xb68] sm:$0xff] }
 0x57d   :  { %5302 = vmatpush2.bf16.msra.mxu0 %v5965_v16  ;;  %v6165_v16 = vcombine.low %v2258_v60, %v2262_v34  ;;  %v2482_v44 = vld [vmem:[#allocation7 + $0xf48] sm:$0xff] }
 0x57e   :  { %5343 = vmatpush2.bf16.msra.mxu1 %v6093_v9  ;;  %5353 = vmatprep.subr.bf16.mxu0 %v6214_v2  ;;  %v6293_v9 = vcombine.low %v2386_v5, %v2390_v31  ;;  %v6158_v2 = vcombine.high %v2250_v1, %v2254_v21  ;;  %v2486_v11 = vld [vmem:[#allocation7 + $0xf68] sm:$0xff] }
 0x57f   :  { %5394 = vmatprep.subr.bf16.mxu1 %v6342_v27  ;;  %v6286_v27 = vcombine.high %v2378_v14, %v2382_v54  ;;  %v2346_v15 = vld [vmem:[#allocation7 + $0xb08] sm:$0xff] }
 0x580   :  { %5304 = vmatmul.mubr.bf16.vlgmr.msra.gmra.mxu0 %v7582_v36  ;;  %v2350_v42 = vld [vmem:[#allocation7 + $0xb28] sm:$0xff] }
 0x581   :  { %5345 = vmatmul.mubr.bf16.vlgmr.msra.gmra.mxu1 %v7584_v57  ;;  %5354 = vmatpush1.bf16.msra.mxu0 %v6213_v39  ;;  %v2498_v39 = vld [vmem:[#allocation7 + $0xfc8] sm:$0xff] }
 0x582   :  { %5385 = vmatprep.mubr.bf16.mxu0 %v7618_v12  ;;  %5395 = vmatpush1.bf16.msra.mxu1 %v6341_v47  ;;  %v6285_v47 = vcombine.low %v2378_v14, %v2382_v54  ;;  %v6406_v41 = vcombine.high %v2498_v39, %v2502_v26  ;;  %v2474_v22 = vld [vmem:[#allocation7 + $0xf08] sm:$0xff] }
 0x583   :  { %5426 = vmatprep.mubr.bf16.mxu1 %v7681_v8  ;;  %5355 = vmatprep.subr.bf16.mxu0 %v6206_v50  ;;  %v6278_v50 = vcombine.high %v2370_v24, %v2374_v25  ;;  %v2478_v61 = vld [vmem:[#allocation7 + $0xf28] sm:$0xff] }
 0x584   :  { %5396 = vmatprep.subr.bf16.mxu1 %v6334_v53  ;;  %v2366_v53 = vld [vmem:[#allocation7 + $0xba8] sm:$0xff] }
 0x585   :  { %5356 = vmatpush1.bf16.msra.mxu0 %v6205_v63  ;;  %v6277_v63 = vcombine.low %v2370_v24, %v2374_v25  ;;  %v2338_v56 = vld [vmem:[#allocation7 + $0xac8] sm:$0xff] }
 0x586   :  { %5397 = vmatpush1.bf16.msra.mxu1 %v6333_v40  ;;  %5357 = vmatprep.subr.bf16.mxu0 %v6198_v17  ;;  %v6405_v40 = vcombine.low %v2498_v39, %v2502_v26  ;;  %v6270_v17 = vcombine.high %v2362_v7, %v2366_v53  ;;  %v2342_v46 = vld [vmem:[#allocation7 + $0xae8] sm:$0xff] }
 0x587   :  { %5398 = vmatprep.subr.bf16.mxu1 %v6326_v51  ;;  %v6398_v51 = vcombine.high %v2490_v28, %v2494_v48  ;;  %v2466_v6 = vld [vmem:[#allocation7 + $0xec8] sm:$0xff] }
 0x588   :  { %v2470_v38 = vld [vmem:[#allocation7 + $0xee8] sm:$0xff] }
 0x589   :  { %5358 = vmatpush1.bf16.msra.mxu0 %v6197_v33  ;;  %v6269_v33 = vcombine.low %v2362_v7, %v2366_v53  ;;  %v2330_v60 = vld [vmem:[#allocation7 + $0xa88] sm:$0xff]  ;;  %v2051_v7 = vld [vmem:[#allocation7 + $0x1d0] sm:$0xff] }
 0x58a   :  { %5399 = vmatpush1.bf16.msra.mxu1 %v6325_v52  ;;  %5359 = vmatprep.subr.bf16.mxu0 %v6190_v58  ;;  %v6397_v52 = vcombine.low %v2490_v28, %v2494_v48  ;;  %v6262_v58 = vcombine.high %v2354_v30, %v2358_v59  ;;  %v2334_v34 = vld [vmem:[#allocation7 + $0xaa8] sm:$0xff]  ;;  %v2055_v53 = vld [vmem:[#allocation7 + $0x1f0] sm:$0xff] }
 0x58b   :  { %5400 = vmatprep.subr.bf16.mxu1 %v6318_v19  ;;  %v6390_v19 = vcombine.high %v2482_v44, %v2486_v11  ;;  %v2458_v5 = vld [vmem:[#allocation7 + $0xe88] sm:$0xff]  ;;  %v2179_v28 = vld [vmem:[#allocation7 + $0x5d0] sm:$0xff] }
 0x58c   :  { %v2462_v31 = vld [vmem:[#allocation7 + $0xea8] sm:$0xff]  ;;  %v2183_v48 = vld [vmem:[#allocation7 + $0x5f0] sm:$0xff] }
 0x58d   :  { %5360 = vmatpush1.bf16.msra.mxu0 %v6189_v45  ;;  %v6261_v45 = vcombine.low %v2354_v30, %v2358_v59  ;;  %v2322_v1 = vld [vmem:[#allocation7 + $0xa48] sm:$0xff]  ;;  %v6088_v30 = vcombine.high %v2179_v28, %v2183_v48  ;;  %v2043_v59 = vld [vmem:[#allocation7 + $0x190] sm:$0xff] }
 0x58e   :  { %5401 = vmatpush1.bf16.msra.mxu1 %v6317_v0  ;;  %5361 = vmatprep.subr.bf16.mxu0 %v6182_v23  ;;  %v6389_v0 = vcombine.low %v2482_v44, %v2486_v11  ;;  %v6254_v23 = vcombine.high %v2346_v15, %v2350_v42  ;;  %v2326_v21 = vld [vmem:[#allocation7 + $0xa68] sm:$0xff]  ;;  %v2047_v44 = vld [vmem:[#allocation7 + $0x1b0] sm:$0xff]  ;;  %v5959_v11 = vcombine.low %v2051_v7, %v2055_v53 }
 0x58f   :  { %5402 = vmatprep.subr.bf16.mxu1 %v6310_v55  ;;  %v6382_v55 = vcombine.high %v2474_v22, %v2478_v61  ;;  %v2450_v14 = vld [vmem:[#allocation7 + $0xe48] sm:$0xff] }
 0x590   :  { %v2454_v54 = vld [vmem:[#allocation7 + $0xe68] sm:$0xff] }
 0x591   :  { %5362 = vmatpush1.bf16.msra.mxu0 %v6181_v49  ;;  %v6253_v49 = vcombine.low %v2346_v15, %v2350_v42  ;;  %v2314_v24 = vld [vmem:[#allocation7 + $0xa08] sm:$0xff]  ;;  %v2175_v15 = vld [vmem:[#allocation7 + $0x5b0] sm:$0xff]  ;;  %v6087_v42 = vcombine.low %v2179_v28, %v2183_v48 }
 0x592   :  { %5403 = vmatpush1.bf16.msra.mxu1 %v6309_v18  ;;  %5363 = vmatprep.subr.bf16.mxu0 %v6174_v37  ;;  %v6381_v18 = vcombine.low %v2474_v22, %v2478_v61  ;;  %v6246_v37 = vcombine.high %v2338_v56, %v2342_v46  ;;  %v2318_v25 = vld [vmem:[#allocation7 + $0xa28] sm:$0xff]  ;;  %v2011_v28 = vld [vmem:[#allocation7 + $0x90] sm:$0xff] }
 0x593   :  { %5404 = vmatprep.subr.bf16.mxu1 %v6302_v3  ;;  %v6374_v3 = vcombine.high %v2466_v6, %v2470_v38  ;;  %v2442_v39 = vld [vmem:[#allocation7 + $0xe08] sm:$0xff]  ;;  %v2015_v48 = vld [vmem:[#allocation7 + $0xb0] sm:$0xff] }
 0x594   :  { %v2446_v26 = vld [vmem:[#allocation7 + $0xe28] sm:$0xff] }
 0x595   :  { %5364 = vmatpush1.bf16.msra.mxu0 %v6173_v10  ;;  %v6245_v10 = vcombine.low %v2338_v56, %v2342_v46 }
 0x596   :  { %5405 = vmatpush1.bf16.msra.mxu1 %v6301_v4  ;;  %5365 = vmatprep.subr.bf16.mxu0 %v6166_v43  ;;  %v6373_v4 = vcombine.low %v2466_v6, %v2470_v38  ;;  %v6238_v43 = vcombine.high %v2330_v60, %v2334_v34  ;;  %v2163_v6 = vld [vmem:[#allocation7 + $0x550] sm:$0xff] }
 0x597   :  { %5406 = vmatprep.subr.bf16.mxu1 %v6294_v35  ;;  %v6366_v35 = vcombine.high %v2458_v5, %v2462_v31  ;;  %v2167_v38 = vld [vmem:[#allocation7 + $0x570] sm:$0xff] }
 0x599   :  { %5366 = vmatpush1.bf16.msra.mxu0 %v6165_v16  ;;  %v6237_v16 = vcombine.low %v2330_v60, %v2334_v34 }
 0x59a   :  { %5407 = vmatpush1.bf16.msra.mxu1 %v6293_v9  ;;  %5367 = vmatprep.subr.bf16.mxu0 %v6158_v2  ;;  %v6365_v9 = vcombine.low %v2458_v5, %v2462_v31  ;;  %v6230_v2 = vcombine.high %v2322_v1, %v2326_v21 }
 0x59b   :  { %5408 = vmatprep.subr.bf16.mxu1 %v6286_v27  ;;  %v6358_v27 = vcombine.high %v2450_v14, %v2454_v54 }
 0x59d   :  { %5368 = vmatpush1.bf16.msra.mxu0 %v6157_v29  ;;  %v6229_v29 = vcombine.low %v2322_v1, %v2326_v21  ;;  %v2155_v21 = vld [vmem:[#allocation7 + $0x510] sm:$0xff] }
 0x59e   :  { %5409 = vmatpush1.bf16.msra.mxu1 %v6285_v47  ;;  %5369 = vmatprep.subr.bf16.mxu0 %v6278_v50  ;;  %v6357_v47 = vcombine.low %v2450_v14, %v2454_v54  ;;  %v6222_v50 = vcombine.high %v2314_v24, %v2318_v25  ;;  %v2159_v14 = vld [vmem:[#allocation7 + $0x530] sm:$0xff] }
 0x59f   :  { %5410 = vmatprep.subr.bf16.mxu1 %v6406_v41  ;;  %v6350_v41 = vcombine.high %v2442_v39, %v2446_v26 }
 0x5a1   :  { %5370 = vmatpush2.bf16.msra.mxu0 %v6277_v63  ;;  %v6221_v63 = vcombine.low %v2314_v24, %v2318_v25  ;;  %v6064_v25 = vcombine.high %v2155_v21, %v2159_v14 }
 0x5a2   :  { %5411 = vmatpush2.bf16.msra.mxu1 %v6405_v40  ;;  %5371 = vmatprep.subr.bf16.mxu0 %v6270_v17  ;;  %v6349_v40 = vcombine.low %v2442_v39, %v2446_v26  ;;  %v5960_v17 = vcombine.high %v2051_v7, %v2055_v53  ;;  %v2019_v39 = vld [vmem:[#allocation7 + $0xd0] sm:$0xff] }
 0x5a3   :  { %5412 = vmatprep.subr.bf16.mxu1 %v6398_v51  ;;  %v2505_v51 = vld [vmem:[#allocation8] sm:$0xff]  ;;  %v2023_v26 = vld [vmem:[#allocation7 + $0xf0] sm:$0xff] }
 0x5a4   :  { %v5928_v7 = vcombine.high %v2019_v39, %v2023_v26 }
 0x5a5   :  { %5372 = vmatpush2.bf16.msra.mxu0 %v6269_v33  ;;  %v7858_v33 = vld [vmem:[#allocation15_spill] sm:$0xff] }
 0x5a6   :  { %5413 = vmatpush2.bf16.msra.mxu1 %v6397_v52  ;;  %5373 = vmatprep.subr.bf16.mxu0 %v6262_v58  ;;  %v7859_v52 = vsub.s32 0, %v7858_v33  ;;  %v7860_v22 = vsub.s32 1, %v7858_v33 }
 0x5a7   :  { %5414 = vmatprep.subr.bf16.mxu1 %v6390_v19  ;;  %v2171_v19 = vld [vmem:[#allocation7 + $0x590] sm:$0xff] }
 0x5a8   :  { %v2510_v58 = vrot.slane %v2505_v51, %v7859_v52  ;;  %v2514_v61 = vrot.slane %v2505_v51, %v7860_v22  ;;  %v6080_v46 = vcombine.high %v2171_v19, %v2175_v15  ;;  %v6079_v60 = vcombine.low %v2171_v19, %v2175_v15  ;;  %v2131_v52 = vld [vmem:[#allocation7 + $0x450] sm:$0xff] }
 0x5a9   :  { %5374 = vmatpush2.bf16.msra.mxu0 %v6261_v45  ;;  %v5952_v45 = vcombine.high %v2043_v59, %v2047_v44  ;;  %v5919_v19 = vcombine.low %v2011_v28, %v2015_v48 }
 0x5aa   :  { %5415 = vmatpush2.bf16.msra.mxu1 %v6389_v0  ;;  %5375 = vmatprep.subr.bf16.mxu0 %v6254_v23  ;;  %v2035_v0 = vld [vmem:[#allocation7 + $0x150] sm:$0xff] }
 0x5ab   :  { %5416 = vmatprep.subr.bf16.mxu1 %v6382_v55  ;;  %v2039_v23 = vld [vmem:[#allocation7 + $0x170] sm:$0xff] }
 0x5ac   :  { %v5944_v34 = vcombine.high %v2035_v0, %v2039_v23 }
 0x5ad   :  { %5376 = vmatpush2.bf16.msra.mxu0 %v6253_v49 }
 0x5ae   :  { %5417 = vmatpush2.bf16.msra.mxu1 %v6381_v18  ;;  %5377 = vmatprep.subr.bf16.mxu0 %v6246_v37  ;;  %v5951_v18 = vcombine.low %v2043_v59, %v2047_v44  ;;  %v2003_v44 = vld [vmem:[#allocation7 + $0x50] sm:$0xff] }
 0x5af   :  { %5418 = vmatprep.subr.bf16.mxu1 %v6374_v3 }
 0x5b1   :  { %5378 = vmatpush2.bf16.msra.mxu0 %v6245_v10  ;;  %v6072_v10 = vcombine.high %v2163_v6, %v2167_v38 }
 0x5b2   :  { %5419 = vmatpush2.bf16.msra.mxu1 %v6373_v4  ;;  %5379 = vmatprep.subr.bf16.mxu0 %v6238_v43  ;;  %v2027_v4 = vld [vmem:[#allocation7 + $0x110] sm:$0xff] }
 0x5b3   :  { %5420 = vmatprep.subr.bf16.mxu1 %v6366_v35  ;;  %v2031_v43 = vld [vmem:[#allocation7 + $0x130] sm:$0xff] }
 0x5b4   :  { %v5936_v24 = vcombine.high %v2027_v4, %v2031_v43 }
 0x5b5   :  { %5380 = vmatpush2.bf16.msra.mxu0 %v6237_v16  ;;  %v5943_v16 = vcombine.low %v2035_v0, %v2039_v23  ;;  %v2123_v0 = vld [vmem:[#allocation7 + $0x410] sm:$0xff] }
 0x5b6   :  { %5421 = vmatpush2.bf16.msra.mxu1 %v6365_v9  ;;  %5381 = vmatprep.subr.bf16.mxu0 %v6230_v2  ;;  %v2127_v23 = vld [vmem:[#allocation7 + $0x430] sm:$0xff] }
 0x5b7   :  { %5422 = vmatprep.subr.bf16.mxu1 %v6358_v27  ;;  %v6071_v27 = vcombine.low %v2163_v6, %v2167_v38  ;;  %v6032_v6 = vcombine.high %v2123_v0, %v2127_v23  ;;  %v2115_v38 = vld [vmem:[#allocation7 + $0x3d0] sm:$0xff] }
 0x5b9   :  { %5382 = vmatpush2.bf16.msra.mxu0 %v6229_v29  ;;  %v2147_v29 = vld [vmem:[#allocation7 + $0x4d0] sm:$0xff] }
 0x5ba   :  { %5423 = vmatpush2.bf16.msra.mxu1 %v6357_v47  ;;  %5383 = vmatprep.subr.bf16.mxu0 %v6222_v50  ;;  %v2151_v47 = vld [vmem:[#allocation7 + $0x4f0] sm:$0xff]  ;;  %v5935_v50 = vcombine.low %v2027_v4, %v2031_v43 }
 0x5bb   :  { %5424 = vmatprep.subr.bf16.mxu1 %v6350_v41  ;;  %v6063_v41 = vcombine.low %v2155_v21, %v2159_v14  ;;  %v6056_v53 = vcombine.high %v2147_v29, %v2151_v47  ;;  %v6055_v51 = vcombine.low %v2147_v29, %v2151_v47  ;;  %v2111_v4 = vld [vmem:[#allocation7 + $0x3b0] sm:$0xff] }
 0x5bc   :  { %v5141_v55 = vpop.f32.mrf.mxu0  ;;  %v2235_v43 = vld [vmem:[#allocation7 + $0x790] sm:$0xff] }
 0x5bd   :  { %5384 = vmatpush2.bf16.msra.mxu0 %v6221_v63  ;;  %v5182_v56 = vpop.f32.mrf.mxu1  ;;  %v5142_v49 = vadd.f32 %v5141_v55, %v2510_v58  ;;  %v2139_v63 = vld [vmem:[#allocation7 + $0x490] sm:$0xff] }
 0x5be   :  { %5425 = vmatpush2.bf16.msra.mxu1 %v6349_v40  ;;  %5435 = vmatprep.subr.bf16.mxu0 %v5960_v17  ;;  %v5143_v37 = vpop.f32.mrf.mxu0  ;;  %v2143_v40 = vld [vmem:[#allocation7 + $0x4b0] sm:$0xff]  ;;  %v5927_v17 = vcombine.low %v2019_v39, %v2023_v26 }
 0x5bf   :  { %5476 = vmatprep.subr.bf16.mxu1 %v6088_v30  ;;  %v5184_v3 = vpop.f32.mrf.mxu1  ;;  %v7711_v5 = vadd.f32 %v5182_v56, %v5142_v49  ;;  %v5144_v31 = vadd.f32 %v5143_v37, %v2514_v61  ;;  %v5920_v30 = vcombine.high %v2011_v28, %v2015_v48  ;;  %v6048_v59 = vcombine.high %v2139_v63, %v2143_v40  ;;  %v2135_v58 = vld [vmem:[#allocation7 + $0x470] sm:$0xff] }
 0x5c0   :  { %5386 = vmatmul.mubr.bf16.vlgmr.msra.gmra.mxu0 %v7690_v62  ;;  %v5145_v35 = vpop.f32.mrf.mxu0  ;;  %v6047_v15 = vcombine.low %v2139_v63, %v2143_v40  ;;  %v6040_v22 = vcombine.high %v2131_v52, %v2135_v58  ;;  %v1995_v61 = vld [vmem:[#allocation7 + $0x10] sm:$0xff]  ;;  %v6039_v56 = vcombine.low %v2131_v52, %v2135_v58 }
 0x5c1   :  { %5427 = vmatmul.mubr.bf16.vlgmr.msra.gmra.mxu1 %v7694_v20  ;;  %5436 = vmatpush1.bf16.msra.mxu0 %v5959_v11  ;;  %v5186_v1 = vpop.f32.mrf.mxu1  ;;  %v7714_v54 = vadd.f32 %v5184_v3, %v5144_v31  ;;  %v2007_v11 = vld [vmem:[#allocation7 + $0x70] sm:$0xff] }
 0x5c2   :  { %5467 = vmatprep.mubr.bf16.mxu0 %v7578_v32  ;;  %5477 = vmatpush1.bf16.msra.mxu1 %v6087_v42  ;;  %v5146_v9 = vpop.f32.mrf.mxu0  ;;  %v5912_v42 = vcombine.high %v2003_v44, %v2007_v11  ;;  %v5911_v55 = vcombine.low %v2003_v44, %v2007_v11  ;;  %v2119_v49 = vld [vmem:[#allocation7 + $0x3f0] sm:$0xff] }
 0x5c3   :  { %5508 = vmatprep.mubr.bf16.mxu1 %v7580_v13  ;;  %5437 = vmatprep.subr.bf16.mxu0 %v5952_v45  ;;  %v5187_v2 = vpop.f32.mrf.mxu1  ;;  %v1999_v45 = vld [vmem:[#allocation7 + $0x30] sm:$0xff]  ;;  %v6023_v1 = vcombine.low %v2115_v38, %v2119_v49 }
 0x5c4   :  { %5478 = vmatprep.subr.bf16.mxu1 %v6080_v46  ;;  %v5904_v46 = vcombine.high %v1995_v61, %v1999_v45  ;;  %v2247_v37 = vld [vmem:[#allocation7 + $0x7f0] sm:$0xff]  ;;  %v5903_v3 = vcombine.low %v1995_v61, %v1999_v45 }
 0x5c5   :  { %5438 = vmatpush1.bf16.msra.mxu0 %v5951_v18  ;;  %v2243_v18 = vld [vmem:[#allocation7 + $0x7d0] sm:$0xff] }
 0x5c6   :  { %5479 = vmatpush1.bf16.msra.mxu1 %v6079_v60  ;;  %5439 = vmatprep.subr.bf16.mxu0 %v5944_v34  ;;  %v6031_v60 = vcombine.low %v2123_v0, %v2127_v23  ;;  %v6024_v34 = vcombine.high %v2115_v38, %v2119_v49  ;;  %v6152_v31 = vcombine.high %v2243_v18, %v2247_v37  ;;  %v2239_v35 = vld [vmem:[#allocation7 + $0x7b0] sm:$0xff] }
 0x5c7   :  { %5480 = vmatprep.subr.bf16.mxu1 %v6072_v10  ;;  %v2107_v10 = vld [vmem:[#allocation7 + $0x390] sm:$0xff]  ;;  %v6151_v21 = vcombine.low %v2243_v18, %v2247_v37  ;;  %v6143_v39 = vcombine.low %v2235_v43, %v2239_v35 }
 0x5c8   :  { %v6016_v14 = vcombine.high %v2107_v10, %v2111_v4  ;;  %v2099_v9 = vld [vmem:[#allocation7 + $0x350] sm:$0xff] }
 0x5c9   :  { %5440 = vmatpush1.bf16.msra.mxu0 %v5943_v16  ;;  %v6144_v16 = vcombine.high %v2235_v43, %v2239_v35  ;;  %v2103_v2 = vld [vmem:[#allocation7 + $0x370] sm:$0xff] }
 0x5ca   :  { %5481 = vmatpush1.bf16.msra.mxu1 %v6071_v27  ;;  %5441 = vmatprep.subr.bf16.mxu0 %v5936_v24  ;;  %v2227_v27 = vld [vmem:[#allocation7 + $0x750] sm:$0xff]  ;;  %v6008_v26 = vcombine.high %v2099_v9, %v2103_v2 }
 0x5cb   :  { %5482 = vmatprep.subr.bf16.mxu1 %v6064_v25  ;;  %v2231_v24 = vld [vmem:[#allocation7 + $0x770] sm:$0xff]  ;;  %v6015_v25 = vcombine.low %v2107_v10, %v2111_v4 }
 0x5cc   :  { %v6136_v29 = vcombine.high %v2227_v27, %v2231_v24  ;;  %v2091_v47 = vld [vmem:[#allocation7 + $0x310] sm:$0xff]  ;;  %v6135_v28 = vcombine.low %v2227_v27, %v2231_v24 }
 0x5cd   :  { %5442 = vmatpush1.bf16.msra.mxu0 %v5935_v50  ;;  %v2095_v50 = vld [vmem:[#allocation7 + $0x330] sm:$0xff] }
 0x5ce   :  { %5483 = vmatpush1.bf16.msra.mxu1 %v6063_v41  ;;  %5443 = vmatprep.subr.bf16.mxu0 %v5928_v7  ;;  %v2219_v41 = vld [vmem:[#allocation7 + $0x710] sm:$0xff]  ;;  %v6000_v48 = vcombine.high %v2091_v47, %v2095_v50 }
 0x5cf   :  { %5484 = vmatprep.subr.bf16.mxu1 %v6056_v53  ;;  %v2223_v7 = vld [vmem:[#allocation7 + $0x730] sm:$0xff]  ;;  %v6007_v53 = vcombine.low %v2099_v9, %v2103_v2 }
 0x5d0   :  { %v6128_v63 = vcombine.high %v2219_v41, %v2223_v7  ;;  %v2083_v40 = vld [vmem:[#allocation7 + $0x2d0] sm:$0xff]  ;;  %v6127_v44 = vcombine.low %v2219_v41, %v2223_v7 }
 0x5d1   :  { %5444 = vmatpush1.bf16.msra.mxu0 %v5927_v17  ;;  %v2087_v17 = vld [vmem:[#allocation7 + $0x2f0] sm:$0xff] }
 0x5d2   :  { %5485 = vmatpush1.bf16.msra.mxu1 %v6055_v51  ;;  %5445 = vmatprep.subr.bf16.mxu0 %v5920_v30  ;;  %v2211_v51 = vld [vmem:[#allocation7 + $0x6d0] sm:$0xff]  ;;  %v5992_v11 = vcombine.high %v2083_v40, %v2087_v17 }
 0x5d3   :  { %5486 = vmatprep.subr.bf16.mxu1 %v6048_v59  ;;  %v2215_v30 = vld [vmem:[#allocation7 + $0x6f0] sm:$0xff]  ;;  %v5999_v59 = vcombine.low %v2091_v47, %v2095_v50 }
 0x5d4   :  { %v6120_v52 = vcombine.high %v2211_v51, %v2215_v30  ;;  %v2075_v58 = vld [vmem:[#allocation7 + $0x290] sm:$0xff]  ;;  %v6119_v61 = vcombine.low %v2211_v51, %v2215_v30 }
 0x5d5   :  { %5446 = vmatpush1.bf16.msra.mxu0 %v5919_v19  ;;  %v2079_v19 = vld [vmem:[#allocation7 + $0x2b0] sm:$0xff] }
 0x5d6   :  { %5487 = vmatpush1.bf16.msra.mxu1 %v6047_v15  ;;  %5447 = vmatprep.subr.bf16.mxu0 %v5912_v42  ;;  %v2203_v15 = vld [vmem:[#allocation7 + $0x690] sm:$0xff]  ;;  %v5984_v45 = vcombine.high %v2075_v58, %v2079_v19 }
 0x5d7   :  { %5488 = vmatprep.subr.bf16.mxu1 %v6040_v22  ;;  %v2207_v42 = vld [vmem:[#allocation7 + $0x6b0] sm:$0xff]  ;;  %v5991_v22 = vcombine.low %v2083_v40, %v2087_v17 }
 0x5d8   :  { %v6112_v0 = vcombine.high %v2203_v15, %v2207_v42  ;;  %v2067_v23 = vld [vmem:[#allocation7 + $0x250] sm:$0xff]  ;;  %v6111_v38 = vcombine.low %v2203_v15, %v2207_v42 }
 0x5d9   :  { %5448 = vmatpush1.bf16.msra.mxu0 %v5911_v55  ;;  %v2071_v55 = vld [vmem:[#allocation7 + $0x270] sm:$0xff] }
 0x5da   :  { %5489 = vmatpush1.bf16.msra.mxu1 %v6039_v56  ;;  %5449 = vmatprep.subr.bf16.mxu0 %v5904_v46  ;;  %v2195_v56 = vld [vmem:[#allocation7 + $0x650] sm:$0xff]  ;;  %v5976_v49 = vcombine.high %v2067_v23, %v2071_v55 }
 0x5db   :  { %5490 = vmatprep.subr.bf16.mxu1 %v6032_v6  ;;  %v2199_v46 = vld [vmem:[#allocation7 + $0x670] sm:$0xff]  ;;  %v5983_v6 = vcombine.low %v2075_v58, %v2079_v19 }
 0x5dc   :  { %v6104_v18 = vcombine.high %v2195_v56, %v2199_v46  ;;  %v2059_v37 = vld [vmem:[#allocation7 + $0x210] sm:$0xff]  ;;  %v6103_v10 = vcombine.low %v2195_v56, %v2199_v46 }
 0x5dd   :  { %5450 = vmatpush1.bf16.msra.mxu0 %v5903_v3  ;;  %v2063_v3 = vld [vmem:[#allocation7 + $0x230] sm:$0xff] }
 0x5de   :  { %5491 = vmatpush1.bf16.msra.mxu1 %v6031_v60  ;;  %5451 = vmatprep.subr.bf16.mxu0 %v6024_v34  ;;  %v2187_v60 = vld [vmem:[#allocation7 + $0x610] sm:$0xff]  ;;  %v5968_v4 = vcombine.high %v2059_v37, %v2063_v3 }
 0x5df   :  { %5492 = vmatprep.subr.bf16.mxu1 %v6152_v31  ;;  %v2191_v34 = vld [vmem:[#allocation7 + $0x630] sm:$0xff]  ;;  %v5975_v31 = vcombine.low %v2067_v23, %v2071_v55 }
 0x5e0   :  { %v6096_v43 = vcombine.high %v2187_v60, %v2191_v34  ;;  %v2307_v35 = vld [vmem:[#allocation7 + $0x9d0] sm:$0xff]  ;;  %v6095_v9 = vcombine.low %v2187_v60, %v2191_v34 }
 0x5e1   :  { %5452 = vmatpush2.bf16.msra.mxu0 %v6023_v1  ;;  %v2311_v1 = vld [vmem:[#allocation7 + $0x9f0] sm:$0xff] }
 0x5e2   :  { %5493 = vmatpush2.bf16.msra.mxu1 %v6151_v21  ;;  %5453 = vmatprep.subr.bf16.mxu0 %v6016_v14  ;;  %v2435_v21 = vld [vmem:[#allocation7 + $0xdd0] sm:$0xff]  ;;  %v6216_v2 = vcombine.high %v2307_v35, %v2311_v1 }
 0x5e3   :  { %5494 = vmatprep.subr.bf16.mxu1 %v6144_v16  ;;  %v2439_v14 = vld [vmem:[#allocation7 + $0xdf0] sm:$0xff]  ;;  %v5967_v16 = vcombine.low %v2059_v37, %v2063_v3 }
 0x5e4   :  { %v6344_v27 = vcombine.high %v2435_v21, %v2439_v14  ;;  %v2299_v24 = vld [vmem:[#allocation7 + $0x990] sm:$0xff]  ;;  %v6343_v47 = vcombine.low %v2435_v21, %v2439_v14 }
 0x5e5   :  { %5454 = vmatpush2.bf16.msra.mxu0 %v6015_v25  ;;  %v2303_v25 = vld [vmem:[#allocation7 + $0x9b0] sm:$0xff] }
 0x5e6   :  { %5495 = vmatpush2.bf16.msra.mxu1 %v6143_v39  ;;  %5455 = vmatprep.subr.bf16.mxu0 %v6008_v26  ;;  %v6215_v39 = vcombine.low %v2307_v35, %v2311_v1  ;;  %v2427_v26 = vld [vmem:[#allocation7 + $0xd90] sm:$0xff]  ;;  %v6208_v50 = vcombine.high %v2299_v24, %v2303_v25  ;;  %v6207_v51 = vcombine.low %v2299_v24, %v2303_v25 }
 0x5e7   :  { %5496 = vmatprep.subr.bf16.mxu1 %v6136_v29  ;;  %v2431_v29 = vld [vmem:[#allocation7 + $0xdb0] sm:$0xff] }
 0x5e8   :  { %v2291_v41 = vld [vmem:[#allocation7 + $0x950] sm:$0xff] }
 0x5e9   :  { %5456 = vmatpush2.bf16.msra.mxu0 %v6007_v53  ;;  %v2295_v7 = vld [vmem:[#allocation7 + $0x970] sm:$0xff] }
 0x5ea   :  { %5497 = vmatpush2.bf16.msra.mxu1 %v6135_v28  ;;  %5457 = vmatprep.subr.bf16.mxu0 %v6000_v48  ;;  %v6336_v48 = vcombine.high %v2427_v26, %v2431_v29  ;;  %v2423_v40 = vld [vmem:[#allocation7 + $0xd70] sm:$0xff]  ;;  %v6199_v23 = vcombine.low %v2291_v41, %v2295_v7 }
 0x5eb   :  { %5498 = vmatprep.subr.bf16.mxu1 %v6128_v63  ;;  %v2419_v63 = vld [vmem:[#allocation7 + $0xd50] sm:$0xff] }
 0x5ec   :  { %v6328_v19 = vcombine.high %v2419_v63, %v2423_v40  ;;  %v2287_v15 = vld [vmem:[#allocation7 + $0x930] sm:$0xff]  ;;  %v6327_v46 = vcombine.low %v2419_v63, %v2423_v40 }
 0x5ed   :  { %5458 = vmatpush2.bf16.msra.mxu0 %v5999_v59  ;;  %v2403_v37 = vld [vmem:[#allocation7 + $0xcd0] sm:$0xff] }
 0x5ee   :  { %5499 = vmatpush2.bf16.msra.mxu1 %v6127_v44  ;;  %5459 = vmatprep.subr.bf16.mxu0 %v5992_v11  ;;  %v6335_v44 = vcombine.low %v2427_v26, %v2431_v29  ;;  %v6200_v11 = vcombine.high %v2291_v41, %v2295_v7  ;;  %v2407_v3 = vld [vmem:[#allocation7 + $0xcf0] sm:$0xff] }
 0x5ef   :  { %5500 = vmatprep.subr.bf16.mxu1 %v6120_v52  ;;  %v2395_v35 = vld [vmem:[#allocation7 + $0xc90] sm:$0xff]  ;;  %v6311_v14 = vcombine.low %v2403_v37, %v2407_v3 }
 0x5f0   :  { %v2399_v1 = vld [vmem:[#allocation7 + $0xcb0] sm:$0xff] }
 0x5f1   :  { %5460 = vmatpush2.bf16.msra.mxu0 %v5991_v22  ;;  %v2387_v24 = vld [vmem:[#allocation7 + $0xc50] sm:$0xff]  ;;  %v6303_v26 = vcombine.low %v2395_v35, %v2399_v1 }
 0x5f2   :  { %5501 = vmatpush2.bf16.msra.mxu1 %v6119_v61  ;;  %5461 = vmatprep.subr.bf16.mxu0 %v5984_v45  ;;  %v2411_v61 = vld [vmem:[#allocation7 + $0xd10] sm:$0xff] }
 0x5f3   :  { %5502 = vmatprep.subr.bf16.mxu1 %v6112_v0  ;;  %v2415_v45 = vld [vmem:[#allocation7 + $0xd30] sm:$0xff] }
 0x5f4   :  { %v6319_v34 = vcombine.low %v2411_v61, %v2415_v45  ;;  %v2391_v25 = vld [vmem:[#allocation7 + $0xc70] sm:$0xff] }
 0x5f5   :  { %5462 = vmatpush2.bf16.msra.mxu0 %v5983_v6  ;;  %v2255_v41 = vld [vmem:[#allocation7 + $0x830] sm:$0xff] }
 0x5f6   :  { %5503 = vmatpush2.bf16.msra.mxu1 %v6111_v38  ;;  %5463 = vmatprep.subr.bf16.mxu0 %v5976_v49  ;;  %v6320_v38 = vcombine.high %v2411_v61, %v2415_v45  ;;  %v2275_v49 = vld [vmem:[#allocation7 + $0x8d0] sm:$0xff] }
 0x5f7   :  { %5504 = vmatprep.subr.bf16.mxu1 %v6104_v18  ;;  %v2279_v18 = vld [vmem:[#allocation7 + $0x8f0] sm:$0xff] }
 0x5f8   :  { %v6183_v21 = vcombine.low %v2275_v49, %v2279_v18  ;;  %v2379_v7 = vld [vmem:[#allocation7 + $0xc10] sm:$0xff] }
 0x5f9   :  { %5464 = vmatpush2.bf16.msra.mxu0 %v5975_v31  ;;  %v6184_v31 = vcombine.high %v2275_v49, %v2279_v18 }
 0x5fa   :  { %5505 = vmatpush2.bf16.msra.mxu1 %v6103_v10  ;;  %5465 = vmatprep.subr.bf16.mxu0 %v5968_v4  ;;  %v6312_v10 = vcombine.high %v2403_v37, %v2407_v3  ;;  %v2267_v4 = vld [vmem:[#allocation7 + $0x890] sm:$0xff] }
 0x5fb   :  { %5506 = vmatprep.subr.bf16.mxu1 %v6096_v43  ;;  %v2271_v43 = vld [vmem:[#allocation7 + $0x8b0] sm:$0xff] }
 0x5fd   :  { %5466 = vmatpush2.bf16.msra.mxu0 %v5967_v16  ;;  %v6176_v16 = vcombine.high %v2267_v4, %v2271_v43 }
 0x5fe   :  { %5507 = vmatpush2.bf16.msra.mxu1 %v6095_v9  ;;  %5517 = vmatprep.subr.bf16.mxu0 %v6216_v2  ;;  %v6304_v9 = vcombine.high %v2395_v35, %v2399_v1  ;;  %v2259_v2 = vld [vmem:[#allocation7 + $0x850] sm:$0xff] }
 0x5ff   :  { %5558 = vmatprep.subr.bf16.mxu1 %v6344_v27  ;;  %v2263_v27 = vld [vmem:[#allocation7 + $0x870] sm:$0xff] }
 0x600   :  { %v5223_v53 = vpop.f32.mrf.mxu0  ;;  %v5264_v28 = vpop.f32.mrf.mxu1  ;;  %5468 = vmatmul.mubr.bf16.vlgmr.msra.gmra.mxu0 %v7582_v36  ;;  %v6168_v29 = vcombine.high %v2259_v2, %v2263_v27 }
 0x601   :  { %v5224_v17 = vadd.f32 %v5223_v53, %v7711_v5  ;;  %5509 = vmatmul.mubr.bf16.vlgmr.msra.gmra.mxu1 %v7584_v57  ;;  %5518 = vmatpush1.bf16.msra.mxu0 %v6215_v39  ;;  %v2283_v5 = vld [vmem:[#allocation7 + $0x910] sm:$0xff]  ;;  %v6175_v39 = vcombine.low %v2267_v4, %v2271_v43 }
 0x602   :  { %5549 = vmatprep.mubr.bf16.mxu0 %v7618_v12  ;;  %5559 = vmatpush1.bf16.msra.mxu1 %v6343_v47  ;;  %v5225_v30 = vpop.f32.mrf.mxu0  ;;  %v5266_v59 = vpop.f32.mrf.mxu1  ;;  %v6192_v6 = vcombine.high %v2283_v5, %v2287_v15  ;;  %v6191_v60 = vcombine.low %v2283_v5, %v2287_v15  ;;  %v6296_v47 = vcombine.high %v2387_v24, %v2391_v25  ;;  %v2383_v53 = vld [vmem:[#allocation7 + $0xc30] sm:$0xff] }
 0x603   :  { %v7720_v52 = vadd.f32 %v5264_v28, %v5224_v17  ;;  %5590 = vmatprep.mubr.bf16.mxu1 %v7681_v8  ;;  %v5226_v58 = vadd.f32 %v5225_v30, %v7714_v54  ;;  %5519 = vmatprep.subr.bf16.mxu0 %v6208_v50  ;;  %v2251_v50 = vld [vmem:[#allocation7 + $0x810] sm:$0xff]  ;;  %v6167_v28 = vcombine.low %v2259_v2, %v2263_v27 }
 0x604   :  { %v5227_v42 = vpop.f32.mrf.mxu0  ;;  %v5268_v22 = vpop.f32.mrf.mxu1  ;;  %5560 = vmatprep.subr.bf16.mxu1 %v6336_v48  ;;  %v6295_v48 = vcombine.low %v2387_v24, %v2391_v25  ;;  %v6160_v63 = vcombine.high %v2251_v50, %v2255_v41  ;;  %v6288_v40 = vcombine.high %v2379_v7, %v2383_v53  ;;  %v2371_v17 = vld [vmem:[#allocation7 + $0xbd0] sm:$0xff] }
 0x605   :  { %v7724_v0 = vadd.f32 %v5266_v59, %v5226_v58  ;;  %5520 = vmatpush1.bf16.msra.mxu0 %v6207_v51  ;;  %v2375_v51 = vld [vmem:[#allocation7 + $0xbf0] sm:$0xff] }
 0x606   :  { %5561 = vmatpush1.bf16.msra.mxu1 %v6335_v44  ;;  %v5228_v55 = vpop.f32.mrf.mxu0  ;;  %v5269_v56 = vpop.f32.mrf.mxu1  ;;  %5521 = vmatprep.subr.bf16.mxu0 %v6200_v11  ;;  %v2499_v30 = vld [vmem:[#allocation7 + $0xfd0] sm:$0xff]  ;;  %v6159_v44 = vcombine.low %v2251_v50, %v2255_v41  ;;  %v6287_v11 = vcombine.low %v2379_v7, %v2383_v53  ;;  %v6280_v58 = vcombine.high %v2371_v17, %v2375_v51 }
 0x607   :  { %v5771_v54 = vcombine.low %v7720_v52, %v7724_v0  ;;  %5562 = vmatprep.subr.bf16.mxu1 %v6328_v19  ;;  %v2503_v59 = vld [vmem:[#allocation7 + $0xff0] sm:$0xff]  ;;  %v6279_v61 = vcombine.low %v2371_v17, %v2375_v51 }
 0x608   :  { %v6408_v19 = vcombine.high %v2499_v30, %v2503_v59  ;;  %v2363_v5 = vld [vmem:[#allocation7 + $0xb90] sm:$0xff]  ;;  %v6407_v45 = vcombine.low %v2499_v30, %v2503_v59 }
 0x609   :  { %5522 = vmatpush1.bf16.msra.mxu0 %v6199_v23  ;;  %v2367_v15 = vld [vmem:[#allocation7 + $0xbb0] sm:$0xff] }
 0x60a   :  { %5563 = vmatpush1.bf16.msra.mxu1 %v6327_v46  ;;  %5523 = vmatprep.subr.bf16.mxu0 %v6192_v6  ;;  %v2491_v42 = vld [vmem:[#allocation7 + $0xf90] sm:$0xff]  ;;  %v6272_v23 = vcombine.high %v2363_v5, %v2367_v15  ;;  %v6271_v49 = vcombine.low %v2363_v5, %v2367_v15 }
 0x60b   :  { %5564 = vmatprep.subr.bf16.mxu1 %v6320_v38  ;;  %v2495_v22 = vld [vmem:[#allocation7 + $0xfb0] sm:$0xff] }
 0x60c   :  { %v6400_v55 = vcombine.high %v2491_v42, %v2495_v22  ;;  %v2355_v56 = vld [vmem:[#allocation7 + $0xb50] sm:$0xff]  ;;  %v6399_v18 = vcombine.low %v2491_v42, %v2495_v22 }
 0x60d   :  { %5524 = vmatpush1.bf16.msra.mxu0 %v6191_v60  ;;  %v2359_v46 = vld [vmem:[#allocation7 + $0xb70] sm:$0xff] }
 0x60e   :  { %5565 = vmatpush1.bf16.msra.mxu1 %v6319_v34  ;;  %5525 = vmatprep.subr.bf16.mxu0 %v6184_v31  ;;  %v2483_v6 = vld [vmem:[#allocation7 + $0xf50] sm:$0xff]  ;;  %v6264_v37 = vcombine.high %v2355_v56, %v2359_v46  ;;  %v6263_v4 = vcombine.low %v2355_v56, %v2359_v46 }
 0x60f   :  { %5566 = vmatprep.subr.bf16.mxu1 %v6312_v10  ;;  %v2487_v38 = vld [vmem:[#allocation7 + $0xf70] sm:$0xff] }
 0x610   :  { %v6392_v3 = vcombine.high %v2483_v6, %v2487_v38  ;;  %v2347_v60 = vld [vmem:[#allocation7 + $0xb10] sm:$0xff]  ;;  %v6391_v43 = vcombine.low %v2483_v6, %v2487_v38 }
 0x611   :  { %5526 = vmatpush1.bf16.msra.mxu0 %v6183_v21  ;;  %v2351_v34 = vld [vmem:[#allocation7 + $0xb30] sm:$0xff] }
 0x612   :  { %5567 = vmatpush1.bf16.msra.mxu1 %v6311_v14  ;;  %5527 = vmatprep.subr.bf16.mxu0 %v6176_v16  ;;  %v2475_v31 = vld [vmem:[#allocation7 + $0xf10] sm:$0xff]  ;;  %v6256_v35 = vcombine.high %v2347_v60, %v2351_v34  ;;  %v6255_v2 = vcombine.low %v2347_v60, %v2351_v34  ;;  %v2176_v60 = vld [vmem:[#allocation7 + $0x5b8] sm:$0xff] }
 0x613   :  { %5568 = vmatprep.subr.bf16.mxu1 %v6304_v9  ;;  %v2479_v10 = vld [vmem:[#allocation7 + $0xf30] sm:$0xff] }
 0x614   :  { %v6384_v1 = vcombine.high %v2475_v31, %v2479_v10  ;;  %v2339_v21 = vld [vmem:[#allocation7 + $0xad0] sm:$0xff]  ;;  %v6383_v27 = vcombine.low %v2475_v31, %v2479_v10  ;;  %v2036_v10 = vld [vmem:[#allocation7 + $0x158] sm:$0xff] }
 0x615   :  { %5528 = vmatpush1.bf16.msra.mxu0 %v6175_v39  ;;  %v2343_v14 = vld [vmem:[#allocation7 + $0xaf0] sm:$0xff] }
 0x616   :  { %5569 = vmatpush1.bf16.msra.mxu1 %v6303_v26  ;;  %5529 = vmatprep.subr.bf16.mxu0 %v6168_v29  ;;  %v2467_v16 = vld [vmem:[#allocation7 + $0xed0] sm:$0xff]  ;;  %v6248_v24 = vcombine.high %v2339_v21, %v2343_v14  ;;  %v6247_v50 = vcombine.low %v2339_v21, %v2343_v14  ;;  %v2168_v21 = vld [vmem:[#allocation7 + $0x578] sm:$0xff] }
 0x617   :  { %5570 = vmatprep.subr.bf16.mxu1 %v6296_v47  ;;  %v2471_v9 = vld [vmem:[#allocation7 + $0xef0] sm:$0xff] }
 0x618   :  { %v6376_v25 = vcombine.high %v2467_v16, %v2471_v9  ;;  %v2331_v39 = vld [vmem:[#allocation7 + $0xa90] sm:$0xff]  ;;  %v6375_v41 = vcombine.low %v2467_v16, %v2471_v9 }
 0x619   :  { %5530 = vmatpush1.bf16.msra.mxu0 %v6167_v28  ;;  %v2335_v26 = vld [vmem:[#allocation7 + $0xab0] sm:$0xff] }
 0x61a   :  { %5571 = vmatpush1.bf16.msra.mxu1 %v6295_v48  ;;  %5531 = vmatprep.subr.bf16.mxu0 %v6160_v63  ;;  %v2459_v29 = vld [vmem:[#allocation7 + $0xe90] sm:$0xff]  ;;  %v6240_v7 = vcombine.high %v2331_v39, %v2335_v26  ;;  %v6239_v17 = vcombine.low %v2331_v39, %v2335_v26  ;;  %v2028_v39 = vld [vmem:[#allocation7 + $0x118] sm:$0xff] }
 0x61b   :  { %5572 = vmatprep.subr.bf16.mxu1 %v6288_v40  ;;  %v2463_v47 = vld [vmem:[#allocation7 + $0xeb0] sm:$0xff]  ;;  %v2032_v26 = vld [vmem:[#allocation7 + $0x138] sm:$0xff] }
 0x61c   :  { %v6368_v53 = vcombine.high %v2459_v29, %v2463_v47  ;;  %v2323_v28 = vld [vmem:[#allocation7 + $0xa50] sm:$0xff]  ;;  %v6367_v51 = vcombine.low %v2459_v29, %v2463_v47  ;;  %v2156_v47 = vld [vmem:[#allocation7 + $0x518] sm:$0xff] }
 0x61d   :  { %5532 = vmatpush1.bf16.msra.mxu0 %v6159_v44  ;;  %v2327_v48 = vld [vmem:[#allocation7 + $0xa70] sm:$0xff] }
 0x61e   :  { %5573 = vmatpush1.bf16.msra.mxu1 %v6287_v11  ;;  %5533 = vmatprep.subr.bf16.mxu0 %v6280_v58  ;;  %v2451_v63 = vld [vmem:[#allocation7 + $0xe50] sm:$0xff]  ;;  %v6232_v30 = vcombine.high %v2323_v28, %v2327_v48  ;;  %v6231_v5 = vcombine.low %v2323_v28, %v2327_v48  ;;  %v5938_v28 = vcombine.high %v2028_v39, %v2032_v26 }
 0x61f   :  { %5574 = vmatprep.subr.bf16.mxu1 %v6408_v19  ;;  %v2455_v40 = vld [vmem:[#allocation7 + $0xe70] sm:$0xff] }
 0x620   :  { %v6360_v59 = vcombine.high %v2451_v63, %v2455_v40  ;;  %v2315_v44 = vld [vmem:[#allocation7 + $0xa10] sm:$0xff]  ;;  %v6359_v15 = vcombine.low %v2451_v63, %v2455_v40  ;;  %v2020_v63 = vld [vmem:[#allocation7 + $0xd8] sm:$0xff] }
 0x621   :  { %5534 = vmatpush2.bf16.msra.mxu0 %v6279_v61  ;;  %v2319_v11 = vld [vmem:[#allocation7 + $0xa30] sm:$0xff]  ;;  %v2052_v61 = vld [vmem:[#allocation7 + $0x1d8] sm:$0xff] }
 0x622   :  { %5575 = vmatpush2.bf16.msra.mxu1 %v6407_v45  ;;  %5535 = vmatprep.subr.bf16.mxu0 %v6272_v23  ;;  %v2443_v58 = vld [vmem:[#allocation7 + $0xe10] sm:$0xff]  ;;  %v6224_v42 = vcombine.high %v2315_v44, %v2319_v11  ;;  %v2056_v45 = vld [vmem:[#allocation7 + $0x1f8] sm:$0xff]  ;;  %v6223_v56 = vcombine.low %v2315_v44, %v2319_v11 }
 0x623   :  { %5576 = vmatprep.subr.bf16.mxu1 %v6400_v55  ;;  %v2447_v19 = vld [vmem:[#allocation7 + $0xe30] sm:$0xff]  ;;  %v2180_v23 = vld [vmem:[#allocation7 + $0x5d8] sm:$0xff]  ;;  %v5962_v6 = vcombine.high %v2052_v61, %v2056_v45 }
 0x624   :  { %v6352_v22 = vcombine.high %v2443_v58, %v2447_v19  ;;  %v2184_v55 = vld [vmem:[#allocation7 + $0x5f8] sm:$0xff]  ;;  %v6351_v46 = vcombine.low %v2443_v58, %v2447_v19 }
 0x625   :  { %5536 = vmatpush2.bf16.msra.mxu0 %v6271_v49  ;;  %v6090_v38 = vcombine.high %v2180_v23, %v2184_v55  ;;  %v2044_v49 = vld [vmem:[#allocation7 + $0x198] sm:$0xff]  ;;  %v6089_v34 = vcombine.low %v2180_v23, %v2184_v55 }
 0x626   :  { %5577 = vmatpush2.bf16.msra.mxu1 %v6399_v18  ;;  %5537 = vmatprep.subr.bf16.mxu0 %v6264_v37  ;;  %v2048_v18 = vld [vmem:[#allocation7 + $0x1b8] sm:$0xff]  ;;  %v5961_v37 = vcombine.low %v2052_v61, %v2056_v45 }
 0x627   :  { %5578 = vmatprep.subr.bf16.mxu1 %v6392_v3  ;;  %v2172_v3 = vld [vmem:[#allocation7 + $0x598] sm:$0xff]  ;;  %v5954_v31 = vcombine.high %v2044_v49, %v2048_v18  ;;  %v5953_v16 = vcombine.low %v2044_v49, %v2048_v18 }
 0x628   :  { %v2024_v40 = vld [vmem:[#allocation7 + $0xf8] sm:$0xff] }
 0x629   :  { %5538 = vmatpush2.bf16.msra.mxu0 %v6263_v4  ;;  %v2040_v4 = vld [vmem:[#allocation7 + $0x178] sm:$0xff]  ;;  %v5930_v44 = vcombine.high %v2020_v63, %v2024_v40 }
 0x62a   :  { %5579 = vmatpush2.bf16.msra.mxu1 %v6391_v43  ;;  %5539 = vmatprep.subr.bf16.mxu0 %v6256_v35  ;;  %v6082_v35 = vcombine.high %v2172_v3, %v2176_v60  ;;  %v2012_v58 = vld [vmem:[#allocation7 + $0x98] sm:$0xff] }
 0x62b   :  { %5580 = vmatprep.subr.bf16.mxu1 %v6384_v1  ;;  %v2164_v1 = vld [vmem:[#allocation7 + $0x558] sm:$0xff] }
 0x62c   :  { %v2016_v19 = vld [vmem:[#allocation7 + $0xb8] sm:$0xff] }
 0x62d   :  { %5540 = vmatpush2.bf16.msra.mxu0 %v6255_v2  ;;  %v6081_v2 = vcombine.low %v2172_v3, %v2176_v60  ;;  %v5922_v61 = vcombine.high %v2012_v58, %v2016_v19  ;;  %v2004_v23 = vld [vmem:[#allocation7 + $0x58] sm:$0xff] }
 0x62e   :  { %5581 = vmatpush2.bf16.msra.mxu1 %v6383_v27  ;;  %5541 = vmatprep.subr.bf16.mxu0 %v6248_v24  ;;  %v5946_v27 = vcombine.high %v2036_v10, %v2040_v4  ;;  %v2008_v55 = vld [vmem:[#allocation7 + $0x78] sm:$0xff] }
 0x62f   :  { %5582 = vmatprep.subr.bf16.mxu1 %v6376_v25  ;;  %v6074_v25 = vcombine.high %v2164_v1, %v2168_v21  ;;  %v5914_v49 = vcombine.high %v2004_v23, %v2008_v55  ;;  %v2000_v3 = vld [vmem:[#allocation7 + $0x38] sm:$0xff] }
 0x630   :  { %v2124_v60 = vld [vmem:[#allocation7 + $0x418] sm:$0xff] }
 0x631   :  { %5542 = vmatpush2.bf16.msra.mxu0 %v6247_v50  ;;  %v2160_v50 = vld [vmem:[#allocation7 + $0x538] sm:$0xff] }
 0x632   :  { %5583 = vmatpush2.bf16.msra.mxu1 %v6375_v41  ;;  %5543 = vmatprep.subr.bf16.mxu0 %v6240_v7 }
 0x633   :  { %5584 = vmatprep.subr.bf16.mxu1 %v6368_v53  ;;  %v6073_v53 = vcombine.low %v2164_v1, %v2168_v21  ;;  %v2116_v1 = vld [vmem:[#allocation7 + $0x3d8] sm:$0xff] }
 0x634   :  { %v2120_v21 = vld [vmem:[#allocation7 + $0x3f8] sm:$0xff] }
 0x635   :  { %5544 = vmatpush2.bf16.msra.mxu0 %v6239_v17  ;;  %v2148_v17 = vld [vmem:[#allocation7 + $0x4d8] sm:$0xff] }
 0x636   :  { %5585 = vmatpush2.bf16.msra.mxu1 %v6367_v51  ;;  %5545 = vmatprep.subr.bf16.mxu0 %v6232_v30  ;;  %v2152_v51 = vld [vmem:[#allocation7 + $0x4f8] sm:$0xff]  ;;  %v5937_v30 = vcombine.low %v2028_v39, %v2032_v26  ;;  %v6026_v39 = vcombine.high %v2116_v1, %v2120_v21 }
 0x637   :  { %5586 = vmatprep.subr.bf16.mxu1 %v6360_v59  ;;  %v6065_v59 = vcombine.low %v2156_v47, %v2160_v50  ;;  %v6058_v11 = vcombine.high %v2148_v17, %v2152_v51 }
 0x639   :  { %5546 = vmatpush2.bf16.msra.mxu0 %v6231_v5  ;;  %v2140_v5 = vld [vmem:[#allocation7 + $0x498] sm:$0xff] }
 0x63a   :  { %5587 = vmatpush2.bf16.msra.mxu1 %v6359_v15  ;;  %5547 = vmatprep.subr.bf16.mxu0 %v6224_v42  ;;  %v2144_v15 = vld [vmem:[#allocation7 + $0x4b8] sm:$0xff]  ;;  %v5929_v42 = vcombine.low %v2020_v63, %v2024_v40 }
 0x63b   :  { %5588 = vmatprep.subr.bf16.mxu1 %v6352_v22  ;;  %v6057_v22 = vcombine.low %v2148_v17, %v2152_v51  ;;  %v6050_v45 = vcombine.high %v2140_v5, %v2144_v15  ;;  %v2228_v63 = vld [vmem:[#allocation7 + $0x758] sm:$0xff] }
 0x63c   :  { %v2232_v40 = vld [vmem:[#allocation7 + $0x778] sm:$0xff] }
 0x63d   :  { %5548 = vmatpush2.bf16.msra.mxu0 %v6223_v56  ;;  %v2132_v56 = vld [vmem:[#allocation7 + $0x458] sm:$0xff] }
 0x63e   :  { %5589 = vmatpush2.bf16.msra.mxu1 %v6351_v46  ;;  %5599 = vmatprep.subr.bf16.mxu0 %v5962_v6  ;;  %v2136_v46 = vld [vmem:[#allocation7 + $0x478] sm:$0xff]  ;;  %v5921_v6 = vcombine.low %v2012_v58, %v2016_v19 }
 0x63f   :  { %5640 = vmatprep.subr.bf16.mxu1 %v6090_v38  ;;  %v6049_v38 = vcombine.low %v2140_v5, %v2144_v15  ;;  %v6042_v18 = vcombine.high %v2132_v56, %v2136_v46  ;;  %v2220_v58 = vld [vmem:[#allocation7 + $0x718] sm:$0xff]  ;;  %v6137_v15 = vcombine.low %v2228_v63, %v2232_v40 }
 0x640   :  { %v7728_v43 = vpop.f32.mrf.mxu0  ;;  %5550 = vmatmul.mubr.bf16.vlgmr.msra.gmra.mxu0 %v7690_v62  ;;  %v2224_v19 = vld [vmem:[#allocation7 + $0x738] sm:$0xff] }
 0x641   :  { %v7731_v14 = vpop.f32.mrf.mxu1  ;;  %5591 = vmatmul.mubr.bf16.vlgmr.msra.gmra.mxu1 %v7694_v20  ;;  %5600 = vmatpush1.bf16.msra.mxu0 %v5961_v37  ;;  %v1996_v37 = vld [vmem:[#allocation7 + $0x18] sm:$0xff] }
 0x642   :  { %5631 = vmatprep.mubr.bf16.mxu0 %v7578_v32  ;;  %5641 = vmatpush1.bf16.msra.mxu1 %v6089_v34  ;;  %v7735_v9 = vpop.f32.mrf.mxu0  ;;  %v5945_v32 = vcombine.low %v2036_v10, %v2040_v4  ;;  %v2128_v34 = vld [vmem:[#allocation7 + $0x438] sm:$0xff]  ;;  %v6041_v10 = vcombine.low %v2132_v56, %v2136_v46  ;;  %v5906_v4 = vcombine.high %v1996_v37, %v2000_v3 }
 0x643   :  { %5672 = vmatprep.mubr.bf16.mxu1 %v7580_v13  ;;  %v7738_v24 = vpop.f32.mrf.mxu1  ;;  %5601 = vmatprep.subr.bf16.mxu0 %v5954_v31  ;;  %v6066_v13 = vcombine.high %v2156_v47, %v2160_v50  ;;  %v5913_v31 = vcombine.low %v2004_v23, %v2008_v55  ;;  %v2112_v47 = vld [vmem:[#allocation7 + $0x3b8] sm:$0xff]  ;;  %v6129_v46 = vcombine.low %v2220_v58, %v2224_v19 }
 0x644   :  { %v5309_v29 = vpop.f32.mrf.mxu0  ;;  %5642 = vmatprep.subr.bf16.mxu1 %v6082_v35  ;;  %v6034_v35 = vcombine.high %v2124_v60, %v2128_v34  ;;  %v2236_v50 = vld [vmem:[#allocation7 + $0x798] sm:$0xff] }
 0x645   :  { %v5350_v41 = vpop.f32.mrf.mxu1  ;;  %5602 = vmatpush1.bf16.msra.mxu0 %v5953_v16  ;;  %v2244_v16 = vld [vmem:[#allocation7 + $0x7d8] sm:$0xff] }
 0x646   :  { %5643 = vmatpush1.bf16.msra.mxu1 %v6081_v2  ;;  %v5310_v7 = vpop.f32.mrf.mxu0  ;;  %5603 = vmatprep.subr.bf16.mxu0 %v5946_v27  ;;  %v2248_v2 = vld [vmem:[#allocation7 + $0x7f8] sm:$0xff]  ;;  %v5905_v27 = vcombine.low %v1996_v37, %v2000_v3 }
 0x647   :  { %v5351_v48 = vpop.f32.mrf.mxu1  ;;  %5644 = vmatprep.subr.bf16.mxu1 %v6074_v25  ;;  %v6033_v25 = vcombine.low %v2124_v60, %v2128_v34  ;;  %v6154_v26 = vcombine.high %v2244_v16, %v2248_v2  ;;  %v2108_v29 = vld [vmem:[#allocation7 + $0x398] sm:$0xff]  ;;  %v6153_v7 = vcombine.low %v2244_v16, %v2248_v2 }
 0x648   :  { %v2240_v41 = vld [vmem:[#allocation7 + $0x7b8] sm:$0xff]  ;;  %v6017_v17 = vcombine.low %v2108_v29, %v2112_v47 }
 0x649   :  { %5604 = vmatpush1.bf16.msra.mxu0 %v5945_v32  ;;  %v6025_v32 = vcombine.low %v2116_v1, %v2120_v21  ;;  %v2100_v48 = vld [vmem:[#allocation7 + $0x358] sm:$0xff]  ;;  %v6145_v51 = vcombine.low %v2236_v50, %v2240_v41 }
 0x64a   :  { %5645 = vmatpush1.bf16.msra.mxu1 %v6073_v53  ;;  %5605 = vmatprep.subr.bf16.mxu0 %v5938_v28  ;;  %v6018_v53 = vcombine.high %v2108_v29, %v2112_v47  ;;  %v6146_v28 = vcombine.high %v2236_v50, %v2240_v41  ;;  %v2212_v23 = vld [vmem:[#allocation7 + $0x6d8] sm:$0xff] }
 0x64b   :  { %5646 = vmatprep.subr.bf16.mxu1 %v6066_v13  ;;  %v2104_v13 = vld [vmem:[#allocation7 + $0x378] sm:$0xff] }
 0x64c   :  { %v6009_v5 = vcombine.low %v2100_v48, %v2104_v13  ;;  %v2216_v55 = vld [vmem:[#allocation7 + $0x6f8] sm:$0xff] }
 0x64d   :  { %5606 = vmatpush1.bf16.msra.mxu0 %v5937_v30  ;;  %v6010_v30 = vcombine.high %v2100_v48, %v2104_v13  ;;  %v2204_v37 = vld [vmem:[#allocation7 + $0x698] sm:$0xff]  ;;  %v6121_v34 = vcombine.low %v2212_v23, %v2216_v55 }
 0x64e   :  { %5647 = vmatpush1.bf16.msra.mxu1 %v6065_v59  ;;  %5607 = vmatprep.subr.bf16.mxu0 %v5930_v44  ;;  %v6138_v59 = vcombine.high %v2228_v63, %v2232_v40  ;;  %v2092_v44 = vld [vmem:[#allocation7 + $0x318] sm:$0xff] }
 0x64f   :  { %5648 = vmatprep.subr.bf16.mxu1 %v6058_v11  ;;  %v2096_v11 = vld [vmem:[#allocation7 + $0x338] sm:$0xff] }
 0x650   :  { %v6001_v56 = vcombine.low %v2092_v44, %v2096_v11  ;;  %v2208_v3 = vld [vmem:[#allocation7 + $0x6b8] sm:$0xff] }
 0x651   :  { %5608 = vmatpush1.bf16.msra.mxu0 %v5929_v42  ;;  %v6002_v42 = vcombine.high %v2092_v44, %v2096_v11  ;;  %v2196_v1 = vld [vmem:[#allocation7 + $0x658] sm:$0xff]  ;;  %v6113_v2 = vcombine.low %v2204_v37, %v2208_v3 }
 0x652   :  { %5649 = vmatpush1.bf16.msra.mxu1 %v6057_v22  ;;  %5609 = vmatprep.subr.bf16.mxu0 %v5922_v61  ;;  %v6130_v22 = vcombine.high %v2220_v58, %v2224_v19  ;;  %v2084_v61 = vld [vmem:[#allocation7 + $0x2d8] sm:$0xff] }
 0x653   :  { %5650 = vmatprep.subr.bf16.mxu1 %v6050_v45  ;;  %v2088_v45 = vld [vmem:[#allocation7 + $0x2f8] sm:$0xff] }
 0x654   :  { %v5993_v60 = vcombine.low %v2084_v61, %v2088_v45  ;;  %v2200_v21 = vld [vmem:[#allocation7 + $0x678] sm:$0xff] }
 0x655   :  { %5610 = vmatpush1.bf16.msra.mxu0 %v5921_v6  ;;  %v5994_v6 = vcombine.high %v2084_v61, %v2088_v45  ;;  %v2188_v29 = vld [vmem:[#allocation7 + $0x618] sm:$0xff]  ;;  %v6105_v41 = vcombine.low %v2196_v1, %v2200_v21 }
 0x656   :  { %5651 = vmatpush1.bf16.msra.mxu1 %v6049_v38  ;;  %5611 = vmatprep.subr.bf16.mxu0 %v5914_v49  ;;  %v6122_v38 = vcombine.high %v2212_v23, %v2216_v55  ;;  %v2076_v49 = vld [vmem:[#allocation7 + $0x298] sm:$0xff] }
 0x657   :  { %5652 = vmatprep.subr.bf16.mxu1 %v6042_v18  ;;  %v2080_v18 = vld [vmem:[#allocation7 + $0x2b8] sm:$0xff] }
 0x658   :  { %v5985_v16 = vcombine.low %v2076_v49, %v2080_v18  ;;  %v2192_v47 = vld [vmem:[#allocation7 + $0x638] sm:$0xff] }
 0x659   :  { %5612 = vmatpush1.bf16.msra.mxu0 %v5913_v31  ;;  %v5986_v31 = vcombine.high %v2076_v49, %v2080_v18  ;;  %v6098_v48 = vcombine.high %v2188_v29, %v2192_v47  ;;  %v2308_v13 = vld [vmem:[#allocation7 + $0x9d8] sm:$0xff]  ;;  %v6097_v44 = vcombine.low %v2188_v29, %v2192_v47 }
 0x65a   :  { %5653 = vmatpush1.bf16.msra.mxu1 %v6041_v10  ;;  %5613 = vmatprep.subr.bf16.mxu0 %v5906_v4  ;;  %v6114_v10 = vcombine.high %v2204_v37, %v2208_v3  ;;  %v2068_v4 = vld [vmem:[#allocation7 + $0x258] sm:$0xff] }
 0x65b   :  { %5654 = vmatprep.subr.bf16.mxu1 %v6034_v35  ;;  %v2072_v35 = vld [vmem:[#allocation7 + $0x278] sm:$0xff] }
 0x65c   :  { %v5977_v50 = vcombine.low %v2068_v4, %v2072_v35  ;;  %v2312_v63 = vld [vmem:[#allocation7 + $0x9f8] sm:$0xff] }
 0x65d   :  { %5614 = vmatpush1.bf16.msra.mxu0 %v5905_v27  ;;  %v5978_v27 = vcombine.high %v2068_v4, %v2072_v35  ;;  %v2436_v40 = vld [vmem:[#allocation7 + $0xdd8] sm:$0xff]  ;;  %v6218_v11 = vcombine.high %v2308_v13, %v2312_v63 }
 0x65e   :  { %5655 = vmatpush1.bf16.msra.mxu1 %v6033_v25  ;;  %5615 = vmatprep.subr.bf16.mxu0 %v6026_v39  ;;  %v6106_v25 = vcombine.high %v2196_v1, %v2200_v21  ;;  %v2060_v39 = vld [vmem:[#allocation7 + $0x218] sm:$0xff] }
 0x65f   :  { %5656 = vmatprep.subr.bf16.mxu1 %v6154_v26  ;;  %v2064_v26 = vld [vmem:[#allocation7 + $0x238] sm:$0xff] }
 0x660   :  { %v2428_v61 = vld [vmem:[#allocation7 + $0xd98] sm:$0xff] }
 0x661   :  { %5616 = vmatpush2.bf16.msra.mxu0 %v6025_v32  ;;  %v5970_v32 = vcombine.high %v2060_v39, %v2064_v26  ;;  %v2432_v45 = vld [vmem:[#allocation7 + $0xdb8] sm:$0xff] }
 0x662   :  { %5657 = vmatpush2.bf16.msra.mxu1 %v6153_v7  ;;  %5617 = vmatprep.subr.bf16.mxu0 %v6018_v53  ;;  %v7740_v7 = vld [vmem:[#allocation8] sm:$0xff]  ;;  %v7861_v53 = vsub.s32 2, %v7858_v33  ;;  %v2420_v49 = vld [vmem:[#allocation7 + $0xd58] sm:$0xff] }
 0x663   :  { %5658 = vmatprep.subr.bf16.mxu1 %v6146_v28  ;;  %v2424_v18 = vld [vmem:[#allocation7 + $0xd78] sm:$0xff] }
 0x664   :  { %v2518_v28 = vrot.slane %v7740_v7, %v7861_v53  ;;  %v6330_v4 = vcombine.high %v2420_v49, %v2424_v18  ;;  %v2284_v35 = vld [vmem:[#allocation7 + $0x918] sm:$0xff] }
 0x665   :  { %5618 = vmatpush2.bf16.msra.mxu0 %v6017_v17  ;;  %v2440_v17 = vld [vmem:[#allocation7 + $0xdf8] sm:$0xff] }
 0x666   :  { %5659 = vmatpush2.bf16.msra.mxu1 %v6145_v51  ;;  %5619 = vmatprep.subr.bf16.mxu0 %v6010_v30  ;;  %v7862_v51 = vsub.s32 3, %v7858_v33  ;;  %v5306_v58 = vadd.f32 %v7728_v43, %v2518_v28  ;;  %v6346_v19 = vcombine.high %v2436_v40, %v2440_v17  ;;  %v6345_v23 = vcombine.low %v2436_v40, %v2440_v17  ;;  %v2412_v21 = vld [vmem:[#allocation7 + $0xd18] sm:$0xff]  ;;  %v7863_v28 = vld [vmem:[#allocation16_spill] sm:$0xff] }
 0x667   :  { %5660 = vmatprep.subr.bf16.mxu1 %v6138_v59  ;;  %v5969_v59 = vcombine.low %v2060_v39, %v2064_v26  ;;  %v6329_v39 = vcombine.low %v2420_v49, %v2424_v18  ;;  %v2408_v53 = vld [vmem:[#allocation7 + $0xcf8] sm:$0xff] }
 0x668   :  { %v2522_v30 = vrot.slane %v7740_v7, %v7862_v51  ;;  %v5347_v55 = vadd.f32 %v7731_v14, %v5306_v58  ;;  %v2400_v58 = vld [vmem:[#allocation7 + $0xcb8] sm:$0xff] }
 0x669   :  { %5620 = vmatpush2.bf16.msra.mxu0 %v6009_v5  ;;  %v2300_v5 = vld [vmem:[#allocation7 + $0x998] sm:$0xff] }
 0x66a   :  { %5661 = vmatpush2.bf16.msra.mxu1 %v6137_v15  ;;  %5621 = vmatprep.subr.bf16.mxu0 %v6002_v42  ;;  %v2304_v15 = vld [vmem:[#allocation7 + $0x9b8] sm:$0xff]  ;;  %v5308_v42 = vadd.f32 %v7735_v9, %v2522_v30 }
 0x66b   :  { %5662 = vmatprep.subr.bf16.mxu1 %v6130_v22  ;;  %v6217_v22 = vcombine.low %v2308_v13, %v2312_v63  ;;  %v2268_v30 = vld [vmem:[#allocation7 + $0x898] sm:$0xff] }
 0x66c   :  { %v5349_v9 = vadd.f32 %v7738_v24, %v5308_v42  ;;  %v2288_v24 = vld [vmem:[#allocation7 + $0x938] sm:$0xff] }
 0x66d   :  { %5622 = vmatpush2.bf16.msra.mxu0 %v6001_v56  ;;  %v6210_v56 = vcombine.high %v2300_v5, %v2304_v15  ;;  %v6193_v63 = vcombine.low %v2284_v35, %v2288_v24  ;;  %v2388_v42 = vld [vmem:[#allocation7 + $0xc58] sm:$0xff] }
 0x66e   :  { %5663 = vmatpush2.bf16.msra.mxu1 %v6129_v46  ;;  %5623 = vmatprep.subr.bf16.mxu0 %v5994_v6  ;;  %v2292_v46 = vld [vmem:[#allocation7 + $0x958] sm:$0xff] }
 0x66f   :  { %5664 = vmatprep.subr.bf16.mxu1 %v6122_v38  ;;  %v2296_v6 = vld [vmem:[#allocation7 + $0x978] sm:$0xff]  ;;  %v6338_v38 = vcombine.high %v2428_v61, %v2432_v45 }
 0x671   :  { %5624 = vmatpush2.bf16.msra.mxu0 %v5993_v60  ;;  %v6209_v60 = vcombine.low %v2300_v5, %v2304_v15  ;;  %v2260_v5 = vld [vmem:[#allocation7 + $0x858] sm:$0xff] }
 0x672   :  { %5665 = vmatpush2.bf16.msra.mxu1 %v6121_v34  ;;  %5625 = vmatprep.subr.bf16.mxu0 %v5986_v31  ;;  %v6337_v34 = vcombine.low %v2428_v61, %v2432_v45  ;;  %v6202_v31 = vcombine.high %v2292_v46, %v2296_v6  ;;  %v2264_v15 = vld [vmem:[#allocation7 + $0x878] sm:$0xff] }
 0x673   :  { %5666 = vmatprep.subr.bf16.mxu1 %v6114_v10 }
 0x675   :  { %5626 = vmatpush2.bf16.msra.mxu0 %v5985_v16 }
 0x676   :  { %5667 = vmatpush2.bf16.msra.mxu1 %v6113_v2  ;;  %5627 = vmatprep.subr.bf16.mxu0 %v5978_v27 }
 0x677   :  { %5668 = vmatprep.subr.bf16.mxu1 %v6106_v25 }
 0x679   :  { %5628 = vmatpush2.bf16.msra.mxu0 %v5977_v50  ;;  %v2276_v50 = vld [vmem:[#allocation7 + $0x8d8] sm:$0xff] }
 0x67a   :  { %5669 = vmatpush2.bf16.msra.mxu1 %v6105_v41  ;;  %5629 = vmatprep.subr.bf16.mxu0 %v5970_v32  ;;  %v2280_v41 = vld [vmem:[#allocation7 + $0x8f8] sm:$0xff] }
 0x67b   :  { %5670 = vmatprep.subr.bf16.mxu1 %v6098_v48  ;;  %v2404_v32 = vld [vmem:[#allocation7 + $0xcd8] sm:$0xff]  ;;  %v5779_v48 = vrot.slane %v5771_v54, %v7863_v28  ;;  %v6186_v17 = vcombine.high %v2276_v50, %v2280_v41 }
 0x67c   :  { %v6314_v51 = vcombine.high %v2404_v32, %v2408_v53  ;;  %v6313_v52 = vcombine.low %v2404_v32, %v2408_v53  ;;  %v2476_v32 = vld [vmem:[#allocation7 + $0xf18] sm:$0xff] }
 0x67d   :  { %5630 = vmatpush2.bf16.msra.mxu0 %v5969_v59  ;;  %v2272_v59 = vld [vmem:[#allocation7 + $0x8b8] sm:$0xff] }
 0x67e   :  { %5671 = vmatpush2.bf16.msra.mxu1 %v6097_v44  ;;  %5681 = vmatprep.subr.bf16.mxu0 %v6218_v11  ;;  %v2396_v11 = vld [vmem:[#allocation7 + $0xc98] sm:$0xff]  ;;  %v6178_v0 = vcombine.high %v2268_v30, %v2272_v59  ;;  %v6177_v61 = vcombine.low %v2268_v30, %v2272_v59 }
 0x67f   :  { %5722 = vmatprep.subr.bf16.mxu1 %v6346_v19  ;;  %v6185_v19 = vcombine.low %v2276_v50, %v2280_v41  ;;  %v6306_v54 = vcombine.high %v2396_v11, %v2400_v58  ;;  %v6305_v45 = vcombine.low %v2396_v11, %v2400_v58  ;;  %v2348_v50 = vld [vmem:[#allocation7 + $0xb18] sm:$0xff] }
 0x680   :  { %v5387_v43 = vpop.f32.mrf.mxu0  ;;  %5632 = vmatmul.mubr.bf16.vlgmr.msra.gmra.mxu0 %v7582_v36  ;;  %v2352_v41 = vld [vmem:[#allocation7 + $0xb38] sm:$0xff] }
 0x681   :  { %v5388_v37 = vadd.f32 %v5387_v43, %v5347_v55  ;;  %v5428_v3 = vpop.f32.mrf.mxu1  ;;  %5673 = vmatmul.mubr.bf16.vlgmr.msra.gmra.mxu1 %v7584_v57  ;;  %5682 = vmatpush1.bf16.msra.mxu0 %v6217_v22  ;;  %v2416_v57 = vld [vmem:[#allocation7 + $0xd38] sm:$0xff] }
 0x682   :  { %5713 = vmatprep.mubr.bf16.mxu0 %v7618_v12  ;;  %5723 = vmatpush1.bf16.msra.mxu1 %v6345_v23  ;;  %v5389_v14 = vpop.f32.mrf.mxu0  ;;  %v6201_v12 = vcombine.low %v2292_v46, %v2296_v6  ;;  %v6322_v47 = vcombine.high %v2412_v21, %v2416_v57  ;;  %v6321_v40 = vcombine.low %v2412_v21, %v2416_v57  ;;  %v2392_v22 = vld [vmem:[#allocation7 + $0xc78] sm:$0xff] }
 0x683   :  { %5754 = vmatprep.mubr.bf16.mxu1 %v7681_v8  ;;  %v5390_v36 = vadd.f32 %v5389_v14, %v5349_v9  ;;  %v5430_v10 = vpop.f32.mrf.mxu1  ;;  %5683 = vmatprep.subr.bf16.mxu0 %v6210_v56  ;;  %v5429_v16 = vadd.f32 %v5428_v3, %v5388_v37  ;;  %v6194_v8 = vcombine.high %v2284_v35, %v2288_v24  ;;  %v2252_v56 = vld [vmem:[#allocation7 + $0x818] sm:$0xff] }
 0x684   :  { %v5391_v1 = vpop.f32.mrf.mxu0  ;;  %5724 = vmatprep.subr.bf16.mxu1 %v6338_v38  ;;  %v6170_v23 = vcombine.high %v2260_v5, %v2264_v15  ;;  %v6298_v55 = vcombine.high %v2388_v42, %v2392_v22  ;;  %v2256_v46 = vld [vmem:[#allocation7 + $0x838] sm:$0xff]  ;;  %v6169_v38 = vcombine.low %v2260_v5, %v2264_v15  ;;  %v6297_v49 = vcombine.low %v2388_v42, %v2392_v22 }
 0x685   :  { %v5431_v2 = vadd.f32 %v5430_v10, %v5390_v36  ;;  %v5432_v27 = vpop.f32.mrf.mxu1  ;;  %5684 = vmatpush1.bf16.msra.mxu0 %v6209_v60  ;;  %v2380_v6 = vld [vmem:[#allocation7 + $0xc18] sm:$0xff]  ;;  %v6162_v18 = vcombine.high %v2252_v56, %v2256_v46 }
 0x686   :  { %5725 = vmatpush1.bf16.msra.mxu1 %v6337_v34  ;;  %v5392_v25 = vpop.f32.mrf.mxu0  ;;  %5685 = vmatprep.subr.bf16.mxu0 %v6202_v31  ;;  %v2384_v43 = vld [vmem:[#allocation7 + $0xc38] sm:$0xff]  ;;  %v6161_v34 = vcombine.low %v2252_v56, %v2256_v46 }
 0x687   :  { %v5772_v26 = vcombine.low %v5429_v16, %v5431_v2  ;;  %v5433_v29 = vpop.f32.mrf.mxu1  ;;  %5726 = vmatprep.subr.bf16.mxu1 %v6330_v4  ;;  %v6290_v9 = vcombine.high %v2380_v6, %v2384_v43  ;;  %v2372_v37 = vld [vmem:[#allocation7 + $0xbd8] sm:$0xff]  ;;  %v6289_v31 = vcombine.low %v2380_v6, %v2384_v43 }
 0x688   :  { %v2376_v3 = vld [vmem:[#allocation7 + $0xbf8] sm:$0xff] }
 0x689   :  { %v5786_v13 = vrot.slane %v5772_v26, %v7863_v28  ;;  %5686 = vmatpush1.bf16.msra.mxu0 %v6201_v12  ;;  %v2500_v60 = vld [vmem:[#allocation7 + $0xfd8] sm:$0xff]  ;;  %v6282_v36 = vcombine.high %v2372_v37, %v2376_v3  ;;  %v6281_v21 = vcombine.low %v2372_v37, %v2376_v3 }
 0x68a   :  { %5727 = vmatpush1.bf16.msra.mxu1 %v6329_v39  ;;  %5687 = vmatprep.subr.bf16.mxu0 %v6194_v8  ;;  %v2504_v14 = vld [vmem:[#allocation7 + $0xff8] sm:$0xff] }
 0x68b   :  { %5728 = vmatprep.subr.bf16.mxu1 %v6322_v47  ;;  %v5787_v44 = vcombine.low %v5779_v48, %v5786_v13  ;;  %v6410_v10 = vcombine.high %v2500_v60, %v2504_v14  ;;  %v2364_v4 = vld [vmem:[#allocation7 + $0xb98] sm:$0xff]  ;;  %v6409_v57 = vcombine.low %v2500_v60, %v2504_v14 }
 0x68c   :  { %v2368_v35 = vld [vmem:[#allocation7 + $0xbb8] sm:$0xff] }
 0x68d   :  { %5688 = vmatpush1.bf16.msra.mxu0 %v6193_v63  ;;  %5807 = vst [vmem:[#allocation10] sm:$0xff] %v5787_v44  ;;  %v2492_v24 = vld [vmem:[#allocation7 + $0xf98] sm:$0xff]  ;;  %v6274_v16 = vcombine.high %v2364_v4, %v2368_v35  ;;  %v6273_v8 = vcombine.low %v2364_v4, %v2368_v35  ;;  %v6258_v63 = vcombine.high %v2348_v50, %v2352_v41  ;;  %v7865_v35 = vsub.s32 5, %v7858_v33 }
 0x68e   :  { %5729 = vmatpush1.bf16.msra.mxu1 %v6321_v40  ;;  %5689 = vmatprep.subr.bf16.mxu0 %v6186_v17  ;;  %v2496_v1 = vld [vmem:[#allocation7 + $0xfb8] sm:$0xff]  ;;  %v6257_v44 = vcombine.low %v2348_v50, %v2352_v41 }
 0x68f   :  { %5730 = vmatprep.subr.bf16.mxu1 %v6314_v51  ;;  %v6402_v2 = vcombine.high %v2492_v24, %v2496_v1  ;;  %v2356_v27 = vld [vmem:[#allocation7 + $0xb58] sm:$0xff]  ;;  %v6401_v26 = vcombine.low %v2492_v24, %v2496_v1  ;;  %v2530_v24 = vrot.slane %v7740_v7, %v7865_v35 }
 0x690   :  { %v2360_v12 = vld [vmem:[#allocation7 + $0xb78] sm:$0xff] }
 0x691   :  { %5690 = vmatpush1.bf16.msra.mxu0 %v6185_v19  ;;  %v2484_v25 = vld [vmem:[#allocation7 + $0xf58] sm:$0xff]  ;;  %v6266_v29 = vcombine.high %v2356_v27, %v2360_v12  ;;  %v6265_v48 = vcombine.low %v2356_v27, %v2360_v12 }
 0x692   :  { %5731 = vmatpush1.bf16.msra.mxu1 %v6313_v52  ;;  %5691 = vmatprep.subr.bf16.mxu0 %v6178_v0  ;;  %v2488_v39 = vld [vmem:[#allocation7 + $0xf78] sm:$0xff] }
 0x693   :  { %5732 = vmatprep.subr.bf16.mxu1 %v6306_v54  ;;  %v6394_v47 = vcombine.high %v2484_v25, %v2488_v39  ;;  %v2480_v53 = vld [vmem:[#allocation7 + $0xf38] sm:$0xff]  ;;  %v6393_v13 = vcombine.low %v2484_v25, %v2488_v39 }
 0x694   :  { %v6386_v40 = vcombine.high %v2476_v32, %v2480_v53  ;;  %v2340_v17 = vld [vmem:[#allocation7 + $0xad8] sm:$0xff]  ;;  %v6385_v11 = vcombine.low %v2476_v32, %v2480_v53 }
 0x695   :  { %5692 = vmatpush1.bf16.msra.mxu0 %v6177_v61  ;;  %v2344_v51 = vld [vmem:[#allocation7 + $0xaf8] sm:$0xff] }
 0x696   :  { %5733 = vmatpush1.bf16.msra.mxu1 %v6305_v45  ;;  %5693 = vmatprep.subr.bf16.mxu0 %v6170_v23  ;;  %v2468_v30 = vld [vmem:[#allocation7 + $0xed8] sm:$0xff]  ;;  %v6250_v58 = vcombine.high %v2340_v17, %v2344_v51  ;;  %v6249_v15 = vcombine.low %v2340_v17, %v2344_v51 }
 0x697   :  { %5734 = vmatprep.subr.bf16.mxu1 %v6298_v55  ;;  %v2472_v59 = vld [vmem:[#allocation7 + $0xef8] sm:$0xff] }
 0x698   :  { %v6378_v19 = vcombine.high %v2468_v30, %v2472_v59  ;;  %v2332_v52 = vld [vmem:[#allocation7 + $0xa98] sm:$0xff]  ;;  %v6377_v42 = vcombine.low %v2468_v30, %v2472_v59 }
 0x699   :  { %5694 = vmatpush1.bf16.msra.mxu0 %v6169_v38  ;;  %v2336_v0 = vld [vmem:[#allocation7 + $0xab8] sm:$0xff] }
 0x69a   :  { %5735 = vmatpush1.bf16.msra.mxu1 %v6297_v49  ;;  %5695 = vmatprep.subr.bf16.mxu0 %v6162_v18  ;;  %v2460_v54 = vld [vmem:[#allocation7 + $0xe98] sm:$0xff]  ;;  %v6242_v22 = vcombine.high %v2332_v52, %v2336_v0  ;;  %v6241_v46 = vcombine.low %v2332_v52, %v2336_v0 }
 0x69b   :  { %5736 = vmatprep.subr.bf16.mxu1 %v6290_v9  ;;  %v2464_v5 = vld [vmem:[#allocation7 + $0xeb8] sm:$0xff] }
 0x69c   :  { %v6370_v61 = vcombine.high %v2460_v54, %v2464_v5  ;;  %v2324_v45 = vld [vmem:[#allocation7 + $0xa58] sm:$0xff]  ;;  %v6369_v6 = vcombine.low %v2460_v54, %v2464_v5  ;;  %v7866_v54 = vsub.s32 6, %v7858_v33 }
 0x69d   :  { %5696 = vmatpush1.bf16.msra.mxu0 %v6161_v34  ;;  %v2328_v23 = vld [vmem:[#allocation7 + $0xa78] sm:$0xff] }
 0x69e   :  { %5737 = vmatpush1.bf16.msra.mxu1 %v6289_v31  ;;  %5697 = vmatprep.subr.bf16.mxu0 %v6282_v36  ;;  %v2452_v55 = vld [vmem:[#allocation7 + $0xe58] sm:$0xff]  ;;  %v6234_v43 = vcombine.high %v2324_v45, %v2328_v23  ;;  %v6233_v3 = vcombine.low %v2324_v45, %v2328_v23  ;;  %v2534_v5 = vrot.slane %v7740_v7, %v7866_v54 }
 0x69f   :  { %5738 = vmatprep.subr.bf16.mxu1 %v6410_v10  ;;  %v2456_v56 = vld [vmem:[#allocation7 + $0xe78] sm:$0xff]  ;;  %v7864_v10 = vsub.s32 4, %v7858_v33 }
 0x6a0   :  { %v6362_v38 = vcombine.high %v2452_v55, %v2456_v56  ;;  %v2316_v49 = vld [vmem:[#allocation7 + $0xa18] sm:$0xff]  ;;  %v6361_v60 = vcombine.low %v2452_v55, %v2456_v56 }
 0x6a1   :  { %5698 = vmatpush2.bf16.msra.mxu0 %v6281_v21  ;;  %v2320_v18 = vld [vmem:[#allocation7 + $0xa38] sm:$0xff]  ;;  %v2526_v4 = vrot.slane %v7740_v7, %v7864_v10 }
 0x6a2   :  { %5739 = vmatpush2.bf16.msra.mxu1 %v6409_v57  ;;  %5699 = vmatprep.subr.bf16.mxu0 %v6274_v16  ;;  %v2444_v9 = vld [vmem:[#allocation7 + $0xe18] sm:$0xff]  ;;  %v6226_v14 = vcombine.high %v2316_v49, %v2320_v18  ;;  %v6225_v31 = vcombine.low %v2316_v49, %v2320_v18 }
 0x6a3   :  { %5740 = vmatprep.subr.bf16.mxu1 %v6402_v2  ;;  %v2448_v37 = vld [vmem:[#allocation7 + $0xe38] sm:$0xff] }
 0x6a4   :  { %v6354_v34 = vcombine.high %v2444_v9, %v2448_v37  ;;  %v6353_v36 = vcombine.low %v2444_v9, %v2448_v37 }
 0x6a5   :  { %5700 = vmatpush2.bf16.msra.mxu0 %v6273_v8 }
 0x6a6   :  { %5741 = vmatpush2.bf16.msra.mxu1 %v6401_v26  ;;  %5701 = vmatprep.subr.bf16.mxu0 %v6266_v29 }
 0x6a7   :  { %5742 = vmatprep.subr.bf16.mxu1 %v6394_v47 }
 0x6a9   :  { %5702 = vmatpush2.bf16.msra.mxu0 %v6265_v48 }
 0x6aa   :  { %5743 = vmatpush2.bf16.msra.mxu1 %v6393_v13  ;;  %5703 = vmatprep.subr.bf16.mxu0 %v6258_v63 }
 0x6ab   :  { %5744 = vmatprep.subr.bf16.mxu1 %v6386_v40 }
 0x6ad   :  { %5704 = vmatpush2.bf16.msra.mxu0 %v6257_v44 }
 0x6ae   :  { %5745 = vmatpush2.bf16.msra.mxu1 %v6385_v11  ;;  %5705 = vmatprep.subr.bf16.mxu0 %v6250_v58 }
 0x6af   :  { %5746 = vmatprep.subr.bf16.mxu1 %v6378_v19 }
 0x6b1   :  { %5706 = vmatpush2.bf16.msra.mxu0 %v6249_v15  ;;  %v7867_v15 = vsub.s32 7, %v7858_v33 }
 0x6b2   :  { %5747 = vmatpush2.bf16.msra.mxu1 %v6377_v42  ;;  %5707 = vmatprep.subr.bf16.mxu0 %v6242_v22 }
 0x6b3   :  { %5748 = vmatprep.subr.bf16.mxu1 %v6370_v61  ;;  %v2538_v42 = vrot.slane %v7740_v7, %v7867_v15 }
 0x6b5   :  { %5708 = vmatpush2.bf16.msra.mxu0 %v6241_v46 }
 0x6b6   :  { %5749 = vmatpush2.bf16.msra.mxu1 %v6369_v6  ;;  %5709 = vmatprep.subr.bf16.mxu0 %v6234_v43 }
 0x6b7   :  { %5750 = vmatprep.subr.bf16.mxu1 %v6362_v38 }
 0x6b9   :  { %5710 = vmatpush2.bf16.msra.mxu0 %v6233_v3 }
 0x6ba   :  { %5751 = vmatpush2.bf16.msra.mxu1 %v6361_v60  ;;  %5711 = vmatprep.subr.bf16.mxu0 %v6226_v14 }
 0x6bb   :  { %5752 = vmatprep.subr.bf16.mxu1 %v6354_v34 }
 0x6bd   :  { %5712 = vmatpush2.bf16.msra.mxu0 %v6225_v31 }
 0x6be   :  { %5753 = vmatpush2.bf16.msra.mxu1 %v6353_v36 }
 0x6c0   :  { %v5469_v1 = vpop.f32.mrf.mxu0  ;;  %5714 = vmatmul.mubr.bf16.vlgmr.msra.gmra.mxu0 %v7690_v62 }
 0x6c1   :  { %v5470_v21 = vadd.f32 %v5469_v1, %v2526_v4  ;;  %v5510_v57 = vpop.f32.mrf.mxu1  ;;  %5755 = vmatmul.mubr.bf16.vlgmr.msra.gmra.mxu1 %v7694_v20 }
 0x6c2   :  { %v5471_v16 = vpop.f32.mrf.mxu0 }
 0x6c3   :  { %v5511_v2 = vadd.f32 %v5510_v57, %v5470_v21  ;;  %v5472_v27 = vadd.f32 %v5471_v16, %v2530_v24  ;;  %v5512_v12 = vpop.f32.mrf.mxu1 }
 0x6c4   :  { %v5473_v25 = vpop.f32.mrf.mxu0 }
 0x6c5   :  { %v5513_v39 = vadd.f32 %v5512_v12, %v5472_v27  ;;  %v5514_v8 = vpop.f32.mrf.mxu1 }
 0x6c6   :  { %v5474_v26 = vpop.f32.mrf.mxu0 }
 0x6c7   :  { %v5515_v29 = vpop.f32.mrf.mxu1 }
 0x700   :  { %v5551_v47 = vpop.f32.mrf.mxu0 }
 0x701   :  { %v5552_v50 = vadd.f32 %v5551_v47, %v5511_v2  ;;  %v5592_v41 = vpop.f32.mrf.mxu1 }
 0x702   :  { %v5553_v32 = vpop.f32.mrf.mxu0 }
 0x703   :  { %v5593_v53 = vadd.f32 %v5592_v41, %v5552_v50  ;;  %v5554_v48 = vadd.f32 %v5553_v32, %v5513_v39  ;;  %v5594_v62 = vpop.f32.mrf.mxu1 }
 0x704   :  { %v5555_v13 = vpop.f32.mrf.mxu0 }
 0x705   :  { %v5595_v63 = vadd.f32 %v5594_v62, %v5554_v48  ;;  %v5596_v40 = vpop.f32.mrf.mxu1 }
 0x706   :  { %v5556_v20 = vpop.f32.mrf.mxu0 }
 0x707   :  { %v5788_v17 = vcombine.low %v5593_v53, %v5595_v63  ;;  %v5597_v51 = vpop.f32.mrf.mxu1 }
 0x709   :  { %v5796_v33 = vrot.slane %v5788_v17, %v7863_v28 }
 0x740   :  { %v5633_v30 = vpop.f32.mrf.mxu0 }
 0x741   :  { %v5674_v59 = vpop.f32.mrf.mxu1  ;;  %v5634_v22 = vadd.f32 %v5633_v30, %v2534_v5 }
 0x742   :  { %v5635_v44 = vpop.f32.mrf.mxu0 }
 0x743   :  { %v5676_v11 = vpop.f32.mrf.mxu1  ;;  %v5636_v61 = vadd.f32 %v5635_v44, %v2538_v42  ;;  %v5675_v45 = vadd.f32 %v5674_v59, %v5634_v22 }
 0x744   :  { %v5637_v58 = vpop.f32.mrf.mxu0 }
 0x745   :  { %v5678_v19 = vpop.f32.mrf.mxu1  ;;  %v5677_v55 = vadd.f32 %v5676_v11, %v5636_v61 }
 0x746   :  { %v5638_v52 = vpop.f32.mrf.mxu0 }
 0x747   :  { %v5679_v0 = vpop.f32.mrf.mxu1 }
 0x780   :  { %v5715_v23 = vpop.f32.mrf.mxu0 }
 0x781   :  { %v5716_v56 = vadd.f32 %v5715_v23, %v5675_v45  ;;  %v5756_v46 = vpop.f32.mrf.mxu1 }
 0x782   :  { %v5717_v6 = vpop.f32.mrf.mxu0 }
 0x783   :  { %v5718_v43 = vadd.f32 %v5717_v6, %v5677_v55  ;;  %v5758_v38 = vpop.f32.mrf.mxu1  ;;  %v5757_v18 = vadd.f32 %v5756_v46, %v5716_v56 }
 0x784   :  { %v5719_v49 = vpop.f32.mrf.mxu0 }
 0x785   :  { %v5759_v9 = vadd.f32 %v5758_v38, %v5718_v43  ;;  %v5760_v37 = vpop.f32.mrf.mxu1 }
 0x786   :  { %v5720_v3 = vpop.f32.mrf.mxu0 }
 0x787   :  { %v5789_v60 = vcombine.low %v5757_v18, %v5759_v9  ;;  %v5761_v14 = vpop.f32.mrf.mxu1 }
 0x789   :  { %v5803_v7 = vrot.slane %v5789_v60, %v7863_v28 }
 0x78b   :  { %v5804_v34 = vcombine.low %v5796_v33, %v5803_v7 }
 0x78d   :  { %5808 = vst [vmem:[#allocation10 + $0x8] sm:$0xff] %v5804_v34 }
 0x78e   :  { %6731 = shalt.err (!%p6728_p10)
}
 0x78f   :  { %5818 = dma.vmem_to_hbm [thread:$0]  %s5816_s27, 256, %s7785_s5, [#allocation4]  }
 0x790   :  { %6746 = dma.done.wait [#allocation4], 256  }
 0x791   :  { %6747 = vsyncadd [#allocation4], 4294967040 }
 0x792   :  { %5822 = vsyncpa [#allocation3], 1 }
 0x793   :  { %5823 = vsyncpa [#allocation6], 1 }
 0x794   :  { %5824 = vsyncpa [#allocation9], 1 }
 0x795   :  { %5825 = vsyncpa [#allocation4], 1 }

</bundles_post_ra>
